<compile_context>
chip_gen: v5e
topology: v5e:2x2
jax: 0.10.0
libtpu: 0.0.40
codegen_flags: <defaults>
</compile_context>

<pallas_src>
import math
from functools import partial

import jax
import jax.numpy as jnp
from jax import lax
from jax.experimental import pallas as pl
from jax.experimental.pallas import tpu as pltpu


WDTYPE = jnp.bfloat16      # matmul-input / weight dtype; accumulation stays f32
LN_EPS = 1e-5              # PyTorch LayerNorm default


def _bf(x):
    return x.astype(WDTYPE)


def _ln(x, g, b):
    mu = jnp.mean(x, axis=-1, keepdims=True)
    var = jnp.mean((x - mu) ** 2, axis=-1, keepdims=True)
    return (x - mu) * lax.rsqrt(var + LN_EPS) * g + b


def _attention(q_all, k_all, v_all, nhead, w_out, b_out):
    """Multi-head attention + output projection, all in-kernel.

    q_all: (Sq, D) f32, k_all/v_all: (Sk, D) f32, w_out: (D, D) bf16,
    b_out: (1, D) f32.  Output projection is folded into the per-head loop:
        concat(heads) @ W_out == sum_h head_h @ W_out[h*hd:(h+1)*hd, :]
    """
    Sq, D = q_all.shape
    hd = D // nhead
    scale = 1.0 / math.sqrt(hd)
    out = jnp.zeros((Sq, D), jnp.float32) + b_out
    for h in range(nhead):
        sl = slice(h * hd, (h + 1) * hd)
        q = _bf(q_all[:, sl])
        k = _bf(k_all[:, sl])
        v = _bf(v_all[:, sl])
        # scores = q @ k^T without a physical transpose (contract last dims)
        s = lax.dot_general(q, k, (((1,), (1,)), ((), ())),
                            preferred_element_type=jnp.float32) * scale
        s = s - jnp.max(s, axis=-1, keepdims=True)
        p = jnp.exp(s)
        p = p / jnp.sum(p, axis=-1, keepdims=True)
        o = jnp.dot(_bf(p), v, preferred_element_type=jnp.float32)      # (Sq, hd)
        out = out + jnp.dot(_bf(o), w_out[sl, :],
                            preferred_element_type=jnp.float32)
    return out


# ----------------------------- fused layer kernels ---------------------------

def enc_layer_kernel(*refs, nhead, final_norm):
    if final_norm:
        (x_ref, wqkv, bqkv, wout, bout, g1, be1,
         w1, bf1, w2, bf2, g2, be2, gf, bef, o_ref) = refs
    else:
        (x_ref, wqkv, bqkv, wout, bout, g1, be1,
         w1, bf1, w2, bf2, g2, be2, o_ref) = refs
        gf = bef = None

    x = x_ref[0].astype(jnp.float32)                              # (S, D)
    D = x.shape[-1]

    # fused QKV projection (bf16 MXU inputs, f32 accumulation)
    qkv = jnp.dot(_bf(x), wqkv[...], preferred_element_type=jnp.float32) + bqkv[...]
    attn = _attention(qkv[:, :D], qkv[:, D:2 * D], qkv[:, 2 * D:],
                      nhead, wout[...], bout[...])
    x = _ln(x + attn, g1[...], be1[...])                          # post-norm

    # fused FFN: lin1 + relu + lin2
    h = jnp.dot(_bf(x), w1[...], preferred_element_type=jnp.float32) + bf1[...]
    h = _bf(jnp.maximum(h, 0.0))
    ff = jnp.dot(h, w2[...], preferred_element_type=jnp.float32) + bf2[...]
    x = _ln(x + ff, g2[...], be2[...])

    if final_norm:                                                # fused encoder norm
        x = _ln(x, gf[...], bef[...])
    o_ref[0] = x.astype(o_ref.dtype)


def dec_layer_kernel(x_ref, mem_ref, wqkv, bqkv, wout_s, bout_s, g1, be1,
                     wq_c, bq_c, wkv_c, bkv_c, wout_c, bout_c, g2, be2,
                     w1, bf1, w2, bf2, g3, be3, o_ref, *, nhead):
    x = x_ref[0].astype(jnp.float32)                              # (S2, D)
    m = mem_ref[0].astype(jnp.float32)                            # (S1, D)
    D = x.shape[-1]

    # self attention
    qkv = jnp.dot(_bf(x), wqkv[...], preferred_element_type=jnp.float32) + bqkv[...]
    attn = _attention(qkv[:, :D], qkv[:, D:2 * D], qkv[:, 2 * D:],
                      nhead, wout_s[...], bout_s[...])
    x = _ln(x + attn, g1[...], be1[...])

    # cross attention: Q from decoder stream, fused KV from encoder memory
    q = jnp.dot(_bf(x), wq_c[...], preferred_element_type=jnp.float32) + bq_c[...]
    kv = jnp.dot(_bf(m), wkv_c[...], preferred_element_type=jnp.float32) + bkv_c[...]
    attn = _attention(q, kv[:, :D], kv[:, D:], nhead, wout_c[...], bout_c[...])
    x = _ln(x + attn, g2[...], be2[...])

    # fused FFN
    h = jnp.dot(_bf(x), w1[...], preferred_element_type=jnp.float32) + bf1[...]
    h = _bf(jnp.maximum(h, 0.0))
    ff = jnp.dot(h, w2[...], preferred_element_type=jnp.float32) + bf2[...]
    x = _ln(x + ff, g3[...], be3[...])
    o_ref[0] = x.astype(o_ref.dtype)


def head_kernel(x_ref, g_ref, b_ref, wr_ref, br_ref, o_ref, *, seq_out):
    # fused: decoder final LayerNorm + slicing + linReducer + relu epilogue
    x = x_ref[0].astype(jnp.float32)                              # (S2, D)
    xn = _ln(x, g_ref[...], b_ref[...])
    head = xn[:seq_out, :]                                        # (So, D)
    rem = xn[seq_out:, :]                                         # (Sr, D)
    # relu(head + relu(W_red @ rem + b_red))
    z = jnp.dot(wr_ref[...], rem, preferred_element_type=jnp.float32) + br_ref[...]
    o_ref[0] = jnp.maximum(head + jnp.maximum(z, 0.0), 0.0).astype(o_ref.dtype)


# ----------------------------- pallas_call wrappers --------------------------

def _parallel():
    return pltpu.CompilerParams(dimension_semantics=("parallel",))


def _ws(shape):
    # constant-index weight BlockSpec (fetched once across the batch grid)
    return pl.BlockSpec(shape, lambda b: (0,) * len(shape))


def encoder_layer_forward(x, p, nhead, final_norm=None):
    B, S, D = x.shape
    FF = p["w1"].shape[1]
    in_specs = [
        pl.BlockSpec((1, S, D), lambda b: (b, 0, 0)),
        _ws((D, 3 * D)), _ws((1, 3 * D)),
        _ws((D, D)), _ws((1, D)),
        _ws((1, D)), _ws((1, D)),
        _ws((D, FF)), _ws((1, FF)),
        _ws((FF, D)), _ws((1, D)),
        _ws((1, D)), _ws((1, D)),
    ]
    args = [x,
            p["w_qkv"], p["b_qkv"], p["w_out"], p["b_out"],
            p["g1"], p["be1"],
            p["w1"], p["bf1"], p["w2"], p["bf2"],
            p["g2"], p["be2"]]
    if final_norm is not None:
        in_specs += [_ws((1, D)), _ws((1, D))]
        args += [final_norm["g"], final_norm["b"]]
    return pl.pallas_call(
        partial(enc_layer_kernel, nhead=nhead, final_norm=final_norm is not None),
        out_shape=jax.ShapeDtypeStruct((B, S, D), jnp.float32),
        grid=(B,),
        in_specs=in_specs,
        out_specs=pl.BlockSpec((1, S, D), lambda b: (b, 0, 0)),
        compiler_params=_parallel(),
    )(*args)


def decoder_layer_forward(x, mem, p, nhead):
    B, S2, D = x.shape
    S1 = mem.shape[1]
    FF = p["w1"].shape[1]
    in_specs = [
        pl.BlockSpec((1, S2, D), lambda b: (b, 0, 0)),
        pl.BlockSpec((1, S1, D), lambda b: (b, 0, 0)),
        _ws((D, 3 * D)), _ws((1, 3 * D)), _ws((D, D)), _ws((1, D)),
        _ws((1, D)), _ws((1, D)),
        _ws((D, D)), _ws((1, D)), _ws((D, 2 * D)), _ws((1, 2 * D)),
        _ws((D, D)), _ws((1, D)),
        _ws((1, D)), _ws((1, D)),
        _ws((D, FF)), _ws((1, FF)), _ws((FF, D)), _ws((1, D)),
        _ws((1, D)), _ws((1, D)),
    ]
    args = [x, mem,
            p["sa_w_qkv"], p["sa_b_qkv"], p["sa_w_out"], p["sa_b_out"],
            p["g1"], p["be1"],
            p["ca_w_q"], p["ca_b_q"], p["ca_w_kv"], p["ca_b_kv"],
            p["ca_w_out"], p["ca_b_out"],
            p["g2"], p["be2"],
            p["w1"], p["bf1"], p["w2"], p["bf2"],
            p["g3"], p["be3"]]
    return pl.pallas_call(
        partial(dec_layer_kernel, nhead=nhead),
        out_shape=jax.ShapeDtypeStruct((B, S2, D), jnp.float32),
        grid=(B,),
        in_specs=in_specs,
        out_specs=pl.BlockSpec((1, S2, D), lambda b: (b, 0, 0)),
        compiler_params=_parallel(),
    )(*args)


def head_forward(x, dec_norm, wr, br, seq_out):
    B, S, D = x.shape
    Sr = S - seq_out
    return pl.pallas_call(
        partial(head_kernel, seq_out=seq_out),
        out_shape=jax.ShapeDtypeStruct((B, seq_out, D), jnp.float32),
        grid=(B,),
        in_specs=[pl.BlockSpec((1, S, D), lambda b: (b, 0, 0)),
                  _ws((1, D)), _ws((1, D)),
                  _ws((seq_out, Sr)), _ws((seq_out, 1))],
        out_specs=pl.BlockSpec((1, seq_out, D), lambda b: (b, 0, 0)),
        compiler_params=_parallel(),
    )(x, dec_norm["g"], dec_norm["b"], wr, br)


# --------------------------------- model -------------------------------------

def positional_encoding(S, D):
    pos = jnp.arange(S, dtype=jnp.float32)[:, None]
    div = jnp.exp(jnp.arange(0, D, 2, dtype=jnp.float32) * (-math.log(10000.0) / D))
    pe = jnp.zeros((S, D), jnp.float32)
    pe = pe.at[:, 0::2].set(jnp.sin(pos * div))
    pe = pe.at[:, 1::2].set(jnp.cos(pos * div))
    return pe                                                    # (S, D)


def transformer_block_a(params, input1, input2, *, nhead, seq_out):
    D = params["embedding"].shape[1]
    # Embedding lookup; kept batch-first (B, S, D) throughout (equivalent to
    # PyTorch's (S, B, D): per-token ops are row independent, attention mixes
    # only inside one batch element, and the final permute(1,0,2) is implicit).
    x1 = jnp.take(params["embedding"], input1, axis=0)            # (B, S1, D)
    x2 = jnp.take(params["embedding"], input2, axis=0)            # (B, S2, D)
    S1, S2 = x1.shape[1], x2.shape[1]
    pe = positional_encoding(max(S1, S2), D)
    # TODO(synk): dropout (p=0.1) in PositionalEncoding / Transformer is eval-mode identity.
    x1 = x1 + pe[None, :S1, :]
    x2 = x2 + pe[None, :S2, :]

    mem = x1
    n_enc = len(params["enc_layers"])
    for i, lp in enumerate(params["enc_layers"]):
        fn = params["enc_norm"] if i == n_enc - 1 else None       # fuse final enc norm
        mem = encoder_layer_forward(mem, lp, nhead, final_norm=fn)

    out = x2
    for lp in params["dec_layers"]:
        out = decoder_layer_forward(out, mem, lp, nhead)

    # decoder final norm + linReducer head fused in one kernel
    return head_forward(out, params["dec_norm"], params["reducer_w"],
                        params["reducer_b"], seq_out)


# ----------------------------- parameter init --------------------------------
# Weights stored pre-transposed (K, N) in bf16; biases / LN params f32 shaped
# (1, N) so kernels can broadcast without per-call reshapes; cross-attn Q and
# fused-KV projections pre-split at init.

def _init_ln(D):
    return {"g": jnp.ones((1, D), jnp.float32), "b": jnp.zeros((1, D), jnp.float32)}


def _init_self_attn(key, D):
    k = jax.random.split(key, 4)
    return {
        "w_qkv": (jax.random.normal(k[0], (D, 3 * D)) * 0.05).astype(WDTYPE),
        "b_qkv": jax.random.normal(k[1], (1, 3 * D)) * 0.05,
        "w_out": (jax.random.normal(k[2], (D, D)) * 0.05).astype(WDTYPE),
        "b_out": jax.random.normal(k[3], (1, D)) * 0.05,
    }


def _init_ffn(key, D, FF):
    k = jax.random.split(key, 4)
    return {
        "w1": (jax.random.normal(k[0], (D, FF)) * 0.05).astype(WDTYPE),
        "bf1": jax.random.normal(k[1], (1, FF)) * 0.05,
        "w2": (jax.random.normal(k[2], (FF, D)) * 0.05).astype(WDTYPE),
        "bf2": jax.random.normal(k[3], (1, D)) * 0.05,
    }


def _init_enc_layer(key, D, FF):
    k = jax.random.split(key, 2)
    p = dict(_init_self_attn(k[0], D))
    p.update(_init_ffn(k[1], D, FF))
    ln1, ln2 = _init_ln(D), _init_ln(D)
    p.update({"g1": ln1["g"], "be1": ln1["b"], "g2": ln2["g"], "be2": ln2["b"]})
    return p


def _init_dec_layer(key, D, FF):
    k = jax.random.split(key, 3)
    sa = _init_self_attn(k[0], D)
    kc = jax.random.split(k[1], 6)
    p = {
        "sa_w_qkv": sa["w_qkv"], "sa_b_qkv": sa["b_qkv"],
        "sa_w_out": sa["w_out"], "sa_b_out": sa["b_out"],
        "ca_w_q": (jax.random.normal(kc[0], (D, D)) * 0.05).astype(WDTYPE),
        "ca_b_q": jax.random.normal(kc[1], (1, D)) * 0.05,
        "ca_w_kv": (jax.random.normal(kc[2], (D, 2 * D)) * 0.05).astype(WDTYPE),
        "ca_b_kv": jax.random.normal(kc[3], (1, 2 * D)) * 0.05,
        "ca_w_out": (jax.random.normal(kc[4], (D, D)) * 0.05).astype(WDTYPE),
        "ca_b_out": jax.random.normal(kc[5], (1, D)) * 0.05,
    }
    p.update(_init_ffn(k[2], D, FF))
    ln1, ln2, ln3 = _init_ln(D), _init_ln(D), _init_ln(D)
    p.update({"g1": ln1["g"], "be1": ln1["b"], "g2": ln2["g"], "be2": ln2["b"],
              "g3": ln3["g"], "be3": ln3["b"]})
    return p


def init_params(key, vocab, D, FF, seq_in, seq_out, n_enc, n_dec):
    keys = jax.random.split(key, 3 + n_enc + n_dec)
    return {
        "embedding": jax.random.normal(keys[0], (vocab, D)) * 0.1,
        "enc_layers": [_init_enc_layer(keys[3 + i], D, FF) for i in range(n_enc)],
        "dec_layers": [_init_dec_layer(keys[3 + n_enc + i], D, FF) for i in range(n_dec)],
        "enc_norm": _init_ln(D),
        "dec_norm": _init_ln(D),
        "reducer_w": jax.random.normal(keys[1], (seq_out, seq_in - seq_out)) * 0.05,
        "reducer_b": (jax.random.normal(keys[2], (seq_out,)) * 0.05).reshape(seq_out, 1),
    }


# --------------------------------- main ---------------------------------------

if __name__ == "__main__":
    VOCAB = 32
    SEQ_IN = 8
    SEQ_OUT = 4
    MODEL_DIM = 32
    NHEAD = 4
    NUM_ENC = 1
    NUM_DEC = 1
    DIM_FF = 2048          # nn.Transformer default dim_feedforward
    BATCH = 2

    key = jax.random.PRNGKey(0)
    kp, k1, k2 = jax.random.split(key, 3)
    params = init_params(kp, VOCAB, MODEL_DIM, DIM_FF, SEQ_IN, SEQ_OUT,
                         NUM_ENC, NUM_DEC)

    input1 = jax.random.randint(k1, (BATCH, SEQ_IN), 0, VOCAB, dtype=jnp.int32)
    input2 = jax.random.randint(k2, (BATCH, SEQ_IN), 0, VOCAB, dtype=jnp.int32)

    fwd = jax.jit(partial(transformer_block_a, nhead=NHEAD, seq_out=SEQ_OUT))
    out = jax.block_until_ready(fwd(params, input1, input2))

    assert out.shape == (BATCH, SEQ_OUT, MODEL_DIM), out.shape
    assert bool(jnp.all(jnp.isfinite(out)))
    print("KERNEL_OK")
</pallas_src>

<mosaic_0001>
module attributes {stable_mosaic.version = 11 : i64} {
  func.func @enc_layer_kernel(%arg0: i32, %arg1: memref<1x8x32xf32, #tpu.memory_space<vmem>>, %arg2: memref<32x96xbf16, #tpu.memory_space<vmem>>, %arg3: memref<1x96xf32, #tpu.memory_space<vmem>>, %arg4: memref<32x32xbf16, #tpu.memory_space<vmem>>, %arg5: memref<1x32xf32, #tpu.memory_space<vmem>>, %arg6: memref<1x32xf32, #tpu.memory_space<vmem>>, %arg7: memref<1x32xf32, #tpu.memory_space<vmem>>, %arg8: memref<32x2048xbf16, #tpu.memory_space<vmem>>, %arg9: memref<1x2048xf32, #tpu.memory_space<vmem>>, %arg10: memref<2048x32xbf16, #tpu.memory_space<vmem>>, %arg11: memref<1x32xf32, #tpu.memory_space<vmem>>, %arg12: memref<1x32xf32, #tpu.memory_space<vmem>>, %arg13: memref<1x32xf32, #tpu.memory_space<vmem>>, %arg14: memref<1x32xf32, #tpu.memory_space<vmem>>, %arg15: memref<1x32xf32, #tpu.memory_space<vmem>>, %arg16: memref<1x8x32xf32, #tpu.memory_space<vmem>>) attributes {dimension_semantics = [#tpu.dimension_semantics<parallel>], iteration_bounds = array<i64: 2>, scalar_prefetch = 0 : i64, scratch_operands = 0 : i64, tpu.core_type = #tpu.core_type<tc>, window_params = [{transform_indices = @transform_0, window_bounds = array<i64: 1, 8, 32>}, {pipeline_mode = #tpu.pipeline_mode<synchronous>, transform_indices = @transform_1, window_bounds = array<i64: 32, 96>}, {pipeline_mode = #tpu.pipeline_mode<synchronous>, transform_indices = @transform_2, window_bounds = array<i64: 1, 96>}, {pipeline_mode = #tpu.pipeline_mode<synchronous>, transform_indices = @transform_3, window_bounds = array<i64: 32, 32>}, {pipeline_mode = #tpu.pipeline_mode<synchronous>, transform_indices = @transform_4, window_bounds = array<i64: 1, 32>}, {pipeline_mode = #tpu.pipeline_mode<synchronous>, transform_indices = @transform_5, window_bounds = array<i64: 1, 32>}, {pipeline_mode = #tpu.pipeline_mode<synchronous>, transform_indices = @transform_6, window_bounds = array<i64: 1, 32>}, {pipeline_mode = #tpu.pipeline_mode<synchronous>, transform_indices = @transform_7, window_bounds = array<i64: 32, 2048>}, {pipeline_mode = #tpu.pipeline_mode<synchronous>, transform_indices = @transform_8, window_bounds = array<i64: 1, 2048>}, {pipeline_mode = #tpu.pipeline_mode<synchronous>, transform_indices = @transform_9, window_bounds = array<i64: 2048, 32>}, {pipeline_mode = #tpu.pipeline_mode<synchronous>, transform_indices = @transform_10, window_bounds = array<i64: 1, 32>}, {pipeline_mode = #tpu.pipeline_mode<synchronous>, transform_indices = @transform_11, window_bounds = array<i64: 1, 32>}, {pipeline_mode = #tpu.pipeline_mode<synchronous>, transform_indices = @transform_12, window_bounds = array<i64: 1, 32>}, {pipeline_mode = #tpu.pipeline_mode<synchronous>, transform_indices = @transform_13, window_bounds = array<i64: 1, 32>}, {pipeline_mode = #tpu.pipeline_mode<synchronous>, transform_indices = @transform_14, window_bounds = array<i64: 1, 32>}, {transform_indices = @transform_15, window_bounds = array<i64: 1, 8, 32>}]} {
    %c0 = arith.constant 0 : index
    %c0_0 = arith.constant 0 : index
    %c0_1 = arith.constant 0 : index
    %0 = vector.load %arg1[%c0, %c0_0, %c0_1] : memref<1x8x32xf32, #tpu.memory_space<vmem>>, vector<1x8x32xf32>
    %1 = vector.shape_cast %0 : vector<1x8x32xf32> to vector<8x32xf32>
    %2 = arith.truncf %1 : vector<8x32xf32> to vector<8x32xbf16>
    %c0_2 = arith.constant 0 : index
    %c0_3 = arith.constant 0 : index
    %3 = vector.load %arg2[%c0_2, %c0_3] : memref<32x96xbf16, #tpu.memory_space<vmem>>, vector<32x96xbf16>
    %cst = arith.constant dense<0.000000e+00> : vector<8x96xf32>
    %4 = tpu.matmul %2, %3, %cst {dimension_numbers = #tpu.dot_dimension_numbers<[1], [0], [0], [1], [0, 0, 1, 1], [], []>} : vector<8x32xbf16>, vector<32x96xbf16>, vector<8x96xf32> -> vector<8x96xf32>
    %c0_4 = arith.constant 0 : index
    %c0_5 = arith.constant 0 : index
    %5 = vector.load %arg3[%c0_4, %c0_5] : memref<1x96xf32, #tpu.memory_space<vmem>>, vector<1x96xf32>
    %6 = vector.broadcast %5 : vector<1x96xf32> to vector<8x96xf32>
    %7 = arith.addf %4, %6 : vector<8x96xf32>
    %8 = vector.extract_strided_slice %7 {offsets = [0, 0], sizes = [8, 32], strides = [1, 1]} : vector<8x96xf32> to vector<8x32xf32>
    %9 = vector.extract_strided_slice %7 {offsets = [0, 32], sizes = [8, 32], strides = [1, 1]} : vector<8x96xf32> to vector<8x32xf32>
    %10 = vector.extract_strided_slice %7 {offsets = [0, 64], sizes = [8, 32], strides = [1, 1]} : vector<8x96xf32> to vector<8x32xf32>
    %c0_6 = arith.constant 0 : index
    %c0_7 = arith.constant 0 : index
    %11 = vector.load %arg4[%c0_6, %c0_7] : memref<32x32xbf16, #tpu.memory_space<vmem>>, vector<32x32xbf16>
    %c0_8 = arith.constant 0 : index
    %c0_9 = arith.constant 0 : index
    %12 = vector.load %arg5[%c0_8, %c0_9] : memref<1x32xf32, #tpu.memory_space<vmem>>, vector<1x32xf32>
    %cst_10 = arith.constant 0.000000e+00 : f32
    %13 = vector.broadcast %cst_10 : f32 to vector<8x32xf32>
    %14 = vector.broadcast %12 : vector<1x32xf32> to vector<8x32xf32>
    %15 = arith.addf %13, %14 : vector<8x32xf32>
    %16 = vector.extract_strided_slice %8 {offsets = [0, 0], sizes = [8, 8], strides = [1, 1]} : vector<8x32xf32> to vector<8x8xf32>
    %17 = arith.truncf %16 : vector<8x8xf32> to vector<8x8xbf16>
    %18 = vector.extract_strided_slice %9 {offsets = [0, 0], sizes = [8, 8], strides = [1, 1]} : vector<8x32xf32> to vector<8x8xf32>
    %19 = arith.truncf %18 : vector<8x8xf32> to vector<8x8xbf16>
    %20 = vector.extract_strided_slice %10 {offsets = [0, 0], sizes = [8, 8], strides = [1, 1]} : vector<8x32xf32> to vector<8x8xf32>
    %21 = arith.truncf %20 : vector<8x8xf32> to vector<8x8xbf16>
    %cst_11 = arith.constant dense<0.000000e+00> : vector<8x8xf32>
    %22 = tpu.matmul %17, %19, %cst_11 {dimension_numbers = #tpu.dot_dimension_numbers<[1], [1], [0], [0], [0, 0, 1, 0], [], []>} : vector<8x8xbf16>, vector<8x8xbf16>, vector<8x8xf32> -> vector<8x8xf32>
    %cst_12 = arith.constant 0.353553385 : f32
    %23 = vector.broadcast %cst_12 : f32 to vector<8x8xf32>
    %24 = arith.mulf %22, %23 : vector<8x8xf32>
    %cst_13 = arith.constant dense<0xFF800000> : vector<8xf32>
    %25 = vector.multi_reduction <maximumf>, %24, %cst_13 [1] : vector<8x8xf32> to vector<8xf32>
    %26 = vector.shape_cast %25 : vector<8xf32> to vector<8x1xf32>
    %27 = vector.broadcast %26 : vector<8x1xf32> to vector<8x8xf32>
    %28 = arith.subf %24, %27 : vector<8x8xf32>
    %29 = math.exp %28 : vector<8x8xf32>
    %cst_14 = arith.constant dense<0.000000e+00> : vector<8xf32>
    %30 = vector.multi_reduction <add>, %29, %cst_14 [1] : vector<8x8xf32> to vector<8xf32>
    %31 = vector.shape_cast %30 : vector<8xf32> to vector<8x1xf32>
    %32 = vector.broadcast %31 : vector<8x1xf32> to vector<8x8xf32>
    %33 = arith.divf %29, %32 : vector<8x8xf32>
    %34 = arith.truncf %33 : vector<8x8xf32> to vector<8x8xbf16>
    %cst_15 = arith.constant dense<0.000000e+00> : vector<8x8xf32>
    %35 = tpu.matmul %34, %21, %cst_15 {dimension_numbers = #tpu.dot_dimension_numbers<[1], [0], [0], [1], [0, 0, 1, 1], [], []>} : vector<8x8xbf16>, vector<8x8xbf16>, vector<8x8xf32> -> vector<8x8xf32>
    %36 = arith.truncf %35 : vector<8x8xf32> to vector<8x8xbf16>
    %37 = vector.extract_strided_slice %11 {offsets = [0, 0], sizes = [8, 32], strides = [1, 1]} : vector<32x32xbf16> to vector<8x32xbf16>
    %cst_16 = arith.constant dense<0.000000e+00> : vector<8x32xf32>
    %38 = tpu.matmul %36, %37, %cst_16 {dimension_numbers = #tpu.dot_dimension_numbers<[1], [0], [0], [1], [0, 0, 1, 1], [], []>} : vector<8x8xbf16>, vector<8x32xbf16>, vector<8x32xf32> -> vector<8x32xf32>
    %39 = arith.addf %15, %38 : vector<8x32xf32>
    %40 = vector.extract_strided_slice %8 {offsets = [0, 8], sizes = [8, 8], strides = [1, 1]} : vector<8x32xf32> to vector<8x8xf32>
    %41 = arith.truncf %40 : vector<8x8xf32> to vector<8x8xbf16>
    %42 = vector.extract_strided_slice %9 {offsets = [0, 8], sizes = [8, 8], strides = [1, 1]} : vector<8x32xf32> to vector<8x8xf32>
    %43 = arith.truncf %42 : vector<8x8xf32> to vector<8x8xbf16>
    %44 = vector.extract_strided_slice %10 {offsets = [0, 8], sizes = [8, 8], strides = [1, 1]} : vector<8x32xf32> to vector<8x8xf32>
    %45 = arith.truncf %44 : vector<8x8xf32> to vector<8x8xbf16>
    %cst_17 = arith.constant dense<0.000000e+00> : vector<8x8xf32>
    %46 = tpu.matmul %41, %43, %cst_17 {dimension_numbers = #tpu.dot_dimension_numbers<[1], [1], [0], [0], [0, 0, 1, 0], [], []>} : vector<8x8xbf16>, vector<8x8xbf16>, vector<8x8xf32> -> vector<8x8xf32>
    %cst_18 = arith.constant 0.353553385 : f32
    %47 = vector.broadcast %cst_18 : f32 to vector<8x8xf32>
    %48 = arith.mulf %46, %47 : vector<8x8xf32>
    %cst_19 = arith.constant dense<0xFF800000> : vector<8xf32>
    %49 = vector.multi_reduction <maximumf>, %48, %cst_19 [1] : vector<8x8xf32> to vector<8xf32>
    %50 = vector.shape_cast %49 : vector<8xf32> to vector<8x1xf32>
    %51 = vector.broadcast %50 : vector<8x1xf32> to vector<8x8xf32>
    %52 = arith.subf %48, %51 : vector<8x8xf32>
    %53 = math.exp %52 : vector<8x8xf32>
    %cst_20 = arith.constant dense<0.000000e+00> : vector<8xf32>
    %54 = vector.multi_reduction <add>, %53, %cst_20 [1] : vector<8x8xf32> to vector<8xf32>
    %55 = vector.shape_cast %54 : vector<8xf32> to vector<8x1xf32>
    %56 = vector.broadcast %55 : vector<8x1xf32> to vector<8x8xf32>
    %57 = arith.divf %53, %56 : vector<8x8xf32>
    %58 = arith.truncf %57 : vector<8x8xf32> to vector<8x8xbf16>
    %cst_21 = arith.constant dense<0.000000e+00> : vector<8x8xf32>
    %59 = tpu.matmul %58, %45, %cst_21 {dimension_numbers = #tpu.dot_dimension_numbers<[1], [0], [0], [1], [0, 0, 1, 1], [], []>} : vector<8x8xbf16>, vector<8x8xbf16>, vector<8x8xf32> -> vector<8x8xf32>
    %60 = arith.truncf %59 : vector<8x8xf32> to vector<8x8xbf16>
    %61 = vector.extract_strided_slice %11 {offsets = [8, 0], sizes = [8, 32], strides = [1, 1]} : vector<32x32xbf16> to vector<8x32xbf16>
    %cst_22 = arith.constant dense<0.000000e+00> : vector<8x32xf32>
    %62 = tpu.matmul %60, %61, %cst_22 {dimension_numbers = #tpu.dot_dimension_numbers<[1], [0], [0], [1], [0, 0, 1, 1], [], []>} : vector<8x8xbf16>, vector<8x32xbf16>, vector<8x32xf32> -> vector<8x32xf32>
    %63 = arith.addf %39, %62 : vector<8x32xf32>
    %64 = vector.extract_strided_slice %8 {offsets = [0, 16], sizes = [8, 8], strides = [1, 1]} : vector<8x32xf32> to vector<8x8xf32>
    %65 = arith.truncf %64 : vector<8x8xf32> to vector<8x8xbf16>
    %66 = vector.extract_strided_slice %9 {offsets = [0, 16], sizes = [8, 8], strides = [1, 1]} : vector<8x32xf32> to vector<8x8xf32>
    %67 = arith.truncf %66 : vector<8x8xf32> to vector<8x8xbf16>
    %68 = vector.extract_strided_slice %10 {offsets = [0, 16], sizes = [8, 8], strides = [1, 1]} : vector<8x32xf32> to vector<8x8xf32>
    %69 = arith.truncf %68 : vector<8x8xf32> to vector<8x8xbf16>
    %cst_23 = arith.constant dense<0.000000e+00> : vector<8x8xf32>
    %70 = tpu.matmul %65, %67, %cst_23 {dimension_numbers = #tpu.dot_dimension_numbers<[1], [1], [0], [0], [0, 0, 1, 0], [], []>} : vector<8x8xbf16>, vector<8x8xbf16>, vector<8x8xf32> -> vector<8x8xf32>
    %cst_24 = arith.constant 0.353553385 : f32
    %71 = vector.broadcast %cst_24 : f32 to vector<8x8xf32>
    %72 = arith.mulf %70, %71 : vector<8x8xf32>
    %cst_25 = arith.constant dense<0xFF800000> : vector<8xf32>
    %73 = vector.multi_reduction <maximumf>, %72, %cst_25 [1] : vector<8x8xf32> to vector<8xf32>
    %74 = vector.shape_cast %73 : vector<8xf32> to vector<8x1xf32>
    %75 = vector.broadcast %74 : vector<8x1xf32> to vector<8x8xf32>
    %76 = arith.subf %72, %75 : vector<8x8xf32>
    %77 = math.exp %76 : vector<8x8xf32>
    %cst_26 = arith.constant dense<0.000000e+00> : vector<8xf32>
    %78 = vector.multi_reduction <add>, %77, %cst_26 [1] : vector<8x8xf32> to vector<8xf32>
    %79 = vector.shape_cast %78 : vector<8xf32> to vector<8x1xf32>
    %80 = vector.broadcast %79 : vector<8x1xf32> to vector<8x8xf32>
    %81 = arith.divf %77, %80 : vector<8x8xf32>
    %82 = arith.truncf %81 : vector<8x8xf32> to vector<8x8xbf16>
    %cst_27 = arith.constant dense<0.000000e+00> : vector<8x8xf32>
    %83 = tpu.matmul %82, %69, %cst_27 {dimension_numbers = #tpu.dot_dimension_numbers<[1], [0], [0], [1], [0, 0, 1, 1], [], []>} : vector<8x8xbf16>, vector<8x8xbf16>, vector<8x8xf32> -> vector<8x8xf32>
    %84 = arith.truncf %83 : vector<8x8xf32> to vector<8x8xbf16>
    %85 = vector.extract_strided_slice %11 {offsets = [16, 0], sizes = [8, 32], strides = [1, 1]} : vector<32x32xbf16> to vector<8x32xbf16>
    %cst_28 = arith.constant dense<0.000000e+00> : vector<8x32xf32>
    %86 = tpu.matmul %84, %85, %cst_28 {dimension_numbers = #tpu.dot_dimension_numbers<[1], [0], [0], [1], [0, 0, 1, 1], [], []>} : vector<8x8xbf16>, vector<8x32xbf16>, vector<8x32xf32> -> vector<8x32xf32>
    %87 = arith.addf %63, %86 : vector<8x32xf32>
    %88 = vector.extract_strided_slice %8 {offsets = [0, 24], sizes = [8, 8], strides = [1, 1]} : vector<8x32xf32> to vector<8x8xf32>
    %89 = arith.truncf %88 : vector<8x8xf32> to vector<8x8xbf16>
    %90 = vector.extract_strided_slice %9 {offsets = [0, 24], sizes = [8, 8], strides = [1, 1]} : vector<8x32xf32> to vector<8x8xf32>
    %91 = arith.truncf %90 : vector<8x8xf32> to vector<8x8xbf16>
    %92 = vector.extract_strided_slice %10 {offsets = [0, 24], sizes = [8, 8], strides = [1, 1]} : vector<8x32xf32> to vector<8x8xf32>
    %93 = arith.truncf %92 : vector<8x8xf32> to vector<8x8xbf16>
    %cst_29 = arith.constant dense<0.000000e+00> : vector<8x8xf32>
    %94 = tpu.matmul %89, %91, %cst_29 {dimension_numbers = #tpu.dot_dimension_numbers<[1], [1], [0], [0], [0, 0, 1, 0], [], []>} : vector<8x8xbf16>, vector<8x8xbf16>, vector<8x8xf32> -> vector<8x8xf32>
    %cst_30 = arith.constant 0.353553385 : f32
    %95 = vector.broadcast %cst_30 : f32 to vector<8x8xf32>
    %96 = arith.mulf %94, %95 : vector<8x8xf32>
    %cst_31 = arith.constant dense<0xFF800000> : vector<8xf32>
    %97 = vector.multi_reduction <maximumf>, %96, %cst_31 [1] : vector<8x8xf32> to vector<8xf32>
    %98 = vector.shape_cast %97 : vector<8xf32> to vector<8x1xf32>
    %99 = vector.broadcast %98 : vector<8x1xf32> to vector<8x8xf32>
    %100 = arith.subf %96, %99 : vector<8x8xf32>
    %101 = math.exp %100 : vector<8x8xf32>
    %cst_32 = arith.constant dense<0.000000e+00> : vector<8xf32>
    %102 = vector.multi_reduction <add>, %101, %cst_32 [1] : vector<8x8xf32> to vector<8xf32>
    %103 = vector.shape_cast %102 : vector<8xf32> to vector<8x1xf32>
    %104 = vector.broadcast %103 : vector<8x1xf32> to vector<8x8xf32>
    %105 = arith.divf %101, %104 : vector<8x8xf32>
    %106 = arith.truncf %105 : vector<8x8xf32> to vector<8x8xbf16>
    %cst_33 = arith.constant dense<0.000000e+00> : vector<8x8xf32>
    %107 = tpu.matmul %106, %93, %cst_33 {dimension_numbers = #tpu.dot_dimension_numbers<[1], [0], [0], [1], [0, 0, 1, 1], [], []>} : vector<8x8xbf16>, vector<8x8xbf16>, vector<8x8xf32> -> vector<8x8xf32>
    %108 = arith.truncf %107 : vector<8x8xf32> to vector<8x8xbf16>
    %109 = vector.extract_strided_slice %11 {offsets = [24, 0], sizes = [8, 32], strides = [1, 1]} : vector<32x32xbf16> to vector<8x32xbf16>
    %cst_34 = arith.constant dense<0.000000e+00> : vector<8x32xf32>
    %110 = tpu.matmul %108, %109, %cst_34 {dimension_numbers = #tpu.dot_dimension_numbers<[1], [0], [0], [1], [0, 0, 1, 1], [], []>} : vector<8x8xbf16>, vector<8x32xbf16>, vector<8x32xf32> -> vector<8x32xf32>
    %111 = arith.addf %87, %110 : vector<8x32xf32>
    %112 = arith.addf %1, %111 : vector<8x32xf32>
    %c0_35 = arith.constant 0 : index
    %c0_36 = arith.constant 0 : index
    %113 = vector.load %arg6[%c0_35, %c0_36] : memref<1x32xf32, #tpu.memory_space<vmem>>, vector<1x32xf32>
    %c0_37 = arith.constant 0 : index
    %c0_38 = arith.constant 0 : index
    %114 = vector.load %arg7[%c0_37, %c0_38] : memref<1x32xf32, #tpu.memory_space<vmem>>, vector<1x32xf32>
    %cst_39 = arith.constant dense<0.000000e+00> : vector<8xf32>
    %115 = vector.multi_reduction <add>, %112, %cst_39 [1] : vector<8x32xf32> to vector<8xf32>
    %116 = vector.shape_cast %115 : vector<8xf32> to vector<8x1xf32>
    %cst_40 = arith.constant 3.200000e+01 : f32
    %117 = vector.broadcast %cst_40 : f32 to vector<8x1xf32>
    %118 = arith.divf %116, %117 : vector<8x1xf32>
    %119 = vector.broadcast %118 : vector<8x1xf32> to vector<8x32xf32>
    %120 = arith.subf %112, %119 : vector<8x32xf32>
    %121 = arith.mulf %120, %120 : vector<8x32xf32>
    %cst_41 = arith.constant dense<0.000000e+00> : vector<8xf32>
    %122 = vector.multi_reduction <add>, %121, %cst_41 [1] : vector<8x32xf32> to vector<8xf32>
    %123 = vector.shape_cast %122 : vector<8xf32> to vector<8x1xf32>
    %cst_42 = arith.constant 3.200000e+01 : f32
    %124 = vector.broadcast %cst_42 : f32 to vector<8x1xf32>
    %125 = arith.divf %123, %124 : vector<8x1xf32>
    %126 = vector.broadcast %118 : vector<8x1xf32> to vector<8x32xf32>
    %127 = arith.subf %112, %126 : vector<8x32xf32>
    %cst_43 = arith.constant 9.99999974E-6 : f32
    %128 = vector.broadcast %cst_43 : f32 to vector<8x1xf32>
    %129 = arith.addf %125, %128 : vector<8x1xf32>
    %130 = math.rsqrt %129 : vector<8x1xf32>
    %131 = vector.broadcast %130 : vector<8x1xf32> to vector<8x32xf32>
    %132 = arith.mulf %127, %131 : vector<8x32xf32>
    %133 = vector.broadcast %113 : vector<1x32xf32> to vector<8x32xf32>
    %134 = arith.mulf %132, %133 : vector<8x32xf32>
    %135 = vector.broadcast %114 : vector<1x32xf32> to vector<8x32xf32>
    %136 = arith.addf %134, %135 : vector<8x32xf32>
    %137 = arith.truncf %136 : vector<8x32xf32> to vector<8x32xbf16>
    %c0_44 = arith.constant 0 : index
    %c0_45 = arith.constant 0 : index
    %138 = vector.load %arg8[%c0_44, %c0_45] : memref<32x2048xbf16, #tpu.memory_space<vmem>>, vector<32x2048xbf16>
    %cst_46 = arith.constant dense<0.000000e+00> : vector<8x2048xf32>
    %139 = tpu.matmul %137, %138, %cst_46 {dimension_numbers = #tpu.dot_dimension_numbers<[1], [0], [0], [1], [0, 0, 1, 1], [], []>} : vector<8x32xbf16>, vector<32x2048xbf16>, vector<8x2048xf32> -> vector<8x2048xf32>
    %c0_47 = arith.constant 0 : index
    %c0_48 = arith.constant 0 : index
    %140 = vector.load %arg9[%c0_47, %c0_48] : memref<1x2048xf32, #tpu.memory_space<vmem>>, vector<1x2048xf32>
    %141 = vector.broadcast %140 : vector<1x2048xf32> to vector<8x2048xf32>
    %142 = arith.addf %139, %141 : vector<8x2048xf32>
    %cst_49 = arith.constant 0.000000e+00 : f32
    %143 = vector.broadcast %cst_49 : f32 to vector<8x2048xf32>
    %144 = arith.maximumf %142, %143 : vector<8x2048xf32>
    %145 = arith.truncf %144 : vector<8x2048xf32> to vector<8x2048xbf16>
    %c0_50 = arith.constant 0 : index
    %c0_51 = arith.constant 0 : index
    %146 = vector.load %arg10[%c0_50, %c0_51] : memref<2048x32xbf16, #tpu.memory_space<vmem>>, vector<2048x32xbf16>
    %cst_52 = arith.constant dense<0.000000e+00> : vector<8x32xf32>
    %147 = tpu.matmul %145, %146, %cst_52 {dimension_numbers = #tpu.dot_dimension_numbers<[1], [0], [0], [1], [0, 0, 1, 1], [], []>} : vector<8x2048xbf16>, vector<2048x32xbf16>, vector<8x32xf32> -> vector<8x32xf32>
    %c0_53 = arith.constant 0 : index
    %c0_54 = arith.constant 0 : index
    %148 = vector.load %arg11[%c0_53, %c0_54] : memref<1x32xf32, #tpu.memory_space<vmem>>, vector<1x32xf32>
    %149 = vector.broadcast %148 : vector<1x32xf32> to vector<8x32xf32>
    %150 = arith.addf %147, %149 : vector<8x32xf32>
    %151 = arith.addf %136, %150 : vector<8x32xf32>
    %c0_55 = arith.constant 0 : index
    %c0_56 = arith.constant 0 : index
    %152 = vector.load %arg12[%c0_55, %c0_56] : memref<1x32xf32, #tpu.memory_space<vmem>>, vector<1x32xf32>
    %c0_57 = arith.constant 0 : index
    %c0_58 = arith.constant 0 : index
    %153 = vector.load %arg13[%c0_57, %c0_58] : memref<1x32xf32, #tpu.memory_space<vmem>>, vector<1x32xf32>
    %cst_59 = arith.constant dense<0.000000e+00> : vector<8xf32>
    %154 = vector.multi_reduction <add>, %151, %cst_59 [1] : vector<8x32xf32> to vector<8xf32>
    %155 = vector.shape_cast %154 : vector<8xf32> to vector<8x1xf32>
    %cst_60 = arith.constant 3.200000e+01 : f32
    %156 = vector.broadcast %cst_60 : f32 to vector<8x1xf32>
    %157 = arith.divf %155, %156 : vector<8x1xf32>
    %158 = vector.broadcast %157 : vector<8x1xf32> to vector<8x32xf32>
    %159 = arith.subf %151, %158 : vector<8x32xf32>
    %160 = arith.mulf %159, %159 : vector<8x32xf32>
    %cst_61 = arith.constant dense<0.000000e+00> : vector<8xf32>
    %161 = vector.multi_reduction <add>, %160, %cst_61 [1] : vector<8x32xf32> to vector<8xf32>
    %162 = vector.shape_cast %161 : vector<8xf32> to vector<8x1xf32>
    %cst_62 = arith.constant 3.200000e+01 : f32
    %163 = vector.broadcast %cst_62 : f32 to vector<8x1xf32>
    %164 = arith.divf %162, %163 : vector<8x1xf32>
    %165 = vector.broadcast %157 : vector<8x1xf32> to vector<8x32xf32>
    %166 = arith.subf %151, %165 : vector<8x32xf32>
    %cst_63 = arith.constant 9.99999974E-6 : f32
    %167 = vector.broadcast %cst_63 : f32 to vector<8x1xf32>
    %168 = arith.addf %164, %167 : vector<8x1xf32>
    %169 = math.rsqrt %168 : vector<8x1xf32>
    %170 = vector.broadcast %169 : vector<8x1xf32> to vector<8x32xf32>
    %171 = arith.mulf %166, %170 : vector<8x32xf32>
    %172 = vector.broadcast %152 : vector<1x32xf32> to vector<8x32xf32>
    %173 = arith.mulf %171, %172 : vector<8x32xf32>
    %174 = vector.broadcast %153 : vector<1x32xf32> to vector<8x32xf32>
    %175 = arith.addf %173, %174 : vector<8x32xf32>
    %c0_64 = arith.constant 0 : index
    %c0_65 = arith.constant 0 : index
    %176 = vector.load %arg14[%c0_64, %c0_65] : memref<1x32xf32, #tpu.memory_space<vmem>>, vector<1x32xf32>
    %c0_66 = arith.constant 0 : index
    %c0_67 = arith.constant 0 : index
    %177 = vector.load %arg15[%c0_66, %c0_67] : memref<1x32xf32, #tpu.memory_space<vmem>>, vector<1x32xf32>
    %cst_68 = arith.constant dense<0.000000e+00> : vector<8xf32>
    %178 = vector.multi_reduction <add>, %175, %cst_68 [1] : vector<8x32xf32> to vector<8xf32>
    %179 = vector.shape_cast %178 : vector<8xf32> to vector<8x1xf32>
    %cst_69 = arith.constant 3.200000e+01 : f32
    %180 = vector.broadcast %cst_69 : f32 to vector<8x1xf32>
    %181 = arith.divf %179, %180 : vector<8x1xf32>
    %182 = vector.broadcast %181 : vector<8x1xf32> to vector<8x32xf32>
    %183 = arith.subf %175, %182 : vector<8x32xf32>
    %184 = arith.mulf %183, %183 : vector<8x32xf32>
    %cst_70 = arith.constant dense<0.000000e+00> : vector<8xf32>
    %185 = vector.multi_reduction <add>, %184, %cst_70 [1] : vector<8x32xf32> to vector<8xf32>
    %186 = vector.shape_cast %185 : vector<8xf32> to vector<8x1xf32>
    %cst_71 = arith.constant 3.200000e+01 : f32
    %187 = vector.broadcast %cst_71 : f32 to vector<8x1xf32>
    %188 = arith.divf %186, %187 : vector<8x1xf32>
    %189 = vector.broadcast %181 : vector<8x1xf32> to vector<8x32xf32>
    %190 = arith.subf %175, %189 : vector<8x32xf32>
    %cst_72 = arith.constant 9.99999974E-6 : f32
    %191 = vector.broadcast %cst_72 : f32 to vector<8x1xf32>
    %192 = arith.addf %188, %191 : vector<8x1xf32>
    %193 = math.rsqrt %192 : vector<8x1xf32>
    %194 = vector.broadcast %193 : vector<8x1xf32> to vector<8x32xf32>
    %195 = arith.mulf %190, %194 : vector<8x32xf32>
    %196 = vector.broadcast %176 : vector<1x32xf32> to vector<8x32xf32>
    %197 = arith.mulf %195, %196 : vector<8x32xf32>
    %198 = vector.broadcast %177 : vector<1x32xf32> to vector<8x32xf32>
    %199 = arith.addf %197, %198 : vector<8x32xf32>
    %c0_73 = arith.constant 0 : index
    %c0_74 = arith.constant 0 : index
    %c0_75 = arith.constant 0 : index
    %200 = vector.load %arg16[%c0_73, %c0_74, %c0_75] : memref<1x8x32xf32, #tpu.memory_space<vmem>>, vector<1x8x32xf32>
    %201 = vector.shape_cast %200 : vector<1x8x32xf32> to vector<8x32xf32>
    %202 = vector.shape_cast %199 : vector<8x32xf32> to vector<1x8x32xf32>
    tpu.vector_store %arg16[%c0_73, %c0_74, %c0_75], %202 {strides = array<i32>} : memref<1x8x32xf32, #tpu.memory_space<vmem>>, vector<1x8x32xf32>,
    return
  }
  func.func @transform_0(%arg0: i32) -> (i32, i32, i32) {
    %c0_i32 = arith.constant 0 : i32
    %c0_i32_0 = arith.constant 0 : i32
    %c0_i32_1 = arith.constant 0 : i32
    return %arg0, %c0_i32, %c0_i32_0 : i32, i32, i32
  }
  func.func @transform_1(%arg0: i32) -> (i32, i32) {
    %c0_i32 = arith.constant 0 : i32
    %c0_i32_0 = arith.constant 0 : i32
    %c0_i32_1 = arith.constant 0 : i32
    return %c0_i32, %c0_i32_0 : i32, i32
  }
  func.func @transform_2(%arg0: i32) -> (i32, i32) {
    %c0_i32 = arith.constant 0 : i32
    %c0_i32_0 = arith.constant 0 : i32
    %c0_i32_1 = arith.constant 0 : i32
    return %c0_i32, %c0_i32_0 : i32, i32
  }
  func.func @transform_3(%arg0: i32) -> (i32, i32) {
    %c0_i32 = arith.constant 0 : i32
    %c0_i32_0 = arith.constant 0 : i32
    %c0_i32_1 = arith.constant 0 : i32
    return %c0_i32, %c0_i32_0 : i32, i32
  }
  func.func @transform_4(%arg0: i32) -> (i32, i32) {
    %c0_i32 = arith.constant 0 : i32
    %c0_i32_0 = arith.constant 0 : i32
    %c0_i32_1 = arith.constant 0 : i32
    return %c0_i32, %c0_i32_0 : i32, i32
  }
  func.func @transform_5(%arg0: i32) -> (i32, i32) {
    %c0_i32 = arith.constant 0 : i32
    %c0_i32_0 = arith.constant 0 : i32
    %c0_i32_1 = arith.constant 0 : i32
    return %c0_i32, %c0_i32_0 : i32, i32
  }
  func.func @transform_6(%arg0: i32) -> (i32, i32) {
    %c0_i32 = arith.constant 0 : i32
    %c0_i32_0 = arith.constant 0 : i32
    %c0_i32_1 = arith.constant 0 : i32
    return %c0_i32, %c0_i32_0 : i32, i32
  }
  func.func @transform_7(%arg0: i32) -> (i32, i32) {
    %c0_i32 = arith.constant 0 : i32
    %c0_i32_0 = arith.constant 0 : i32
    %c0_i32_1 = arith.constant 0 : i32
    return %c0_i32, %c0_i32_0 : i32, i32
  }
  func.func @transform_8(%arg0: i32) -> (i32, i32) {
    %c0_i32 = arith.constant 0 : i32
    %c0_i32_0 = arith.constant 0 : i32
    %c0_i32_1 = arith.constant 0 : i32
    return %c0_i32, %c0_i32_0 : i32, i32
  }
  func.func @transform_9(%arg0: i32) -> (i32, i32) {
    %c0_i32 = arith.constant 0 : i32
    %c0_i32_0 = arith.constant 0 : i32
    %c0_i32_1 = arith.constant 0 : i32
    return %c0_i32, %c0_i32_0 : i32, i32
  }
  func.func @transform_10(%arg0: i32) -> (i32, i32) {
    %c0_i32 = arith.constant 0 : i32
    %c0_i32_0 = arith.constant 0 : i32
    %c0_i32_1 = arith.constant 0 : i32
    return %c0_i32, %c0_i32_0 : i32, i32
  }
  func.func @transform_11(%arg0: i32) -> (i32, i32) {
    %c0_i32 = arith.constant 0 : i32
    %c0_i32_0 = arith.constant 0 : i32
    %c0_i32_1 = arith.constant 0 : i32
    return %c0_i32, %c0_i32_0 : i32, i32
  }
  func.func @transform_12(%arg0: i32) -> (i32, i32) {
    %c0_i32 = arith.constant 0 : i32
    %c0_i32_0 = arith.constant 0 : i32
    %c0_i32_1 = arith.constant 0 : i32
    return %c0_i32, %c0_i32_0 : i32, i32
  }
  func.func @transform_13(%arg0: i32) -> (i32, i32) {
    %c0_i32 = arith.constant 0 : i32
    %c0_i32_0 = arith.constant 0 : i32
    %c0_i32_1 = arith.constant 0 : i32
    return %c0_i32, %c0_i32_0 : i32, i32
  }
  func.func @transform_14(%arg0: i32) -> (i32, i32) {
    %c0_i32 = arith.constant 0 : i32
    %c0_i32_0 = arith.constant 0 : i32
    %c0_i32_1 = arith.constant 0 : i32
    return %c0_i32, %c0_i32_0 : i32, i32
  }
  func.func @transform_15(%arg0: i32) -> (i32, i32, i32) {
    %c0_i32 = arith.constant 0 : i32
    %c0_i32_0 = arith.constant 0 : i32
    %c0_i32_1 = arith.constant 0 : i32
    return %arg0, %c0_i32, %c0_i32_0 : i32, i32, i32
  }
}

module attributes {stable_mosaic.version = 11 : i64} {
  func.func @head_kernel(%arg0: i32, %arg1: memref<1x8x32xf32, #tpu.memory_space<vmem>>, %arg2: memref<1x32xf32, #tpu.memory_space<vmem>>, %arg3: memref<1x32xf32, #tpu.memory_space<vmem>>, %arg4: memref<4x4xf32, #tpu.memory_space<vmem>>, %arg5: memref<4x1xf32, #tpu.memory_space<vmem>>, %arg6: memref<1x4x32xf32, #tpu.memory_space<vmem>>) attributes {dimension_semantics = [#tpu.dimension_semantics<parallel>], iteration_bounds = array<i64: 2>, scalar_prefetch = 0 : i64, scratch_operands = 0 : i64, tpu.core_type = #tpu.core_type<tc>, window_params = [{transform_indices = @transform_0, window_bounds = array<i64: 1, 8, 32>}, {pipeline_mode = #tpu.pipeline_mode<synchronous>, transform_indices = @transform_1, window_bounds = array<i64: 1, 32>}, {pipeline_mode = #tpu.pipeline_mode<synchronous>, transform_indices = @transform_2, window_bounds = array<i64: 1, 32>}, {pipeline_mode = #tpu.pipeline_mode<synchronous>, transform_indices = @transform_3, window_bounds = array<i64: 4, 4>}, {pipeline_mode = #tpu.pipeline_mode<synchronous>, transform_indices = @transform_4, window_bounds = array<i64: 4, 1>}, {transform_indices = @transform_5, window_bounds = array<i64: 1, 4, 32>}]} {
    %c0 = arith.constant 0 : index
    %c0_0 = arith.constant 0 : index
    %c0_1 = arith.constant 0 : index
    %0 = vector.load %arg1[%c0, %c0_0, %c0_1] : memref<1x8x32xf32, #tpu.memory_space<vmem>>, vector<1x8x32xf32>
    %1 = vector.shape_cast %0 : vector<1x8x32xf32> to vector<8x32xf32>
    %c0_2 = arith.constant 0 : index
    %c0_3 = arith.constant 0 : index
    %2 = vector.load %arg2[%c0_2, %c0_3] : memref<1x32xf32, #tpu.memory_space<vmem>>, vector<1x32xf32>
    %c0_4 = arith.constant 0 : index
    %c0_5 = arith.constant 0 : index
    %3 = vector.load %arg3[%c0_4, %c0_5] : memref<1x32xf32, #tpu.memory_space<vmem>>, vector<1x32xf32>
    %cst = arith.constant dense<0.000000e+00> : vector<8xf32>
    %4 = vector.multi_reduction <add>, %1, %cst [1] : vector<8x32xf32> to vector<8xf32>
    %5 = vector.shape_cast %4 : vector<8xf32> to vector<8x1xf32>
    %cst_6 = arith.constant 3.200000e+01 : f32
    %6 = vector.broadcast %cst_6 : f32 to vector<8x1xf32>
    %7 = arith.divf %5, %6 : vector<8x1xf32>
    %8 = vector.broadcast %7 : vector<8x1xf32> to vector<8x32xf32>
    %9 = arith.subf %1, %8 : vector<8x32xf32>
    %10 = arith.mulf %9, %9 : vector<8x32xf32>
    %cst_7 = arith.constant dense<0.000000e+00> : vector<8xf32>
    %11 = vector.multi_reduction <add>, %10, %cst_7 [1] : vector<8x32xf32> to vector<8xf32>
    %12 = vector.shape_cast %11 : vector<8xf32> to vector<8x1xf32>
    %cst_8 = arith.constant 3.200000e+01 : f32
    %13 = vector.broadcast %cst_8 : f32 to vector<8x1xf32>
    %14 = arith.divf %12, %13 : vector<8x1xf32>
    %15 = vector.broadcast %7 : vector<8x1xf32> to vector<8x32xf32>
    %16 = arith.subf %1, %15 : vector<8x32xf32>
    %cst_9 = arith.constant 9.99999974E-6 : f32
    %17 = vector.broadcast %cst_9 : f32 to vector<8x1xf32>
    %18 = arith.addf %14, %17 : vector<8x1xf32>
    %19 = math.rsqrt %18 : vector<8x1xf32>
    %20 = vector.broadcast %19 : vector<8x1xf32> to vector<8x32xf32>
    %21 = arith.mulf %16, %20 : vector<8x32xf32>
    %22 = vector.broadcast %2 : vector<1x32xf32> to vector<8x32xf32>
    %23 = arith.mulf %21, %22 : vector<8x32xf32>
    %24 = vector.broadcast %3 : vector<1x32xf32> to vector<8x32xf32>
    %25 = arith.addf %23, %24 : vector<8x32xf32>
    %26 = vector.extract_strided_slice %25 {offsets = [0, 0], sizes = [4, 32], strides = [1, 1]} : vector<8x32xf32> to vector<4x32xf32>
    %27 = vector.extract_strided_slice %25 {offsets = [4, 0], sizes = [4, 32], strides = [1, 1]} : vector<8x32xf32> to vector<4x32xf32>
    %c0_10 = arith.constant 0 : index
    %c0_11 = arith.constant 0 : index
    %28 = vector.load %arg4[%c0_10, %c0_11] : memref<4x4xf32, #tpu.memory_space<vmem>>, vector<4x4xf32>
    %cst_12 = arith.constant dense<0.000000e+00> : vector<4x32xf32>
    %29 = tpu.matmul %28, %27, %cst_12 {dimension_numbers = #tpu.dot_dimension_numbers<[1], [0], [0], [1], [0, 0, 1, 1], [], []>} : vector<4x4xf32>, vector<4x32xf32>, vector<4x32xf32> -> vector<4x32xf32>
    %c0_13 = arith.constant 0 : index
    %c0_14 = arith.constant 0 : index
    %30 = vector.load %arg5[%c0_13, %c0_14] : memref<4x1xf32, #tpu.memory_space<vmem>>, vector<4x1xf32>
    %31 = vector.broadcast %30 : vector<4x1xf32> to vector<4x32xf32>
    %32 = arith.addf %29, %31 : vector<4x32xf32>
    %cst_15 = arith.constant 0.000000e+00 : f32
    %33 = vector.broadcast %cst_15 : f32 to vector<4x32xf32>
    %34 = arith.maximumf %32, %33 : vector<4x32xf32>
    %35 = arith.addf %26, %34 : vector<4x32xf32>
    %cst_16 = arith.constant 0.000000e+00 : f32
    %36 = vector.broadcast %cst_16 : f32 to vector<4x32xf32>
    %37 = arith.maximumf %35, %36 : vector<4x32xf32>
    %c0_17 = arith.constant 0 : index
    %c0_18 = arith.constant 0 : index
    %c0_19 = arith.constant 0 : index
    %38 = vector.load %arg6[%c0_17, %c0_18, %c0_19] : memref<1x4x32xf32, #tpu.memory_space<vmem>>, vector<1x4x32xf32>
    %39 = vector.shape_cast %38 : vector<1x4x32xf32> to vector<4x32xf32>
    %40 = vector.shape_cast %37 : vector<4x32xf32> to vector<1x4x32xf32>
    tpu.vector_store %arg6[%c0_17, %c0_18, %c0_19], %40 {strides = array<i32>} : memref<1x4x32xf32, #tpu.memory_space<vmem>>, vector<1x4x32xf32>,
    return
  }
  func.func @transform_0(%arg0: i32) -> (i32, i32, i32) {
    %c0_i32 = arith.constant 0 : i32
    %c0_i32_0 = arith.constant 0 : i32
    %c0_i32_1 = arith.constant 0 : i32
    return %arg0, %c0_i32, %c0_i32_0 : i32, i32, i32
  }
  func.func @transform_1(%arg0: i32) -> (i32, i32) {
    %c0_i32 = arith.constant 0 : i32
    %c0_i32_0 = arith.constant 0 : i32
    %c0_i32_1 = arith.constant 0 : i32
    return %c0_i32, %c0_i32_0 : i32, i32
  }
  func.func @transform_2(%arg0: i32) -> (i32, i32) {
    %c0_i32 = arith.constant 0 : i32
    %c0_i32_0 = arith.constant 0 : i32
    %c0_i32_1 = arith.constant 0 : i32
    return %c0_i32, %c0_i32_0 : i32, i32
  }
  func.func @transform_3(%arg0: i32) -> (i32, i32) {
    %c0_i32 = arith.constant 0 : i32
    %c0_i32_0 = arith.constant 0 : i32
    %c0_i32_1 = arith.constant 0 : i32
    return %c0_i32, %c0_i32_0 : i32, i32
  }
  func.func @transform_4(%arg0: i32) -> (i32, i32) {
    %c0_i32 = arith.constant 0 : i32
    %c0_i32_0 = arith.constant 0 : i32
    %c0_i32_1 = arith.constant 0 : i32
    return %c0_i32, %c0_i32_0 : i32, i32
  }
  func.func @transform_5(%arg0: i32) -> (i32, i32, i32) {
    %c0_i32 = arith.constant 0 : i32
    %c0_i32_0 = arith.constant 0 : i32
    %c0_i32_1 = arith.constant 0 : i32
    return %arg0, %c0_i32, %c0_i32_0 : i32, i32, i32
  }
}

module attributes {stable_mosaic.version = 11 : i64} {
  func.func @dec_layer_kernel(%arg0: i32, %arg1: memref<1x8x32xf32, #tpu.memory_space<vmem>>, %arg2: memref<1x8x32xf32, #tpu.memory_space<vmem>>, %arg3: memref<32x96xbf16, #tpu.memory_space<vmem>>, %arg4: memref<1x96xf32, #tpu.memory_space<vmem>>, %arg5: memref<32x32xbf16, #tpu.memory_space<vmem>>, %arg6: memref<1x32xf32, #tpu.memory_space<vmem>>, %arg7: memref<1x32xf32, #tpu.memory_space<vmem>>, %arg8: memref<1x32xf32, #tpu.memory_space<vmem>>, %arg9: memref<32x32xbf16, #tpu.memory_space<vmem>>, %arg10: memref<1x32xf32, #tpu.memory_space<vmem>>, %arg11: memref<32x64xbf16, #tpu.memory_space<vmem>>, %arg12: memref<1x64xf32, #tpu.memory_space<vmem>>, %arg13: memref<32x32xbf16, #tpu.memory_space<vmem>>, %arg14: memref<1x32xf32, #tpu.memory_space<vmem>>, %arg15: memref<1x32xf32, #tpu.memory_space<vmem>>, %arg16: memref<1x32xf32, #tpu.memory_space<vmem>>, %arg17: memref<32x2048xbf16, #tpu.memory_space<vmem>>, %arg18: memref<1x2048xf32, #tpu.memory_space<vmem>>, %arg19: memref<2048x32xbf16, #tpu.memory_space<vmem>>, %arg20: memref<1x32xf32, #tpu.memory_space<vmem>>, %arg21: memref<1x32xf32, #tpu.memory_space<vmem>>, %arg22: memref<1x32xf32, #tpu.memory_space<vmem>>, %arg23: memref<1x8x32xf32, #tpu.memory_space<vmem>>) attributes {dimension_semantics = [#tpu.dimension_semantics<parallel>], iteration_bounds = array<i64: 2>, scalar_prefetch = 0 : i64, scratch_operands = 0 : i64, tpu.core_type = #tpu.core_type<tc>, window_params = [{transform_indices = @transform_0, window_bounds = array<i64: 1, 8, 32>}, {transform_indices = @transform_1, window_bounds = array<i64: 1, 8, 32>}, {pipeline_mode = #tpu.pipeline_mode<synchronous>, transform_indices = @transform_2, window_bounds = array<i64: 32, 96>}, {pipeline_mode = #tpu.pipeline_mode<synchronous>, transform_indices = @transform_3, window_bounds = array<i64: 1, 96>}, {pipeline_mode = #tpu.pipeline_mode<synchronous>, transform_indices = @transform_4, window_bounds = array<i64: 32, 32>}, {pipeline_mode = #tpu.pipeline_mode<synchronous>, transform_indices = @transform_5, window_bounds = array<i64: 1, 32>}, {pipeline_mode = #tpu.pipeline_mode<synchronous>, transform_indices = @transform_6, window_bounds = array<i64: 1, 32>}, {pipeline_mode = #tpu.pipeline_mode<synchronous>, transform_indices = @transform_7, window_bounds = array<i64: 1, 32>}, {pipeline_mode = #tpu.pipeline_mode<synchronous>, transform_indices = @transform_8, window_bounds = array<i64: 32, 32>}, {pipeline_mode = #tpu.pipeline_mode<synchronous>, transform_indices = @transform_9, window_bounds = array<i64: 1, 32>}, {pipeline_mode = #tpu.pipeline_mode<synchronous>, transform_indices = @transform_10, window_bounds = array<i64: 32, 64>}, {pipeline_mode = #tpu.pipeline_mode<synchronous>, transform_indices = @transform_11, window_bounds = array<i64: 1, 64>}, {pipeline_mode = #tpu.pipeline_mode<synchronous>, transform_indices = @transform_12, window_bounds = array<i64: 32, 32>}, {pipeline_mode = #tpu.pipeline_mode<synchronous>, transform_indices = @transform_13, window_bounds = array<i64: 1, 32>}, {pipeline_mode = #tpu.pipeline_mode<synchronous>, transform_indices = @transform_14, window_bounds = array<i64: 1, 32>}, {pipeline_mode = #tpu.pipeline_mode<synchronous>, transform_indices = @transform_15, window_bounds = array<i64: 1, 32>}, {pipeline_mode = #tpu.pipeline_mode<synchronous>, transform_indices = @transform_16, window_bounds = array<i64: 32, 2048>}, {pipeline_mode = #tpu.pipeline_mode<synchronous>, transform_indices = @transform_17, window_bounds = array<i64: 1, 2048>}, {pipeline_mode = #tpu.pipeline_mode<synchronous>, transform_indices = @transform_18, window_bounds = array<i64: 2048, 32>}, {pipeline_mode = #tpu.pipeline_mode<synchronous>, transform_indices = @transform_19, window_bounds = array<i64: 1, 32>}, {pipeline_mode = #tpu.pipeline_mode<synchronous>, transform_indices = @transform_20, window_bounds = array<i64: 1, 32>}, {pipeline_mode = #tpu.pipeline_mode<synchronous>, transform_indices = @transform_21, window_bounds = array<i64: 1, 32>}, {transform_indices = @transform_22, window_bounds = array<i64: 1, 8, 32>}]} {
    %c0 = arith.constant 0 : index
    %c0_0 = arith.constant 0 : index
    %c0_1 = arith.constant 0 : index
    %0 = vector.load %arg1[%c0, %c0_0, %c0_1] : memref<1x8x32xf32, #tpu.memory_space<vmem>>, vector<1x8x32xf32>
    %1 = vector.shape_cast %0 : vector<1x8x32xf32> to vector<8x32xf32>
    %c0_2 = arith.constant 0 : index
    %c0_3 = arith.constant 0 : index
    %c0_4 = arith.constant 0 : index
    %2 = vector.load %arg2[%c0_2, %c0_3, %c0_4] : memref<1x8x32xf32, #tpu.memory_space<vmem>>, vector<1x8x32xf32>
    %3 = vector.shape_cast %2 : vector<1x8x32xf32> to vector<8x32xf32>
    %4 = arith.truncf %1 : vector<8x32xf32> to vector<8x32xbf16>
    %c0_5 = arith.constant 0 : index
    %c0_6 = arith.constant 0 : index
    %5 = vector.load %arg3[%c0_5, %c0_6] : memref<32x96xbf16, #tpu.memory_space<vmem>>, vector<32x96xbf16>
    %cst = arith.constant dense<0.000000e+00> : vector<8x96xf32>
    %6 = tpu.matmul %4, %5, %cst {dimension_numbers = #tpu.dot_dimension_numbers<[1], [0], [0], [1], [0, 0, 1, 1], [], []>} : vector<8x32xbf16>, vector<32x96xbf16>, vector<8x96xf32> -> vector<8x96xf32>
    %c0_7 = arith.constant 0 : index
    %c0_8 = arith.constant 0 : index
    %7 = vector.load %arg4[%c0_7, %c0_8] : memref<1x96xf32, #tpu.memory_space<vmem>>, vector<1x96xf32>
    %8 = vector.broadcast %7 : vector<1x96xf32> to vector<8x96xf32>
    %9 = arith.addf %6, %8 : vector<8x96xf32>
    %10 = vector.extract_strided_slice %9 {offsets = [0, 0], sizes = [8, 32], strides = [1, 1]} : vector<8x96xf32> to vector<8x32xf32>
    %11 = vector.extract_strided_slice %9 {offsets = [0, 32], sizes = [8, 32], strides = [1, 1]} : vector<8x96xf32> to vector<8x32xf32>
    %12 = vector.extract_strided_slice %9 {offsets = [0, 64], sizes = [8, 32], strides = [1, 1]} : vector<8x96xf32> to vector<8x32xf32>
    %c0_9 = arith.constant 0 : index
    %c0_10 = arith.constant 0 : index
    %13 = vector.load %arg5[%c0_9, %c0_10] : memref<32x32xbf16, #tpu.memory_space<vmem>>, vector<32x32xbf16>
    %c0_11 = arith.constant 0 : index
    %c0_12 = arith.constant 0 : index
    %14 = vector.load %arg6[%c0_11, %c0_12] : memref<1x32xf32, #tpu.memory_space<vmem>>, vector<1x32xf32>
    %cst_13 = arith.constant 0.000000e+00 : f32
    %15 = vector.broadcast %cst_13 : f32 to vector<8x32xf32>
    %16 = vector.broadcast %14 : vector<1x32xf32> to vector<8x32xf32>
    %17 = arith.addf %15, %16 : vector<8x32xf32>
    %18 = vector.extract_strided_slice %10 {offsets = [0, 0], sizes = [8, 8], strides = [1, 1]} : vector<8x32xf32> to vector<8x8xf32>
    %19 = arith.truncf %18 : vector<8x8xf32> to vector<8x8xbf16>
    %20 = vector.extract_strided_slice %11 {offsets = [0, 0], sizes = [8, 8], strides = [1, 1]} : vector<8x32xf32> to vector<8x8xf32>
    %21 = arith.truncf %20 : vector<8x8xf32> to vector<8x8xbf16>
    %22 = vector.extract_strided_slice %12 {offsets = [0, 0], sizes = [8, 8], strides = [1, 1]} : vector<8x32xf32> to vector<8x8xf32>
    %23 = arith.truncf %22 : vector<8x8xf32> to vector<8x8xbf16>
    %cst_14 = arith.constant dense<0.000000e+00> : vector<8x8xf32>
    %24 = tpu.matmul %19, %21, %cst_14 {dimension_numbers = #tpu.dot_dimension_numbers<[1], [1], [0], [0], [0, 0, 1, 0], [], []>} : vector<8x8xbf16>, vector<8x8xbf16>, vector<8x8xf32> -> vector<8x8xf32>
    %cst_15 = arith.constant 0.353553385 : f32
    %25 = vector.broadcast %cst_15 : f32 to vector<8x8xf32>
    %26 = arith.mulf %24, %25 : vector<8x8xf32>
    %cst_16 = arith.constant dense<0xFF800000> : vector<8xf32>
    %27 = vector.multi_reduction <maximumf>, %26, %cst_16 [1] : vector<8x8xf32> to vector<8xf32>
    %28 = vector.shape_cast %27 : vector<8xf32> to vector<8x1xf32>
    %29 = vector.broadcast %28 : vector<8x1xf32> to vector<8x8xf32>
    %30 = arith.subf %26, %29 : vector<8x8xf32>
    %31 = math.exp %30 : vector<8x8xf32>
    %cst_17 = arith.constant dense<0.000000e+00> : vector<8xf32>
    %32 = vector.multi_reduction <add>, %31, %cst_17 [1] : vector<8x8xf32> to vector<8xf32>
    %33 = vector.shape_cast %32 : vector<8xf32> to vector<8x1xf32>
    %34 = vector.broadcast %33 : vector<8x1xf32> to vector<8x8xf32>
    %35 = arith.divf %31, %34 : vector<8x8xf32>
    %36 = arith.truncf %35 : vector<8x8xf32> to vector<8x8xbf16>
    %cst_18 = arith.constant dense<0.000000e+00> : vector<8x8xf32>
    %37 = tpu.matmul %36, %23, %cst_18 {dimension_numbers = #tpu.dot_dimension_numbers<[1], [0], [0], [1], [0, 0, 1, 1], [], []>} : vector<8x8xbf16>, vector<8x8xbf16>, vector<8x8xf32> -> vector<8x8xf32>
    %38 = arith.truncf %37 : vector<8x8xf32> to vector<8x8xbf16>
    %39 = vector.extract_strided_slice %13 {offsets = [0, 0], sizes = [8, 32], strides = [1, 1]} : vector<32x32xbf16> to vector<8x32xbf16>
    %cst_19 = arith.constant dense<0.000000e+00> : vector<8x32xf32>
    %40 = tpu.matmul %38, %39, %cst_19 {dimension_numbers = #tpu.dot_dimension_numbers<[1], [0], [0], [1], [0, 0, 1, 1], [], []>} : vector<8x8xbf16>, vector<8x32xbf16>, vector<8x32xf32> -> vector<8x32xf32>
    %41 = arith.addf %17, %40 : vector<8x32xf32>
    %42 = vector.extract_strided_slice %10 {offsets = [0, 8], sizes = [8, 8], strides = [1, 1]} : vector<8x32xf32> to vector<8x8xf32>
    %43 = arith.truncf %42 : vector<8x8xf32> to vector<8x8xbf16>
    %44 = vector.extract_strided_slice %11 {offsets = [0, 8], sizes = [8, 8], strides = [1, 1]} : vector<8x32xf32> to vector<8x8xf32>
    %45 = arith.truncf %44 : vector<8x8xf32> to vector<8x8xbf16>
    %46 = vector.extract_strided_slice %12 {offsets = [0, 8], sizes = [8, 8], strides = [1, 1]} : vector<8x32xf32> to vector<8x8xf32>
    %47 = arith.truncf %46 : vector<8x8xf32> to vector<8x8xbf16>
    %cst_20 = arith.constant dense<0.000000e+00> : vector<8x8xf32>
    %48 = tpu.matmul %43, %45, %cst_20 {dimension_numbers = #tpu.dot_dimension_numbers<[1], [1], [0], [0], [0, 0, 1, 0], [], []>} : vector<8x8xbf16>, vector<8x8xbf16>, vector<8x8xf32> -> vector<8x8xf32>
    %cst_21 = arith.constant 0.353553385 : f32
    %49 = vector.broadcast %cst_21 : f32 to vector<8x8xf32>
    %50 = arith.mulf %48, %49 : vector<8x8xf32>
    %cst_22 = arith.constant dense<0xFF800000> : vector<8xf32>
    %51 = vector.multi_reduction <maximumf>, %50, %cst_22 [1] : vector<8x8xf32> to vector<8xf32>
    %52 = vector.shape_cast %51 : vector<8xf32> to vector<8x1xf32>
    %53 = vector.broadcast %52 : vector<8x1xf32> to vector<8x8xf32>
    %54 = arith.subf %50, %53 : vector<8x8xf32>
    %55 = math.exp %54 : vector<8x8xf32>
    %cst_23 = arith.constant dense<0.000000e+00> : vector<8xf32>
    %56 = vector.multi_reduction <add>, %55, %cst_23 [1] : vector<8x8xf32> to vector<8xf32>
    %57 = vector.shape_cast %56 : vector<8xf32> to vector<8x1xf32>
    %58 = vector.broadcast %57 : vector<8x1xf32> to vector<8x8xf32>
    %59 = arith.divf %55, %58 : vector<8x8xf32>
    %60 = arith.truncf %59 : vector<8x8xf32> to vector<8x8xbf16>
    %cst_24 = arith.constant dense<0.000000e+00> : vector<8x8xf32>
    %61 = tpu.matmul %60, %47, %cst_24 {dimension_numbers = #tpu.dot_dimension_numbers<[1], [0], [0], [1], [0, 0, 1, 1], [], []>} : vector<8x8xbf16>, vector<8x8xbf16>, vector<8x8xf32> -> vector<8x8xf32>
    %62 = arith.truncf %61 : vector<8x8xf32> to vector<8x8xbf16>
    %63 = vector.extract_strided_slice %13 {offsets = [8, 0], sizes = [8, 32], strides = [1, 1]} : vector<32x32xbf16> to vector<8x32xbf16>
    %cst_25 = arith.constant dense<0.000000e+00> : vector<8x32xf32>
    %64 = tpu.matmul %62, %63, %cst_25 {dimension_numbers = #tpu.dot_dimension_numbers<[1], [0], [0], [1], [0, 0, 1, 1], [], []>} : vector<8x8xbf16>, vector<8x32xbf16>, vector<8x32xf32> -> vector<8x32xf32>
    %65 = arith.addf %41, %64 : vector<8x32xf32>
    %66 = vector.extract_strided_slice %10 {offsets = [0, 16], sizes = [8, 8], strides = [1, 1]} : vector<8x32xf32> to vector<8x8xf32>
    %67 = arith.truncf %66 : vector<8x8xf32> to vector<8x8xbf16>
    %68 = vector.extract_strided_slice %11 {offsets = [0, 16], sizes = [8, 8], strides = [1, 1]} : vector<8x32xf32> to vector<8x8xf32>
    %69 = arith.truncf %68 : vector<8x8xf32> to vector<8x8xbf16>
    %70 = vector.extract_strided_slice %12 {offsets = [0, 16], sizes = [8, 8], strides = [1, 1]} : vector<8x32xf32> to vector<8x8xf32>
    %71 = arith.truncf %70 : vector<8x8xf32> to vector<8x8xbf16>
    %cst_26 = arith.constant dense<0.000000e+00> : vector<8x8xf32>
    %72 = tpu.matmul %67, %69, %cst_26 {dimension_numbers = #tpu.dot_dimension_numbers<[1], [1], [0], [0], [0, 0, 1, 0], [], []>} : vector<8x8xbf16>, vector<8x8xbf16>, vector<8x8xf32> -> vector<8x8xf32>
    %cst_27 = arith.constant 0.353553385 : f32
    %73 = vector.broadcast %cst_27 : f32 to vector<8x8xf32>
    %74 = arith.mulf %72, %73 : vector<8x8xf32>
    %cst_28 = arith.constant dense<0xFF800000> : vector<8xf32>
    %75 = vector.multi_reduction <maximumf>, %74, %cst_28 [1] : vector<8x8xf32> to vector<8xf32>
    %76 = vector.shape_cast %75 : vector<8xf32> to vector<8x1xf32>
    %77 = vector.broadcast %76 : vector<8x1xf32> to vector<8x8xf32>
    %78 = arith.subf %74, %77 : vector<8x8xf32>
    %79 = math.exp %78 : vector<8x8xf32>
    %cst_29 = arith.constant dense<0.000000e+00> : vector<8xf32>
    %80 = vector.multi_reduction <add>, %79, %cst_29 [1] : vector<8x8xf32> to vector<8xf32>
    %81 = vector.shape_cast %80 : vector<8xf32> to vector<8x1xf32>
    %82 = vector.broadcast %81 : vector<8x1xf32> to vector<8x8xf32>
    %83 = arith.divf %79, %82 : vector<8x8xf32>
    %84 = arith.truncf %83 : vector<8x8xf32> to vector<8x8xbf16>
    %cst_30 = arith.constant dense<0.000000e+00> : vector<8x8xf32>
    %85 = tpu.matmul %84, %71, %cst_30 {dimension_numbers = #tpu.dot_dimension_numbers<[1], [0], [0], [1], [0, 0, 1, 1], [], []>} : vector<8x8xbf16>, vector<8x8xbf16>, vector<8x8xf32> -> vector<8x8xf32>
    %86 = arith.truncf %85 : vector<8x8xf32> to vector<8x8xbf16>
    %87 = vector.extract_strided_slice %13 {offsets = [16, 0], sizes = [8, 32], strides = [1, 1]} : vector<32x32xbf16> to vector<8x32xbf16>
    %cst_31 = arith.constant dense<0.000000e+00> : vector<8x32xf32>
    %88 = tpu.matmul %86, %87, %cst_31 {dimension_numbers = #tpu.dot_dimension_numbers<[1], [0], [0], [1], [0, 0, 1, 1], [], []>} : vector<8x8xbf16>, vector<8x32xbf16>, vector<8x32xf32> -> vector<8x32xf32>
    %89 = arith.addf %65, %88 : vector<8x32xf32>
    %90 = vector.extract_strided_slice %10 {offsets = [0, 24], sizes = [8, 8], strides = [1, 1]} : vector<8x32xf32> to vector<8x8xf32>
    %91 = arith.truncf %90 : vector<8x8xf32> to vector<8x8xbf16>
    %92 = vector.extract_strided_slice %11 {offsets = [0, 24], sizes = [8, 8], strides = [1, 1]} : vector<8x32xf32> to vector<8x8xf32>
    %93 = arith.truncf %92 : vector<8x8xf32> to vector<8x8xbf16>
    %94 = vector.extract_strided_slice %12 {offsets = [0, 24], sizes = [8, 8], strides = [1, 1]} : vector<8x32xf32> to vector<8x8xf32>
    %95 = arith.truncf %94 : vector<8x8xf32> to vector<8x8xbf16>
    %cst_32 = arith.constant dense<0.000000e+00> : vector<8x8xf32>
    %96 = tpu.matmul %91, %93, %cst_32 {dimension_numbers = #tpu.dot_dimension_numbers<[1], [1], [0], [0], [0, 0, 1, 0], [], []>} : vector<8x8xbf16>, vector<8x8xbf16>, vector<8x8xf32> -> vector<8x8xf32>
    %cst_33 = arith.constant 0.353553385 : f32
    %97 = vector.broadcast %cst_33 : f32 to vector<8x8xf32>
    %98 = arith.mulf %96, %97 : vector<8x8xf32>
    %cst_34 = arith.constant dense<0xFF800000> : vector<8xf32>
    %99 = vector.multi_reduction <maximumf>, %98, %cst_34 [1] : vector<8x8xf32> to vector<8xf32>
    %100 = vector.shape_cast %99 : vector<8xf32> to vector<8x1xf32>
    %101 = vector.broadcast %100 : vector<8x1xf32> to vector<8x8xf32>
    %102 = arith.subf %98, %101 : vector<8x8xf32>
    %103 = math.exp %102 : vector<8x8xf32>
    %cst_35 = arith.constant dense<0.000000e+00> : vector<8xf32>
    %104 = vector.multi_reduction <add>, %103, %cst_35 [1] : vector<8x8xf32> to vector<8xf32>
    %105 = vector.shape_cast %104 : vector<8xf32> to vector<8x1xf32>
    %106 = vector.broadcast %105 : vector<8x1xf32> to vector<8x8xf32>
    %107 = arith.divf %103, %106 : vector<8x8xf32>
    %108 = arith.truncf %107 : vector<8x8xf32> to vector<8x8xbf16>
    %cst_36 = arith.constant dense<0.000000e+00> : vector<8x8xf32>
    %109 = tpu.matmul %108, %95, %cst_36 {dimension_numbers = #tpu.dot_dimension_numbers<[1], [0], [0], [1], [0, 0, 1, 1], [], []>} : vector<8x8xbf16>, vector<8x8xbf16>, vector<8x8xf32> -> vector<8x8xf32>
    %110 = arith.truncf %109 : vector<8x8xf32> to vector<8x8xbf16>
    %111 = vector.extract_strided_slice %13 {offsets = [24, 0], sizes = [8, 32], strides = [1, 1]} : vector<32x32xbf16> to vector<8x32xbf16>
    %cst_37 = arith.constant dense<0.000000e+00> : vector<8x32xf32>
    %112 = tpu.matmul %110, %111, %cst_37 {dimension_numbers = #tpu.dot_dimension_numbers<[1], [0], [0], [1], [0, 0, 1, 1], [], []>} : vector<8x8xbf16>, vector<8x32xbf16>, vector<8x32xf32> -> vector<8x32xf32>
    %113 = arith.addf %89, %112 : vector<8x32xf32>
    %114 = arith.addf %1, %113 : vector<8x32xf32>
    %c0_38 = arith.constant 0 : index
    %c0_39 = arith.constant 0 : index
    %115 = vector.load %arg7[%c0_38, %c0_39] : memref<1x32xf32, #tpu.memory_space<vmem>>, vector<1x32xf32>
    %c0_40 = arith.constant 0 : index
    %c0_41 = arith.constant 0 : index
    %116 = vector.load %arg8[%c0_40, %c0_41] : memref<1x32xf32, #tpu.memory_space<vmem>>, vector<1x32xf32>
    %cst_42 = arith.constant dense<0.000000e+00> : vector<8xf32>
    %117 = vector.multi_reduction <add>, %114, %cst_42 [1] : vector<8x32xf32> to vector<8xf32>
    %118 = vector.shape_cast %117 : vector<8xf32> to vector<8x1xf32>
    %cst_43 = arith.constant 3.200000e+01 : f32
    %119 = vector.broadcast %cst_43 : f32 to vector<8x1xf32>
    %120 = arith.divf %118, %119 : vector<8x1xf32>
    %121 = vector.broadcast %120 : vector<8x1xf32> to vector<8x32xf32>
    %122 = arith.subf %114, %121 : vector<8x32xf32>
    %123 = arith.mulf %122, %122 : vector<8x32xf32>
    %cst_44 = arith.constant dense<0.000000e+00> : vector<8xf32>
    %124 = vector.multi_reduction <add>, %123, %cst_44 [1] : vector<8x32xf32> to vector<8xf32>
    %125 = vector.shape_cast %124 : vector<8xf32> to vector<8x1xf32>
    %cst_45 = arith.constant 3.200000e+01 : f32
    %126 = vector.broadcast %cst_45 : f32 to vector<8x1xf32>
    %127 = arith.divf %125, %126 : vector<8x1xf32>
    %128 = vector.broadcast %120 : vector<8x1xf32> to vector<8x32xf32>
    %129 = arith.subf %114, %128 : vector<8x32xf32>
    %cst_46 = arith.constant 9.99999974E-6 : f32
    %130 = vector.broadcast %cst_46 : f32 to vector<8x1xf32>
    %131 = arith.addf %127, %130 : vector<8x1xf32>
    %132 = math.rsqrt %131 : vector<8x1xf32>
    %133 = vector.broadcast %132 : vector<8x1xf32> to vector<8x32xf32>
    %134 = arith.mulf %129, %133 : vector<8x32xf32>
    %135 = vector.broadcast %115 : vector<1x32xf32> to vector<8x32xf32>
    %136 = arith.mulf %134, %135 : vector<8x32xf32>
    %137 = vector.broadcast %116 : vector<1x32xf32> to vector<8x32xf32>
    %138 = arith.addf %136, %137 : vector<8x32xf32>
    %139 = arith.truncf %138 : vector<8x32xf32> to vector<8x32xbf16>
    %c0_47 = arith.constant 0 : index
    %c0_48 = arith.constant 0 : index
    %140 = vector.load %arg9[%c0_47, %c0_48] : memref<32x32xbf16, #tpu.memory_space<vmem>>, vector<32x32xbf16>
    %cst_49 = arith.constant dense<0.000000e+00> : vector<8x32xf32>
    %141 = tpu.matmul %139, %140, %cst_49 {dimension_numbers = #tpu.dot_dimension_numbers<[1], [0], [0], [1], [0, 0, 1, 1], [], []>} : vector<8x32xbf16>, vector<32x32xbf16>, vector<8x32xf32> -> vector<8x32xf32>
    %c0_50 = arith.constant 0 : index
    %c0_51 = arith.constant 0 : index
    %142 = vector.load %arg10[%c0_50, %c0_51] : memref<1x32xf32, #tpu.memory_space<vmem>>, vector<1x32xf32>
    %143 = vector.broadcast %142 : vector<1x32xf32> to vector<8x32xf32>
    %144 = arith.addf %141, %143 : vector<8x32xf32>
    %145 = arith.truncf %3 : vector<8x32xf32> to vector<8x32xbf16>
    %c0_52 = arith.constant 0 : index
    %c0_53 = arith.constant 0 : index
    %146 = vector.load %arg11[%c0_52, %c0_53] : memref<32x64xbf16, #tpu.memory_space<vmem>>, vector<32x64xbf16>
    %cst_54 = arith.constant dense<0.000000e+00> : vector<8x64xf32>
    %147 = tpu.matmul %145, %146, %cst_54 {dimension_numbers = #tpu.dot_dimension_numbers<[1], [0], [0], [1], [0, 0, 1, 1], [], []>} : vector<8x32xbf16>, vector<32x64xbf16>, vector<8x64xf32> -> vector<8x64xf32>
    %c0_55 = arith.constant 0 : index
    %c0_56 = arith.constant 0 : index
    %148 = vector.load %arg12[%c0_55, %c0_56] : memref<1x64xf32, #tpu.memory_space<vmem>>, vector<1x64xf32>
    %149 = vector.broadcast %148 : vector<1x64xf32> to vector<8x64xf32>
    %150 = arith.addf %147, %149 : vector<8x64xf32>
    %151 = vector.extract_strided_slice %150 {offsets = [0, 0], sizes = [8, 32], strides = [1, 1]} : vector<8x64xf32> to vector<8x32xf32>
    %152 = vector.extract_strided_slice %150 {offsets = [0, 32], sizes = [8, 32], strides = [1, 1]} : vector<8x64xf32> to vector<8x32xf32>
    %c0_57 = arith.constant 0 : index
    %c0_58 = arith.constant 0 : index
    %153 = vector.load %arg13[%c0_57, %c0_58] : memref<32x32xbf16, #tpu.memory_space<vmem>>, vector<32x32xbf16>
    %c0_59 = arith.constant 0 : index
    %c0_60 = arith.constant 0 : index
    %154 = vector.load %arg14[%c0_59, %c0_60] : memref<1x32xf32, #tpu.memory_space<vmem>>, vector<1x32xf32>
    %cst_61 = arith.constant 0.000000e+00 : f32
    %155 = vector.broadcast %cst_61 : f32 to vector<8x32xf32>
    %156 = vector.broadcast %154 : vector<1x32xf32> to vector<8x32xf32>
    %157 = arith.addf %155, %156 : vector<8x32xf32>
    %158 = vector.extract_strided_slice %144 {offsets = [0, 0], sizes = [8, 8], strides = [1, 1]} : vector<8x32xf32> to vector<8x8xf32>
    %159 = arith.truncf %158 : vector<8x8xf32> to vector<8x8xbf16>
    %160 = vector.extract_strided_slice %151 {offsets = [0, 0], sizes = [8, 8], strides = [1, 1]} : vector<8x32xf32> to vector<8x8xf32>
    %161 = arith.truncf %160 : vector<8x8xf32> to vector<8x8xbf16>
    %162 = vector.extract_strided_slice %152 {offsets = [0, 0], sizes = [8, 8], strides = [1, 1]} : vector<8x32xf32> to vector<8x8xf32>
    %163 = arith.truncf %162 : vector<8x8xf32> to vector<8x8xbf16>
    %cst_62 = arith.constant dense<0.000000e+00> : vector<8x8xf32>
    %164 = tpu.matmul %159, %161, %cst_62 {dimension_numbers = #tpu.dot_dimension_numbers<[1], [1], [0], [0], [0, 0, 1, 0], [], []>} : vector<8x8xbf16>, vector<8x8xbf16>, vector<8x8xf32> -> vector<8x8xf32>
    %cst_63 = arith.constant 0.353553385 : f32
    %165 = vector.broadcast %cst_63 : f32 to vector<8x8xf32>
    %166 = arith.mulf %164, %165 : vector<8x8xf32>
    %cst_64 = arith.constant dense<0xFF800000> : vector<8xf32>
    %167 = vector.multi_reduction <maximumf>, %166, %cst_64 [1] : vector<8x8xf32> to vector<8xf32>
    %168 = vector.shape_cast %167 : vector<8xf32> to vector<8x1xf32>
    %169 = vector.broadcast %168 : vector<8x1xf32> to vector<8x8xf32>
    %170 = arith.subf %166, %169 : vector<8x8xf32>
    %171 = math.exp %170 : vector<8x8xf32>
    %cst_65 = arith.constant dense<0.000000e+00> : vector<8xf32>
    %172 = vector.multi_reduction <add>, %171, %cst_65 [1] : vector<8x8xf32> to vector<8xf32>
    %173 = vector.shape_cast %172 : vector<8xf32> to vector<8x1xf32>
    %174 = vector.broadcast %173 : vector<8x1xf32> to vector<8x8xf32>
    %175 = arith.divf %171, %174 : vector<8x8xf32>
    %176 = arith.truncf %175 : vector<8x8xf32> to vector<8x8xbf16>
    %cst_66 = arith.constant dense<0.000000e+00> : vector<8x8xf32>
    %177 = tpu.matmul %176, %163, %cst_66 {dimension_numbers = #tpu.dot_dimension_numbers<[1], [0], [0], [1], [0, 0, 1, 1], [], []>} : vector<8x8xbf16>, vector<8x8xbf16>, vector<8x8xf32> -> vector<8x8xf32>
    %178 = arith.truncf %177 : vector<8x8xf32> to vector<8x8xbf16>
    %179 = vector.extract_strided_slice %153 {offsets = [0, 0], sizes = [8, 32], strides = [1, 1]} : vector<32x32xbf16> to vector<8x32xbf16>
    %cst_67 = arith.constant dense<0.000000e+00> : vector<8x32xf32>
    %180 = tpu.matmul %178, %179, %cst_67 {dimension_numbers = #tpu.dot_dimension_numbers<[1], [0], [0], [1], [0, 0, 1, 1], [], []>} : vector<8x8xbf16>, vector<8x32xbf16>, vector<8x32xf32> -> vector<8x32xf32>
    %181 = arith.addf %157, %180 : vector<8x32xf32>
    %182 = vector.extract_strided_slice %144 {offsets = [0, 8], sizes = [8, 8], strides = [1, 1]} : vector<8x32xf32> to vector<8x8xf32>
    %183 = arith.truncf %182 : vector<8x8xf32> to vector<8x8xbf16>
    %184 = vector.extract_strided_slice %151 {offsets = [0, 8], sizes = [8, 8], strides = [1, 1]} : vector<8x32xf32> to vector<8x8xf32>
    %185 = arith.truncf %184 : vector<8x8xf32> to vector<8x8xbf16>
    %186 = vector.extract_strided_slice %152 {offsets = [0, 8], sizes = [8, 8], strides = [1, 1]} : vector<8x32xf32> to vector<8x8xf32>
    %187 = arith.truncf %186 : vector<8x8xf32> to vector<8x8xbf16>
    %cst_68 = arith.constant dense<0.000000e+00> : vector<8x8xf32>
    %188 = tpu.matmul %183, %185, %cst_68 {dimension_numbers = #tpu.dot_dimension_numbers<[1], [1], [0], [0], [0, 0, 1, 0], [], []>} : vector<8x8xbf16>, vector<8x8xbf16>, vector<8x8xf32> -> vector<8x8xf32>
    %cst_69 = arith.constant 0.353553385 : f32
    %189 = vector.broadcast %cst_69 : f32 to vector<8x8xf32>
    %190 = arith.mulf %188, %189 : vector<8x8xf32>
    %cst_70 = arith.constant dense<0xFF800000> : vector<8xf32>
    %191 = vector.multi_reduction <maximumf>, %190, %cst_70 [1] : vector<8x8xf32> to vector<8xf32>
    %192 = vector.shape_cast %191 : vector<8xf32> to vector<8x1xf32>
    %193 = vector.broadcast %192 : vector<8x1xf32> to vector<8x8xf32>
    %194 = arith.subf %190, %193 : vector<8x8xf32>
    %195 = math.exp %194 : vector<8x8xf32>
    %cst_71 = arith.constant dense<0.000000e+00> : vector<8xf32>
    %196 = vector.multi_reduction <add>, %195, %cst_71 [1] : vector<8x8xf32> to vector<8xf32>
    %197 = vector.shape_cast %196 : vector<8xf32> to vector<8x1xf32>
    %198 = vector.broadcast %197 : vector<8x1xf32> to vector<8x8xf32>
    %199 = arith.divf %195, %198 : vector<8x8xf32>
    %200 = arith.truncf %199 : vector<8x8xf32> to vector<8x8xbf16>
    %cst_72 = arith.constant dense<0.000000e+00> : vector<8x8xf32>
    %201 = tpu.matmul %200, %187, %cst_72 {dimension_numbers = #tpu.dot_dimension_numbers<[1], [0], [0], [1], [0, 0, 1, 1], [], []>} : vector<8x8xbf16>, vector<8x8xbf16>, vector<8x8xf32> -> vector<8x8xf32>
    %202 = arith.truncf %201 : vector<8x8xf32> to vector<8x8xbf16>
    %203 = vector.extract_strided_slice %153 {offsets = [8, 0], sizes = [8, 32], strides = [1, 1]} : vector<32x32xbf16> to vector<8x32xbf16>
    %cst_73 = arith.constant dense<0.000000e+00> : vector<8x32xf32>
    %204 = tpu.matmul %202, %203, %cst_73 {dimension_numbers = #tpu.dot_dimension_numbers<[1], [0], [0], [1], [0, 0, 1, 1], [], []>} : vector<8x8xbf16>, vector<8x32xbf16>, vector<8x32xf32> -> vector<8x32xf32>
    %205 = arith.addf %181, %204 : vector<8x32xf32>
    %206 = vector.extract_strided_slice %144 {offsets = [0, 16], sizes = [8, 8], strides = [1, 1]} : vector<8x32xf32> to vector<8x8xf32>
    %207 = arith.truncf %206 : vector<8x8xf32> to vector<8x8xbf16>
    %208 = vector.extract_strided_slice %151 {offsets = [0, 16], sizes = [8, 8], strides = [1, 1]} : vector<8x32xf32> to vector<8x8xf32>
    %209 = arith.truncf %208 : vector<8x8xf32> to vector<8x8xbf16>
    %210 = vector.extract_strided_slice %152 {offsets = [0, 16], sizes = [8, 8], strides = [1, 1]} : vector<8x32xf32> to vector<8x8xf32>
    %211 = arith.truncf %210 : vector<8x8xf32> to vector<8x8xbf16>
    %cst_74 = arith.constant dense<0.000000e+00> : vector<8x8xf32>
    %212 = tpu.matmul %207, %209, %cst_74 {dimension_numbers = #tpu.dot_dimension_numbers<[1], [1], [0], [0], [0, 0, 1, 0], [], []>} : vector<8x8xbf16>, vector<8x8xbf16>, vector<8x8xf32> -> vector<8x8xf32>
    %cst_75 = arith.constant 0.353553385 : f32
    %213 = vector.broadcast %cst_75 : f32 to vector<8x8xf32>
    %214 = arith.mulf %212, %213 : vector<8x8xf32>
    %cst_76 = arith.constant dense<0xFF800000> : vector<8xf32>
    %215 = vector.multi_reduction <maximumf>, %214, %cst_76 [1] : vector<8x8xf32> to vector<8xf32>
    %216 = vector.shape_cast %215 : vector<8xf32> to vector<8x1xf32>
    %217 = vector.broadcast %216 : vector<8x1xf32> to vector<8x8xf32>
    %218 = arith.subf %214, %217 : vector<8x8xf32>
    %219 = math.exp %218 : vector<8x8xf32>
    %cst_77 = arith.constant dense<0.000000e+00> : vector<8xf32>
    %220 = vector.multi_reduction <add>, %219, %cst_77 [1] : vector<8x8xf32> to vector<8xf32>
    %221 = vector.shape_cast %220 : vector<8xf32> to vector<8x1xf32>
    %222 = vector.broadcast %221 : vector<8x1xf32> to vector<8x8xf32>
    %223 = arith.divf %219, %222 : vector<8x8xf32>
    %224 = arith.truncf %223 : vector<8x8xf32> to vector<8x8xbf16>
    %cst_78 = arith.constant dense<0.000000e+00> : vector<8x8xf32>
    %225 = tpu.matmul %224, %211, %cst_78 {dimension_numbers = #tpu.dot_dimension_numbers<[1], [0], [0], [1], [0, 0, 1, 1], [], []>} : vector<8x8xbf16>, vector<8x8xbf16>, vector<8x8xf32> -> vector<8x8xf32>
    %226 = arith.truncf %225 : vector<8x8xf32> to vector<8x8xbf16>
    %227 = vector.extract_strided_slice %153 {offsets = [16, 0], sizes = [8, 32], strides = [1, 1]} : vector<32x32xbf16> to vector<8x32xbf16>
    %cst_79 = arith.constant dense<0.000000e+00> : vector<8x32xf32>
    %228 = tpu.matmul %226, %227, %cst_79 {dimension_numbers = #tpu.dot_dimension_numbers<[1], [0], [0], [1], [0, 0, 1, 1], [], []>} : vector<8x8xbf16>, vector<8x32xbf16>, vector<8x32xf32> -> vector<8x32xf32>
    %229 = arith.addf %205, %228 : vector<8x32xf32>
    %230 = vector.extract_strided_slice %144 {offsets = [0, 24], sizes = [8, 8], strides = [1, 1]} : vector<8x32xf32> to vector<8x8xf32>
    %231 = arith.truncf %230 : vector<8x8xf32> to vector<8x8xbf16>
    %232 = vector.extract_strided_slice %151 {offsets = [0, 24], sizes = [8, 8], strides = [1, 1]} : vector<8x32xf32> to vector<8x8xf32>
    %233 = arith.truncf %232 : vector<8x8xf32> to vector<8x8xbf16>
    %234 = vector.extract_strided_slice %152 {offsets = [0, 24], sizes = [8, 8], strides = [1, 1]} : vector<8x32xf32> to vector<8x8xf32>
    %235 = arith.truncf %234 : vector<8x8xf32> to vector<8x8xbf16>
    %cst_80 = arith.constant dense<0.000000e+00> : vector<8x8xf32>
    %236 = tpu.matmul %231, %233, %cst_80 {dimension_numbers = #tpu.dot_dimension_numbers<[1], [1], [0], [0], [0, 0, 1, 0], [], []>} : vector<8x8xbf16>, vector<8x8xbf16>, vector<8x8xf32> -> vector<8x8xf32>
    %cst_81 = arith.constant 0.353553385 : f32
    %237 = vector.broadcast %cst_81 : f32 to vector<8x8xf32>
    %238 = arith.mulf %236, %237 : vector<8x8xf32>
    %cst_82 = arith.constant dense<0xFF800000> : vector<8xf32>
    %239 = vector.multi_reduction <maximumf>, %238, %cst_82 [1] : vector<8x8xf32> to vector<8xf32>
    %240 = vector.shape_cast %239 : vector<8xf32> to vector<8x1xf32>
    %241 = vector.broadcast %240 : vector<8x1xf32> to vector<8x8xf32>
    %242 = arith.subf %238, %241 : vector<8x8xf32>
    %243 = math.exp %242 : vector<8x8xf32>
    %cst_83 = arith.constant dense<0.000000e+00> : vector<8xf32>
    %244 = vector.multi_reduction <add>, %243, %cst_83 [1] : vector<8x8xf32> to vector<8xf32>
    %245 = vector.shape_cast %244 : vector<8xf32> to vector<8x1xf32>
    %246 = vector.broadcast %245 : vector<8x1xf32> to vector<8x8xf32>
    %247 = arith.divf %243, %246 : vector<8x8xf32>
    %248 = arith.truncf %247 : vector<8x8xf32> to vector<8x8xbf16>
    %cst_84 = arith.constant dense<0.000000e+00> : vector<8x8xf32>
    %249 = tpu.matmul %248, %235, %cst_84 {dimension_numbers = #tpu.dot_dimension_numbers<[1], [0], [0], [1], [0, 0, 1, 1], [], []>} : vector<8x8xbf16>, vector<8x8xbf16>, vector<8x8xf32> -> vector<8x8xf32>
    %250 = arith.truncf %249 : vector<8x8xf32> to vector<8x8xbf16>
    %251 = vector.extract_strided_slice %153 {offsets = [24, 0], sizes = [8, 32], strides = [1, 1]} : vector<32x32xbf16> to vector<8x32xbf16>
    %cst_85 = arith.constant dense<0.000000e+00> : vector<8x32xf32>
    %252 = tpu.matmul %250, %251, %cst_85 {dimension_numbers = #tpu.dot_dimension_numbers<[1], [0], [0], [1], [0, 0, 1, 1], [], []>} : vector<8x8xbf16>, vector<8x32xbf16>, vector<8x32xf32> -> vector<8x32xf32>
    %253 = arith.addf %229, %252 : vector<8x32xf32>
    %254 = arith.addf %138, %253 : vector<8x32xf32>
    %c0_86 = arith.constant 0 : index
    %c0_87 = arith.constant 0 : index
    %255 = vector.load %arg15[%c0_86, %c0_87] : memref<1x32xf32, #tpu.memory_space<vmem>>, vector<1x32xf32>
    %c0_88 = arith.constant 0 : index
    %c0_89 = arith.constant 0 : index
    %256 = vector.load %arg16[%c0_88, %c0_89] : memref<1x32xf32, #tpu.memory_space<vmem>>, vector<1x32xf32>
    %cst_90 = arith.constant dense<0.000000e+00> : vector<8xf32>
    %257 = vector.multi_reduction <add>, %254, %cst_90 [1] : vector<8x32xf32> to vector<8xf32>
    %258 = vector.shape_cast %257 : vector<8xf32> to vector<8x1xf32>
    %cst_91 = arith.constant 3.200000e+01 : f32
    %259 = vector.broadcast %cst_91 : f32 to vector<8x1xf32>
    %260 = arith.divf %258, %259 : vector<8x1xf32>
    %261 = vector.broadcast %260 : vector<8x1xf32> to vector<8x32xf32>
    %262 = arith.subf %254, %261 : vector<8x32xf32>
    %263 = arith.mulf %262, %262 : vector<8x32xf32>
    %cst_92 = arith.constant dense<0.000000e+00> : vector<8xf32>
    %264 = vector.multi_reduction <add>, %263, %cst_92 [1] : vector<8x32xf32> to vector<8xf32>
    %265 = vector.shape_cast %264 : vector<8xf32> to vector<8x1xf32>
    %cst_93 = arith.constant 3.200000e+01 : f32
    %266 = vector.broadcast %cst_93 : f32 to vector<8x1xf32>
    %267 = arith.divf %265, %266 : vector<8x1xf32>
    %268 = vector.broadcast %260 : vector<8x1xf32> to vector<8x32xf32>
    %269 = arith.subf %254, %268 : vector<8x32xf32>
    %cst_94 = arith.constant 9.99999974E-6 : f32
    %270 = vector.broadcast %cst_94 : f32 to vector<8x1xf32>
    %271 = arith.addf %267, %270 : vector<8x1xf32>
    %272 = math.rsqrt %271 : vector<8x1xf32>
    %273 = vector.broadcast %272 : vector<8x1xf32> to vector<8x32xf32>
    %274 = arith.mulf %269, %273 : vector<8x32xf32>
    %275 = vector.broadcast %255 : vector<1x32xf32> to vector<8x32xf32>
    %276 = arith.mulf %274, %275 : vector<8x32xf32>
    %277 = vector.broadcast %256 : vector<1x32xf32> to vector<8x32xf32>
    %278 = arith.addf %276, %277 : vector<8x32xf32>
    %279 = arith.truncf %278 : vector<8x32xf32> to vector<8x32xbf16>
    %c0_95 = arith.constant 0 : index
    %c0_96 = arith.constant 0 : index
    %280 = vector.load %arg17[%c0_95, %c0_96] : memref<32x2048xbf16, #tpu.memory_space<vmem>>, vector<32x2048xbf16>
    %cst_97 = arith.constant dense<0.000000e+00> : vector<8x2048xf32>
    %281 = tpu.matmul %279, %280, %cst_97 {dimension_numbers = #tpu.dot_dimension_numbers<[1], [0], [0], [1], [0, 0, 1, 1], [], []>} : vector<8x32xbf16>, vector<32x2048xbf16>, vector<8x2048xf32> -> vector<8x2048xf32>
    %c0_98 = arith.constant 0 : index
    %c0_99 = arith.constant 0 : index
    %282 = vector.load %arg18[%c0_98, %c0_99] : memref<1x2048xf32, #tpu.memory_space<vmem>>, vector<1x2048xf32>
    %283 = vector.broadcast %282 : vector<1x2048xf32> to vector<8x2048xf32>
    %284 = arith.addf %281, %283 : vector<8x2048xf32>
    %cst_100 = arith.constant 0.000000e+00 : f32
    %285 = vector.broadcast %cst_100 : f32 to vector<8x2048xf32>
    %286 = arith.maximumf %284, %285 : vector<8x2048xf32>
    %287 = arith.truncf %286 : vector<8x2048xf32> to vector<8x2048xbf16>
    %c0_101 = arith.constant 0 : index
    %c0_102 = arith.constant 0 : index
    %288 = vector.load %arg19[%c0_101, %c0_102] : memref<2048x32xbf16, #tpu.memory_space<vmem>>, vector<2048x32xbf16>
    %cst_103 = arith.constant dense<0.000000e+00> : vector<8x32xf32>
    %289 = tpu.matmul %287, %288, %cst_103 {dimension_numbers = #tpu.dot_dimension_numbers<[1], [0], [0], [1], [0, 0, 1, 1], [], []>} : vector<8x2048xbf16>, vector<2048x32xbf16>, vector<8x32xf32> -> vector<8x32xf32>
    %c0_104 = arith.constant 0 : index
    %c0_105 = arith.constant 0 : index
    %290 = vector.load %arg20[%c0_104, %c0_105] : memref<1x32xf32, #tpu.memory_space<vmem>>, vector<1x32xf32>
    %291 = vector.broadcast %290 : vector<1x32xf32> to vector<8x32xf32>
    %292 = arith.addf %289, %291 : vector<8x32xf32>
    %293 = arith.addf %278, %292 : vector<8x32xf32>
    %c0_106 = arith.constant 0 : index
    %c0_107 = arith.constant 0 : index
    %294 = vector.load %arg21[%c0_106, %c0_107] : memref<1x32xf32, #tpu.memory_space<vmem>>, vector<1x32xf32>
    %c0_108 = arith.constant 0 : index
    %c0_109 = arith.constant 0 : index
    %295 = vector.load %arg22[%c0_108, %c0_109] : memref<1x32xf32, #tpu.memory_space<vmem>>, vector<1x32xf32>
    %cst_110 = arith.constant dense<0.000000e+00> : vector<8xf32>
    %296 = vector.multi_reduction <add>, %293, %cst_110 [1] : vector<8x32xf32> to vector<8xf32>
    %297 = vector.shape_cast %296 : vector<8xf32> to vector<8x1xf32>
    %cst_111 = arith.constant 3.200000e+01 : f32
    %298 = vector.broadcast %cst_111 : f32 to vector<8x1xf32>
    %299 = arith.divf %297, %298 : vector<8x1xf32>
    %300 = vector.broadcast %299 : vector<8x1xf32> to vector<8x32xf32>
    %301 = arith.subf %293, %300 : vector<8x32xf32>
    %302 = arith.mulf %301, %301 : vector<8x32xf32>
    %cst_112 = arith.constant dense<0.000000e+00> : vector<8xf32>
    %303 = vector.multi_reduction <add>, %302, %cst_112 [1] : vector<8x32xf32> to vector<8xf32>
    %304 = vector.shape_cast %303 : vector<8xf32> to vector<8x1xf32>
    %cst_113 = arith.constant 3.200000e+01 : f32
    %305 = vector.broadcast %cst_113 : f32 to vector<8x1xf32>
    %306 = arith.divf %304, %305 : vector<8x1xf32>
    %307 = vector.broadcast %299 : vector<8x1xf32> to vector<8x32xf32>
    %308 = arith.subf %293, %307 : vector<8x32xf32>
    %cst_114 = arith.constant 9.99999974E-6 : f32
    %309 = vector.broadcast %cst_114 : f32 to vector<8x1xf32>
    %310 = arith.addf %306, %309 : vector<8x1xf32>
    %311 = math.rsqrt %310 : vector<8x1xf32>
    %312 = vector.broadcast %311 : vector<8x1xf32> to vector<8x32xf32>
    %313 = arith.mulf %308, %312 : vector<8x32xf32>
    %314 = vector.broadcast %294 : vector<1x32xf32> to vector<8x32xf32>
    %315 = arith.mulf %313, %314 : vector<8x32xf32>
    %316 = vector.broadcast %295 : vector<1x32xf32> to vector<8x32xf32>
    %317 = arith.addf %315, %316 : vector<8x32xf32>
    %c0_115 = arith.constant 0 : index
    %c0_116 = arith.constant 0 : index
    %c0_117 = arith.constant 0 : index
    %318 = vector.load %arg23[%c0_115, %c0_116, %c0_117] : memref<1x8x32xf32, #tpu.memory_space<vmem>>, vector<1x8x32xf32>
    %319 = vector.shape_cast %318 : vector<1x8x32xf32> to vector<8x32xf32>
    %320 = vector.shape_cast %317 : vector<8x32xf32> to vector<1x8x32xf32>
    tpu.vector_store %arg23[%c0_115, %c0_116, %c0_117], %320 {strides = array<i32>} : memref<1x8x32xf32, #tpu.memory_space<vmem>>, vector<1x8x32xf32>,
    return
  }
  func.func @transform_0(%arg0: i32) -> (i32, i32, i32) {
    %c0_i32 = arith.constant 0 : i32
    %c0_i32_0 = arith.constant 0 : i32
    %c0_i32_1 = arith.constant 0 : i32
    return %arg0, %c0_i32, %c0_i32_0 : i32, i32, i32
  }
  func.func @transform_1(%arg0: i32) -> (i32, i32, i32) {
    %c0_i32 = arith.constant 0 : i32
    %c0_i32_0 = arith.constant 0 : i32
    %c0_i32_1 = arith.constant 0 : i32
    return %arg0, %c0_i32, %c0_i32_0 : i32, i32, i32
  }
  func.func @transform_2(%arg0: i32) -> (i32, i32) {
    %c0_i32 = arith.constant 0 : i32
    %c0_i32_0 = arith.constant 0 : i32
    %c0_i32_1 = arith.constant 0 : i32
    return %c0_i32, %c0_i32_0 : i32, i32
  }
  func.func @transform_3(%arg0: i32) -> (i32, i32) {
    %c0_i32 = arith.constant 0 : i32
    %c0_i32_0 = arith.constant 0 : i32
    %c0_i32_1 = arith.constant 0 : i32
    return %c0_i32, %c0_i32_0 : i32, i32
  }
  func.func @transform_4(%arg0: i32) -> (i32, i32) {
    %c0_i32 = arith.constant 0 : i32
    %c0_i32_0 = arith.constant 0 : i32
    %c0_i32_1 = arith.constant 0 : i32
    return %c0_i32, %c0_i32_0 : i32, i32
  }
  func.func @transform_5(%arg0: i32) -> (i32, i32) {
    %c0_i32 = arith.constant 0 : i32
    %c0_i32_0 = arith.constant 0 : i32
    %c0_i32_1 = arith.constant 0 : i32
    return %c0_i32, %c0_i32_0 : i32, i32
  }
  func.func @transform_6(%arg0: i32) -> (i32, i32) {
    %c0_i32 = arith.constant 0 : i32
    %c0_i32_0 = arith.constant 0 : i32
    %c0_i32_1 = arith.constant 0 : i32
    return %c0_i32, %c0_i32_0 : i32, i32
  }
  func.func @transform_7(%arg0: i32) -> (i32, i32) {
    %c0_i32 = arith.constant 0 : i32
    %c0_i32_0 = arith.constant 0 : i32
    %c0_i32_1 = arith.constant 0 : i32
    return %c0_i32, %c0_i32_0 : i32, i32
  }
  func.func @transform_8(%arg0: i32) -> (i32, i32) {
    %c0_i32 = arith.constant 0 : i32
    %c0_i32_0 = arith.constant 0 : i32
    %c0_i32_1 = arith.constant 0 : i32
    return %c0_i32, %c0_i32_0 : i32, i32
  }
  func.func @transform_9(%arg0: i32) -> (i32, i32) {
    %c0_i32 = arith.constant 0 : i32
    %c0_i32_0 = arith.constant 0 : i32
    %c0_i32_1 = arith.constant 0 : i32
    return %c0_i32, %c0_i32_0 : i32, i32
  }
  func.func @transform_10(%arg0: i32) -> (i32, i32) {
    %c0_i32 = arith.constant 0 : i32
    %c0_i32_0 = arith.constant 0 : i32
    %c0_i32_1 = arith.constant 0 : i32
    return %c0_i32, %c0_i32_0 : i32, i32
  }
  func.func @transform_11(%arg0: i32) -> (i32, i32) {
    %c0_i32 = arith.constant 0 : i32
    %c0_i32_0 = arith.constant 0 : i32
    %c0_i32_1 = arith.constant 0 : i32
    return %c0_i32, %c0_i32_0 : i32, i32
  }
  func.func @transform_12(%arg0: i32) -> (i32, i32) {
    %c0_i32 = arith.constant 0 : i32
    %c0_i32_0 = arith.constant 0 : i32
    %c0_i32_1 = arith.constant 0 : i32
    return %c0_i32, %c0_i32_0 : i32, i32
  }
  func.func @transform_13(%arg0: i32) -> (i32, i32) {
    %c0_i32 = arith.constant 0 : i32
    %c0_i32_0 = arith.constant 0 : i32
    %c0_i32_1 = arith.constant 0 : i32
    return %c0_i32, %c0_i32_0 : i32, i32
  }
  func.func @transform_14(%arg0: i32) -> (i32, i32) {
    %c0_i32 = arith.constant 0 : i32
    %c0_i32_0 = arith.constant 0 : i32
    %c0_i32_1 = arith.constant 0 : i32
    return %c0_i32, %c0_i32_0 : i32, i32
  }
  func.func @transform_15(%arg0: i32) -> (i32, i32) {
    %c0_i32 = arith.constant 0 : i32
    %c0_i32_0 = arith.constant 0 : i32
    %c0_i32_1 = arith.constant 0 : i32
    return %c0_i32, %c0_i32_0 : i32, i32
  }
  func.func @transform_16(%arg0: i32) -> (i32, i32) {
    %c0_i32 = arith.constant 0 : i32
    %c0_i32_0 = arith.constant 0 : i32
    %c0_i32_1 = arith.constant 0 : i32
    return %c0_i32, %c0_i32_0 : i32, i32
  }
  func.func @transform_17(%arg0: i32) -> (i32, i32) {
    %c0_i32 = arith.constant 0 : i32
    %c0_i32_0 = arith.constant 0 : i32
    %c0_i32_1 = arith.constant 0 : i32
    return %c0_i32, %c0_i32_0 : i32, i32
  }
  func.func @transform_18(%arg0: i32) -> (i32, i32) {
    %c0_i32 = arith.constant 0 : i32
    %c0_i32_0 = arith.constant 0 : i32
    %c0_i32_1 = arith.constant 0 : i32
    return %c0_i32, %c0_i32_0 : i32, i32
  }
  func.func @transform_19(%arg0: i32) -> (i32, i32) {
    %c0_i32 = arith.constant 0 : i32
    %c0_i32_0 = arith.constant 0 : i32
    %c0_i32_1 = arith.constant 0 : i32
    return %c0_i32, %c0_i32_0 : i32, i32
  }
  func.func @transform_20(%arg0: i32) -> (i32, i32) {
    %c0_i32 = arith.constant 0 : i32
    %c0_i32_0 = arith.constant 0 : i32
    %c0_i32_1 = arith.constant 0 : i32
    return %c0_i32, %c0_i32_0 : i32, i32
  }
  func.func @transform_21(%arg0: i32) -> (i32, i32) {
    %c0_i32 = arith.constant 0 : i32
    %c0_i32_0 = arith.constant 0 : i32
    %c0_i32_1 = arith.constant 0 : i32
    return %c0_i32, %c0_i32_0 : i32, i32
  }
  func.func @transform_22(%arg0: i32) -> (i32, i32, i32) {
    %c0_i32 = arith.constant 0 : i32
    %c0_i32_0 = arith.constant 0 : i32
    %c0_i32_1 = arith.constant 0 : i32
    return %arg0, %c0_i32, %c0_i32_0 : i32, i32, i32
  }
}

</mosaic_0001>

<bundles_post_ra>
// kernel: transformer_block_a.5
= control target key start
LH: loop header
LB: loop body
LE: loop exit
PB: predicated region body
PF: predicated region fallthrough
CT: control target
= control target key end

     0   :  { %10 = vsyncpa [#allocation3], 0  ;;  %s633_s0 = inlined_call_operand.vmem [shape: f32[2,8,32], index: 0, kind: input, shape index: {}]   ;;  %s634_s1 = inlined_call_operand.vmem [shape: f32[1,32], index: 1, kind: input, shape index: {}]   ;;  %s635_s2 = inlined_call_operand.vmem [shape: f32[1,32], index: 2, kind: input, shape index: {}]   ;;  %s636_s3 = inlined_call_operand.vmem [shape: f32[4,4], index: 3, kind: input, shape index: {}]   ;;  %s637_s4 = inlined_call_operand.vmem [shape: f32[4,1], index: 4, kind: input, shape index: {}]   ;;  %s638_s5 = inlined_call_operand.hbm [shape: f32[2,4,32], index: 5, kind: output, shape index: {}]  }
   0x1   :  { %12 = vsyncpa [#allocation3 + $0x1], 0  ;;  %s534_s18 = smov 0   ;;  %s536_s19 = smov 0  }
   0x2   :  { %s538_s20 = smov 0   ;;  %s540_s21 = smov 0  }
   0x3 LB: > { %s555_s22 = sadd.s32 4294967295, %s500_s21   ;;  %s377_s23 = sadd.s32 4294967294, %s500_s21   ;;  %s500_s21 = sphi %s540_s21, %s644_s21   ;;  %s496_s20 = sphi %s538_s20, %s643_s20   ;;  %s492_s19 = sphi %s536_s19, %s642_s19   ;;  %s488_s18 = sphi %s534_s18, %s641_s18  }
   0x4   : > { %s559_s24 = sadd.s32 1, %s500_s21   ;;  %s135_s25 = sadd.s32 1, %s496_s20 }
   0x5   : > { %s132_s26 = ssub.s32 %s500_s21, %s559_s24  ;;  %p145_p0 = scmp.ne.s32.totalorder %s496_s20, %s492_s19 }
   0x6   : > { %p133_p1 = scmp.eq.s32.totalorder %s132_s26, 0  ;;  %p146_p2 = scmp.eq.s32.totalorder %s555_s22, 1 }
   0x7   : > { %p151_p3 = scmp.ne.s32.totalorder %s492_s19, %s488_s18  ;;  %p152_p4 = scmp.eq.s32.totalorder %s377_s23, 1 }
   0x8   : > { %s570_s27 = scalar_select %p133_p1, %s496_s20, %s135_s25  }
   0x9   : > { %p572_p5 = por %p146_p2, %p145_p0  ;;  %p576_p6 = por %p152_p4, %p151_p3 }
   0xa   : > { %p380_p7 = scmp.ge.s32.totalorder %s500_s21, 1  ;;  %p189_p8 = scmp.lt.s32.totalorder %s500_s21, 3 }
   0xc   : > { %p190_p9 = pnand %p380_p7, %p189_p8 }
   0xd   : > { %p216_p10 = scmp.lt.s32.totalorder (!%p190_p9), %s555_s22, 1  ;;  %s213_s23 = sand.u32 (!%p190_p9), 1, %s492_s19  }
   0xe   : > { %193 = sbr.rel (%p190_p9) target bundleno = 432 (0x1b0), region = 40  ;;  %s381_s25 = sshll.u32 (!%p190_p9), %s213_s23, 2 }
   0xf   : > { %s386_s26 = sshll.u32 (!%p190_p9), %s555_s22, 2  ;;  %s215_s8 = scalar_lea.vmem (!%p190_p9), [#allocation2], %s381_s25 }
  0x10   : > { %s313_s7 = scalar_lea.hbm (!%p190_p9), %s638_s5, %s386_s26  ;;  %s303_s11 = scalar_lea.sflag (!%p190_p9), [#allocation3], %s213_s23 }
  0x11   : > { %s317_s10 = sshll.u32 (!%p190_p9), %s313_s7, 4  ;;  %s458_s15 = scalar_lea.hbm (!%p190_p9), %s638_s5, 8  ;;  %s318_s10 = int_to_ptr.hbm [resolvable:$true] %s317_s10 }
  0x12   : > { %s452_s12 = sshra.s32 (!%p190_p9), %s318_s10, 4  ;;  %s453_s12 = int_to_ptr.hbm [resolvable:$true] %s452_s12 }
  0x13   : > { %s217_s30 = scalar_select %p216_p10, %s555_s22, 1  ;;  %vm223_vm0 = vcmask 261120   ;;  %v502_v2 = vmov 32.0   ;;  %v262_v15 = vld [vmem:[%s637_s4] sm:$0xf]  ;;  %v503_v17 = vmov 0  }
  0x14   : > { %434 = vrcp.f32 %v502_v2  ;;  %430 = vset.pattern.permute.xlu1 %v503_v17  ;;  %431 = vset.pattern.permute.xlu0 %v503_v17  ;;  %v432_v25 = vld [vmem:[%s634_s1] ss:$0 sm:$0xff]  ;;  %vm274_vm5 = vcmask 1043456   ;;  %vm270_vm6 = vcmask 31744   ;;  %vm300_vm7 = vcmask 257024   ;;  %s454_s22 = scalar_lea.hbm %s453_s12, 4  ;;  %p459_p0 = scmp.lt.s32.totalorder %s453_s12, %s638_s5 }
  0x15   : > { %s382_s6 = sshll.u32 %s217_s30, 3  ;;  %265 = vperm.xlu1 %430, %v262_v15   ;;  %v433_v28 = vld [vmem:[%s635_s2] ss:$0 sm:$0xff]  ;;  %p455_p11 = scmp.ne.s32.totalorder %s453_s12, %s454_s22 }
  0x16   : > { %s219_s9 = scalar_lea.vmem %s633_s0, %s382_s6  ;;  %v261_v32 = vld [vmem:[%s636_s3] sm:$0xf]  ;;  %p460_p1 = scmp.lt.s32.totalorder %s458_s15, %s454_s22 }
  0x17   : > { %v220_v0 = vld [vmem:[%s219_s9] sm:$0xff]  ;;  %s315_s9 = sshll.u32 %s215_s8, 4  ;;  %p456_p12 = pnand %p455_p11, %p572_p5  ;;  %s316_s9 = int_to_ptr.vmem [resolvable:$true] %s315_s9 }
  0x18   : > { %v224_v1 = vsel %vm223_vm0, %v220_v0, 0.0  ;;  %p461_p2 = por %p460_p1, %p459_p0 }
  0x19   : > { %225 = vadd.xlane.f32.xlu0 %v224_v1  ;;  %p457_p13 = pneg %p456_p12 }
  0x1a   : > { %v435_v3 = vpop.eup %434 }
  0x1b   : > { %v228_v4 = vmul.f32 32.0, %v435_v3  ;;  %vm232_vm1 = vweird.f32 %v435_v3  ;;  %p462_p3 = pnand %p461_p2, %p457_p13 }
  0x1d   : > { %v229_v5 = vsub.f32 1.0, %v228_v4 }
  0x1f   : > { %v230_v6 = vmul.f32 %v435_v3, %v229_v5 }
  0x21   : > { %v231_v7 = vadd.f32 %v435_v3, %v230_v6 }
  0x23   : > { %v233_v8 = vsel %vm232_vm1, %v435_v3, %v231_v7 }
  0x87   : > { %v266_v33 = vpop.permute.xlu1 %265 }
  0x8c   : > { %v226_v9 = vpop.xlane.xlu0 %225 }
  0x8d   : > { %v234_v10 = vmul.f32 %v233_v8, %v226_v9 }
  0x8f   : > { %v235_v11 = vsub.f32 %v220_v0, %v234_v10 }
  0x91   : > { %v236_v12 = vmul.f32 %v235_v11, %v235_v11 }
  0x93   : > { %v237_v13 = vsel %vm223_vm0, %v236_v12, 0.0 }
  0x94   : > { %238 = vadd.xlane.f32.xlu0 %v237_v13 }
 0x107   : > { %v239_v14 = vpop.xlane.xlu0 %238 }
 0x108   : > { %v240_v16 = vmul.f32 %v239_v14, %v233_v8 }
 0x10a   : > { %v241_v18 = vadd.f32 1e-05, %v240_v16 }
 0x10c   : > { %436 = vrsqrt.f32 %v241_v18  ;;  %vm248_vm3 = vweird.f32 %v241_v18 }
 0x112   : > { %v437_v19 = vpop.eup %436 }
 0x113   : > { %v243_v20 = vmul.f32 %v437_v19, %v241_v18  ;;  %vm249_vm2 = vweird.f32 %v437_v19 }
 0x114   : > { %vm250_vm4 = vmor %vm248_vm3, %vm249_vm2 }
 0x115   : > { %v244_v21 = vmul.f32 %v437_v19, %v243_v20 }
 0x117   : > { %v245_v22 = vmul.f32 0.5, %v244_v21 }
 0x119   : > { %v246_v23 = vsub.f32 1.5, %v245_v22 }
 0x11b   : > { %v247_v24 = vmul.f32 %v437_v19, %v246_v23 }
 0x11d   : > { %v251_v26 = vsel %vm250_vm4, %v437_v19, %v247_v24 }
 0x11e   : > { %v252_v27 = vmul.f32 %v251_v26, %v235_v11 }
 0x120   : > { %v256_v29 = vmul.f32 %v432_v25, %v252_v27 }
 0x122   : > { %v260_v30 = vadd.f32 %v433_v28, %v256_v29 }
 0x124   : > { %v269_v31 = vrot.slane %v260_v30, 4 }
 0x126   : > { %383 = vmatpush.msk.msra.mxu0 %vm274_vm5, %v269_v31 }
 0x127   : > { %384 = vmatmul.msk.f32.vlgmr.msra.gmra.mxu0 %vm270_vm6, %v261_v32 }
 0x1a4   : > { %v294_v34 = vpop.f32.mrf.mxu0 }
 0x1a5   : > { %v295_v35 = vadd.f32 %v294_v34, %v266_v33 }
 0x1a7   : > { %v297_v36 = vmax.f32 %v295_v35, 0.0 }
 0x1a9   : > { %v298_v37 = vadd.f32 %v297_v36, %v260_v30 }
 0x1ab   : > { %v299_v38 = vmax.f32 %v298_v37, 0.0 }
 0x1ad   : > { %301 = vst.msk [vmem:[%s215_s8] sm:$0xf] %vm300_vm7, %v299_v38 }
 0x1ae   : > { %465 = shalt.err (!%p462_p3)
}
 0x1af   : > { %389 = dma.vmem_to_hbm [thread:$0]  (%p572_p5), %s316_s9, 64, %s318_s10, %s303_s11  }
 0x1b0 PF: > { %p395_p4 = scmp.ge.s32.totalorder %s500_s21, 2  ;;  %s329_s23 = sand.u32 1, %s488_s18  }
 0x1b1   : > { %s330_s25 = scalar_lea.sflag [#allocation3], %s329_s23 }
 0x1b2   : > { %p392_p7 = pnand %p395_p4, %p576_p6 }
 0x1b4   : > { %p393_p8 = pneg %p392_p7 }
 0x1b6   : > { %483 = dma.done.wait (%p393_p8), %s330_s25, 64  }
 0x1b7   : > { %485 = vsyncadd (%p393_p8), %s330_s25, 4294967232  ;;  %p15_p9 = scmp.ge.s32.totalorder %s559_s24, 4   ;;  %s641_s18 = smov %s492_s19 }
 0x1b8   : > { %s642_s19 = smov %s496_s20  ;;  %s643_s20 = smov %s570_s27 }
 0x1b9   : > { %s644_s21 = smov %s559_s24  ;;  %17 = sbr.rel (!%p15_p9) target bundleno = 3 (0x3), region = 75 }
 0x1be   :  { %336 = vsyncpa [#allocation3], 1 }
 0x1bf   :  { %338 = vsyncpa [#allocation3 + $0x1], 1 }

// kernel: transformer_block_a.3
= control target key start
LH: loop header
LB: loop body
LE: loop exit
PB: predicated region body
PF: predicated region fallthrough
CT: control target
= control target key end

     0   :  { %s3773_s18 = smov 0   ;;  %s4558_s0 = inlined_call_operand.vmem [shape: f32[2,8,32], index: 0, kind: input, shape index: {}]   ;;  %s4559_s1 = inlined_call_operand.vmem [shape: bf16[32,96], index: 1, kind: input, shape index: {}]   ;;  %s4560_s2 = inlined_call_operand.vmem [shape: f32[1,96], index: 2, kind: input, shape index: {}]   ;;  %s4561_s3 = inlined_call_operand.vmem [shape: bf16[32,32], index: 3, kind: input, shape index: {}]   ;;  %s4562_s4 = inlined_call_operand.vmem [shape: f32[1,32], index: 4, kind: input, shape index: {}]   ;;  %s4563_s5 = inlined_call_operand.vmem [shape: f32[1,32], index: 5, kind: input, shape index: {}]   ;;  %s4564_s6 = inlined_call_operand.vmem [shape: f32[1,32], index: 6, kind: input, shape index: {}]   ;;  %s4565_s7 = inlined_call_operand.vmem [shape: bf16[32,2048], index: 7, kind: input, shape index: {}]   ;;  %s4566_s8 = inlined_call_operand.vmem [shape: f32[1,2048], index: 8, kind: input, shape index: {}]   ;;  %s4567_s9 = inlined_call_operand.vmem [shape: bf16[2048,32], index: 9, kind: input, shape index: {}]   ;;  %s4568_s10 = inlined_call_operand.vmem [shape: f32[1,32], index: 10, kind: input, shape index: {}]   ;;  %s4569_s11 = inlined_call_operand.vmem [shape: f32[1,32], index: 11, kind: input, shape index: {}]   ;;  %s4570_s12 = inlined_call_operand.vmem [shape: f32[1,32], index: 12, kind: input, shape index: {}]   ;;  %s4571_s13 = inlined_call_operand.vmem [shape: f32[1,32], index: 13, kind: input, shape index: {}]   ;;  %s4572_s14 = inlined_call_operand.vmem [shape: f32[1,32], index: 14, kind: input, shape index: {}]   ;;  %s4573_s15 = inlined_call_operand.vmem [shape: f32[2,8,32], index: 15, kind: output, shape index: {}]  }
   0x1 LB: > { %s2772_s19 = sadd.s32 4294967295, %s3679_s18   ;;  %p2776_p0 = scmp.ge.s32.totalorder %s3679_s18, 1  ;;  %s3679_s18 = sphi %s3773_s18, %s25_s18  }
   0x2   : > { %p436_p1 = scmp.lt.s32.totalorder %s3679_s18, 3 }
   0x4   : > { %p437_p2 = pnand %p2776_p0, %p436_p1 }
   0x5   : > { %p482_p3 = scmp.lt.s32.totalorder (!%p437_p2), %s2772_s19, 1  ;;  %s3681_s30 = smov (!%p437_p2), 88  }
   0x6   : > { %440 = sbr.rel (%p437_p2) target bundleno = 3048 (0xbe8), region = 80  ;;  %s3682_s16 = smov (!%p437_p2), 96  }
   0x7   : > { %s3683_s17 = smov (!%p437_p2), 120   ;;  %s3684_s20 = smov (!%p437_p2), 56  }
   0x8   : > { %s3685_s21 = smov (!%p437_p2), 112   ;;  %s3686_s22 = smov (!%p437_p2), 104  }
   0x9   : > { %s3687_s26 = smov (!%p437_p2), 64   ;;  %s3689_s28 = smov (!%p437_p2), 72  }
   0xb   : > { %v3459_v0 = vld [vmem:[%s4559_s1 + $0x8] sm:$0xff]  ;;  %v3458_v1 = vld [vmem:[%s4559_s1] sm:$0xff]  ;;  %s4575_s19 = smov (!%p482_p3, %s2772_s19), 1  ;;  %vm513_vm0 = vcmask 261120   ;;  %vm543_vm1 = vcmask 64512   ;;  %vm594_vm2 = vcmask 1043456  }
   0xc   : > { %523 = vmatpush.bf16.msra.mxu0 %v3459_v0  ;;  %s2777_s24 = sshll.u32 %s4575_s19, 3  ;;  %v3640_v4 = vld [vmem:[%s4560_s2] ss:$0 sm:$0xff]  ;;  %v531_v59 = vld [vmem:[%s4561_s3 + $0x4] sm:$0xf] }
   0xd   : > { %s485_s27 = scalar_lea.vmem %s4558_s0, %s2777_s24  ;;  %v530_v15 = vld [vmem:[%s4561_s3] sm:$0xf]  ;;  %v707_v60 = vsel %vm594_vm2, %v531_v59, 0  ;;  %v533_v59 = vld [vmem:[%s4561_s3 + $0xc] sm:$0xf] }
   0xe   : > { %v3795_v2 = vld [vmem:[%s485_s27] sm:$0xff]  ;;  %v616_v16 = vsel %vm594_vm2, %v530_v15, 0  ;;  %s3688_s27 = smov 80  }
   0xf   : > { %v492_v3 = vpack.c.bf16 %v3795_v2, %v3795_v2  ;;  %625 = vmatpush.bf16.msra.mxu3 %v616_v16 }
  0x10   : > { %524 = vmatpush.bf16.msra.mxu0 %v3458_v1 }
  0x13   : > { %2787 = vmatmul.msk.bf16.vlgmr.msra.gmra.mxu0 %vm513_vm0, %v492_v3 }
  0x14   : > { %716 = vmatpush.bf16.msrb.mxu0 %v707_v60  ;;  %v889_v60 = vsel %vm594_vm2, %v533_v59, 0  ;;  %v2812_v59 = vld [vmem:[%s4565_s7 + $0x48] sm:$0xf0] }
  0x90   : > { %v526_v5 = vpop.f32.mrf.mxu0 }
  0x91   : > { %v527_v6 = vadd.f32 %v3640_v4, %v526_v5 }
  0x93   : > { %v3803_v7 = vpack.c.bf16 %v527_v6, %v527_v6 }
  0x95   : > { %634 = vrot.lane.b32.xlu2 %v3803_v7, %s3681_s30  ;;  %541 = vrot.lane.b32.xlu0 %v3803_v7, %s3682_s16 }
  0x98   : > { %v528_v8 = vpop.f32.mrf.mxu0 }
  0x9d   : > { %632 = vrot.lane.b32.xlu2 %v3803_v7, %s3683_s17 }
  0xef   : > { %v635_v35 = vpop.permute.xlu2 %634 }
  0xf0   : > { %v640_v39 = vsel %vm543_vm1, %v635_v35, 0 }
  0xf7   : > { %v633_v41 = vpop.permute.xlu2 %632 }
 0x107   : > { %v542_v9 = vpop.permute.xlu0 %541 }
 0x108   : > { %v548_v10 = vsel %vm543_vm1, %v542_v9, 0 }
 0x109   : > { %557 = vmatpush.bf16.xpose.msra.mxu1 %v548_v10 }
 0x110   : > { %2788 = vmatmul.msk.bf16.vlgmr.msra.gmra.mxu1 %vm543_vm1, %v3803_v7 }
 0x18d   : > { %v559_v11 = vpop.f32.mrf.mxu1 }
 0x18e   : > { %v563_v12 = vmul.f32 0.35355338, %v559_v11 }
 0x190   : > { %v564_v13 = vsel %vm543_vm1, %v563_v12, -inf }
 0x191   : > { %565 = vmax.xlane.f32.xlu0 %v564_v13 }
 0x195   : > { %v561_v14 = vpop.f32.mrf.mxu1 }
 0x1a5   : > { %681 = vrot.lane.b32.xlu0 %v3803_v7, %s3684_s20  ;;  %s3690_s20 = smov 48  }
 0x1ad   : > { %723 = vrot.lane.b32.xlu0 %v3803_v7, %s3685_s21  ;;  %s3691_s21 = smov 40  }
 0x1b5   : > { %814 = vrot.lane.b32.xlu0 %v3803_v7, %s3686_s22  ;;  %s489_s22 = scalar_lea.vmem %s4573_s15, %s2777_s24 }
 0x204   : > { %v566_v17 = vpop.xlane.xlu0 %565 }
 0x205   : > { %v567_v18 = vsub.f32 %v563_v12, %v566_v17 }
 0x207   : > { %v568_v19 = vmul.f32 1.442695, %v567_v18 }
 0x209   : > { %3649 = vpow2.f32 %v568_v19 }
 0x20f   : > { %v3650_v20 = vpop.eup %3649 }
 0x210   : > { %v570_v21 = vsel %vm543_vm1, %v3650_v20, 0.0 }
 0x211   : > { %571 = vadd.xlane.f32.xlu1 %v570_v21 }
 0x217   : > { %v682_v22 = vpop.permute.xlu0 %681 }
 0x218   : > { %v687_v23 = vsel %vm594_vm2, %v682_v22, 0 }
 0x219   : > { %696 = vmatpush.bf16.msrb.mxu3 %v687_v23 }
 0x21f   : > { %v724_v58 = vpop.permute.xlu0 %723 }
 0x22a   : > { %589 = vrot.lane.b32.xlu1 %v3803_v7, %s3687_s26 }
 0x284   : > { %v572_v24 = vpop.xlane.xlu1 %571 }
 0x285   : > { %3651 = vrcp.f32 %v572_v24  ;;  %v584_v29 = vand.u32 2147483648, %v572_v24  ;;  %vm578_vm4 = vweird.f32 %v572_v24  ;;  %v582_v31 = vand.u32 2147483647, %v572_v24 }
 0x287   : > { %v585_v33 = vor.u32 1.1754944e-38, %v584_v29  ;;  %vm583_vm6 = vcmp.eq.f32.partialorder %v582_v31, 8.507059e+37 }
 0x28b   : > { %v3652_v25 = vpop.eup %3651 }
 0x28c   : > { %v574_v26 = vmul.f32 %v3652_v25, %v572_v24  ;;  %vm579_vm3 = vweird.f32 %v3652_v25 }
 0x28d   : > { %vm580_vm5 = vmor %vm578_vm4, %vm579_vm3 }
 0x28e   : > { %v575_v27 = vsub.f32 1.0, %v574_v26  ;;  %v815_v26 = vpop.permute.xlu0 %814 }
 0x290   : > { %v576_v28 = vmul.f32 %v3652_v25, %v575_v27  ;;  %v3641_v27 = vld [vmem:[%s4562_s4] ss:$0 sm:$0xff] }
 0x292   : > { %v577_v30 = vadd.f32 %v3652_v25, %v576_v28 }
 0x294   : > { %v581_v32 = vsel %vm580_vm5, %v3652_v25, %v577_v30 }
 0x295   : > { %v586_v34 = vsel %vm583_vm6, %v585_v33, %v581_v32 }
 0x296   : > { %v587_v36 = vmul.f32 %v3650_v20, %v586_v34 }
 0x298   : > { %v588_v40 = vpack.c.bf16 %v587_v36, %v587_v36 }
 0x29c   : > { %v590_v37 = vpop.permute.xlu1 %589 }
 0x29d   : > { %v596_v38 = vsel %vm594_vm2, %v590_v37, 0 }
 0x29e   : > { %605 = vmatpush.bf16.msra.mxu2 %v596_v38 }
 0x2a1   : > { %2789 = vmatmul.msk.bf16.vlgmr.msra.gmra.mxu2 %vm543_vm1, %v588_v40 }
 0x2a2   : > { %649 = vmatpush.bf16.xpose.msrb.mxu2 %v640_v39 }
 0x2b1   : > { %2791 = vmatmul.msk.bf16.vlgmr.msrb.gmra.mxu2 %vm543_vm1, %v633_v41 }
 0x324   : > { %v607_v42 = vpop.f32.mrf.mxu2 }
 0x325   : > { %v611_v43 = vpack.c.bf16 %v607_v42, %v607_v42 }
 0x327   : > { %2790 = vmatmul.msk.bf16.vlgmr.msra.gmra.mxu3 %vm543_vm1, %v611_v43 }
 0x32c   : > { %v609_v44 = vpop.f32.mrf.mxu2 }
 0x334   : > { %v651_v45 = vpop.f32.mrf.mxu2 }
 0x335   : > { %v655_v46 = vmul.f32 0.35355338, %v651_v45 }
 0x337   : > { %v656_v47 = vsel %vm543_vm1, %v655_v46, -inf }
 0x338   : > { %657 = vmax.xlane.f32.xlu2 %v656_v47 }
 0x33c   : > { %v653_v48 = vpop.f32.mrf.mxu2 }
 0x350   : > { %725 = vrot.lane.b32.xlu2 %v3803_v7, %s3688_s27 }
 0x3aa   : > { %v627_v49 = vpop.f32.mrf.mxu3 }
 0x3ab   : > { %v658_v50 = vpop.xlane.xlu2 %657  ;;  %v631_v28 = vadd.f32 %v3641_v27, %v627_v49 }
 0x3ac   : > { %v659_v51 = vsub.f32 %v655_v46, %v658_v50 }
 0x3ae   : > { %v660_v52 = vmul.f32 1.442695, %v659_v51 }
 0x3b0   : > { %3653 = vpow2.f32 %v660_v52 }
 0x3b2   : > { %v629_v53 = vpop.f32.mrf.mxu3 }
 0x3b3   : > { %v726_v54 = vpop.permute.xlu2 %725 }
 0x3b4   : > { %v731_v55 = vsel %vm543_vm1, %v726_v54, 0 }
 0x3b5   : > { %740 = vmatpush.bf16.xpose.msrb.mxu1 %v731_v55 }
 0x3b6   : > { %v3654_v56 = vpop.eup %3653 }
 0x3b7   : > { %v662_v57 = vsel %vm543_vm1, %v3654_v56, 0.0 }
 0x3b8   : > { %663 = vadd.xlane.f32.xlu1 %v662_v57 }
 0x3bc   : > { %2794 = vmatmul.msk.bf16.vlgmr.msrb.gmra.mxu1 %vm543_vm1, %v724_v58 }
 0x3d1   : > { %816 = vrot.lane.b32.xlu1 %v3803_v7, %s3689_s28 }
 0x42b   : > { %v664_v61 = vpop.xlane.xlu1 %663 }
 0x42c   : > { %3655 = vrcp.f32 %v664_v61  ;;  %v676_v1 = vand.u32 2147483648, %v664_v61  ;;  %v674_v4 = vand.u32 2147483647, %v664_v61  ;;  %vm670_vm8 = vweird.f32 %v664_v61 }
 0x42e   : > { %v677_v8 = vor.u32 1.1754944e-38, %v676_v1  ;;  %vm675_vm10 = vcmp.eq.f32.partialorder %v674_v4, 8.507059e+37 }
 0x432   : > { %v3656_v62 = vpop.eup %3655 }
 0x433   : > { %v666_v63 = vmul.f32 %v3656_v62, %v664_v61  ;;  %vm671_vm7 = vweird.f32 %v3656_v62 }
 0x434   : > { %vm672_vm9 = vmor %vm670_vm8, %vm671_vm7 }
 0x435   : > { %v667_v0 = vsub.f32 1.0, %v666_v63 }
 0x437   : > { %v668_v3 = vmul.f32 %v3656_v62, %v667_v0 }
 0x439   : > { %v669_v5 = vadd.f32 %v3656_v62, %v668_v3  ;;  %v742_v6 = vpop.f32.mrf.mxu1 }
 0x43a   : > { %v746_v9 = vmul.f32 0.35355338, %v742_v6 }
 0x43b   : > { %v673_v10 = vsel %vm672_vm9, %v3656_v62, %v669_v5 }
 0x43c   : > { %v747_v11 = vsel %vm543_vm1, %v746_v9, -inf  ;;  %v678_v12 = vsel %vm675_vm10, %v677_v8, %v673_v10 }
 0x43d   : > { %748 = vmax.xlane.f32.xlu2 %v747_v11  ;;  %v679_v13 = vmul.f32 %v3654_v56, %v678_v12  ;;  %v532_v56 = vld [vmem:[%s4561_s3 + $0x8] sm:$0xf] }
 0x43e   : > { %v798_v57 = vsel %vm594_vm2, %v532_v56, 0 }
 0x43f   : > { %v680_v14 = vpack.c.bf16 %v679_v13, %v679_v13  ;;  %807 = vmatpush.bf16.msra.mxu3 %v798_v57 }
 0x441   : > { %2792 = vmatmul.msk.bf16.vlgmr.msrb.gmra.mxu3 %vm543_vm1, %v680_v14  ;;  %v744_v15 = vpop.f32.mrf.mxu1 }
 0x443   : > { %v817_v16 = vpop.permute.xlu1 %816 }
 0x444   : > { %v822_v17 = vsel %vm543_vm1, %v817_v16, 0 }
 0x445   : > { %831 = vmatpush.bf16.xpose.msra.mxu0 %v822_v17 }
 0x4b0   : > { %v749_v18 = vpop.xlane.xlu2 %748 }
 0x4b1   : > { %v750_v19 = vsub.f32 %v746_v9, %v749_v18 }
 0x4b3   : > { %v751_v20 = vmul.f32 1.442695, %v750_v19 }
 0x4b5   : > { %3657 = vpow2.f32 %v751_v20 }
 0x4bb   : > { %v3658_v21 = vpop.eup %3657 }
 0x4bc   : > { %v753_v22 = vsel %vm543_vm1, %v3658_v21, 0.0 }
 0x4bd   : > { %754 = vadd.xlane.f32.xlu1 %v753_v22 }
 0x4c4   : > { %v698_v23 = vpop.f32.mrf.mxu3 }
 0x4c5   : > { %v702_v24 = vpack.c.bf16 %v698_v23, %v698_v23 }
 0x4c7   : > { %2793 = vmatmul.msk.bf16.vlgmr.msrb.gmra.mxu0 %vm543_vm1, %v702_v24 }
 0x4cc   : > { %v700_v25 = vpop.f32.mrf.mxu3 }
 0x4d7   : > { %2797 = vmatmul.msk.bf16.vlgmr.msra.gmra.mxu0 %vm543_vm1, %v815_v26  ;;  %v3692_v26 = vmov 32.0  }
 0x530   : > { %v755_v36 = vpop.xlane.xlu1 %754 }
 0x531   : > { %3659 = vrcp.f32 %v755_v36  ;;  %v767_v45 = vand.u32 2147483648, %v755_v36  ;;  %vm761_vm12 = vweird.f32 %v755_v36  ;;  %v765_v46 = vand.u32 2147483647, %v755_v36 }
 0x533   : > { %v768_v50 = vor.u32 1.1754944e-38, %v767_v45  ;;  %vm766_vm14 = vcmp.eq.f32.partialorder %v765_v46, 8.507059e+37  ;;  %v3477_v46 = vld [vmem:[%s4565_s7 + $0x8c] sm:$0xf] }
 0x537   : > { %v3660_v37 = vpop.eup %3659 }
 0x538   : > { %v757_v38 = vmul.f32 %v3660_v37, %v755_v36  ;;  %vm762_vm11 = vweird.f32 %v3660_v37 }
 0x539   : > { %vm763_vm13 = vmor %vm761_vm12, %vm762_vm11 }
 0x53a   : > { %v758_v39 = vsub.f32 1.0, %v757_v38  ;;  %v3484_v38 = vld [vmem:[%s4565_s7 + $0xbc] sm:$0xf0] }
 0x53c   : > { %v759_v43 = vmul.f32 %v3660_v37, %v758_v39  ;;  %v3476_v39 = vld [vmem:[%s4565_s7 + $0x84] sm:$0xf] }
 0x53e   : > { %v760_v44 = vadd.f32 %v3660_v37, %v759_v43  ;;  %v3485_v43 = vld [vmem:[%s4565_s7 + $0xc4] sm:$0xf0] }
 0x540   : > { %v764_v48 = vsel %vm763_vm13, %v3660_v37, %v760_v44  ;;  %v2866_v37 = vld [vmem:[%s4565_s7 + $0x80] sm:$0xf] }
 0x541   : > { %v769_v51 = vsel %vm766_vm14, %v768_v50, %v764_v48  ;;  %v3468_v50 = vld [vmem:[%s4565_s7 + $0x3c] sm:$0xf0] }
 0x542   : > { %v770_v52 = vmul.f32 %v3658_v21, %v769_v51  ;;  %v3460_v51 = vld [vmem:[%s4565_s7 + $0x4] sm:$0xf] }
 0x544   : > { %v718_v29 = vpop.f32.mrf.mxu0  ;;  %v771_v55 = vpack.c.bf16 %v770_v52, %v770_v52 }
 0x545   : > { %v3846_v30 = vadd.f32 %v718_v29, %v631_v28 }
 0x54c   : > { %v720_v31 = vpop.f32.mrf.mxu0 }
 0x554   : > { %v833_v32 = vpop.f32.mrf.mxu0 }
 0x555   : > { %v837_v33 = vmul.f32 0.35355338, %v833_v32 }
 0x557   : > { %v838_v34 = vsel %vm543_vm1, %v837_v33, -inf }
 0x558   : > { %839 = vmax.xlane.f32.xlu0 %v838_v34 }
 0x55c   : > { %v835_v35 = vpop.f32.mrf.mxu0 }
 0x56c   : > { %772 = vrot.lane.b32.xlu0 %v3803_v7, %s3690_s20 }
 0x5cb   : > { %v840_v40 = vpop.xlane.xlu0 %839 }
 0x5cc   : > { %v841_v41 = vsub.f32 %v837_v33, %v840_v40  ;;  %v2867_v40 = vor.u32 %v3484_v38, %v2866_v37  ;;  %v2898_v37 = vld [vmem:[%s4565_s7 + $0xa0] sm:$0xf] }
 0x5cd   : > { %v3488_v38 = vld [vmem:[%s4565_s7 + $0xdc] sm:$0xf0] }
 0x5ce   : > { %v842_v42 = vmul.f32 1.442695, %v841_v41  ;;  %v2868_v41 = vld [vmem:[%s4565_s7 + $0xc0] sm:$0xf0]  ;;  %1183 = vmatpush.bf16.msrb.mxu3 %v2867_v40 }
 0x5cf   : > { %v2871_v44 = vor.u32 %v3476_v39, %v2868_v41  ;;  %v3480_v39 = vld [vmem:[%s4565_s7 + $0xa4] sm:$0xf] }
 0x5d0   : > { %3661 = vpow2.f32 %v842_v42  ;;  %v2874_v42 = vld [vmem:[%s4565_s7 + $0x88] sm:$0xf]  ;;  %v2900_v40 = vld [vmem:[%s4565_s7 + $0xe0] sm:$0xf0] }
 0x5d1   : > { %v2875_v45 = vor.u32 %v3485_v43, %v2874_v42  ;;  %1196 = vmatpush.bf16.msrb.mxu0 %v2871_v44  ;;  %v3489_v42 = vld [vmem:[%s4565_s7 + $0xe4] sm:$0xf0]  ;;  %v3481_v43 = vld [vmem:[%s4565_s7 + $0xac] sm:$0xf] }
 0x5d2   : > { %v2908_v44 = vld [vmem:[%s4565_s7 + $0xe8] sm:$0xf0] }
 0x5d6   : > { %v3662_v47 = vpop.eup %3661 }
 0x5d7   : > { %v844_v49 = vsel %vm543_vm1, %v3662_v47, 0.0 }
 0x5d8   : > { %845 = vadd.xlane.f32.xlu2 %v844_v49  ;;  %v2802_v49 = vld [vmem:[%s4565_s7] sm:$0xf] }
 0x5d9   : > { %v2803_v52 = vor.u32 %v3468_v50, %v2802_v49  ;;  %v3472_v49 = vld [vmem:[%s4565_s7 + $0x5c] sm:$0xf0] }
 0x5db   : > { %1184 = vmatpush.bf16.msrb.mxu3 %v2803_v52  ;;  %v3464_v52 = vld [vmem:[%s4565_s7 + $0x24] sm:$0xf] }
 0x5de   : > { %v773_v53 = vpop.permute.xlu0 %772 }
 0x5df   : > { %v778_v54 = vsel %vm594_vm2, %v773_v53, 0  ;;  %v2804_v53 = vld [vmem:[%s4565_s7 + $0x40] sm:$0xf0] }
 0x5e0   : > { %787 = vmatpush.bf16.msra.mxu2 %v778_v54  ;;  %v2810_v54 = vld [vmem:[%s4565_s7 + $0x8] sm:$0xf]  ;;  %v2807_v56 = vor.u32 %v3460_v51, %v2804_v53  ;;  %v2911_v51 = vor.u32 %v3481_v43, %v2908_v44  ;;  %v2836_v53 = vld [vmem:[%s4565_s7 + $0x60] sm:$0xf0]  ;;  %v3519_v43 = vld [vmem:[%s4567_s9 + $0xd8] sm:$0xff] }
 0x5e1   : > { %v3502_v44 = vld [vmem:[%s4567_s9 + $0x50] sm:$0xff] }
 0x5e2   : > { %1197 = vmatpush.bf16.msrb.mxu0 %v2807_v56  ;;  %v3465_v56 = vld [vmem:[%s4565_s7 + $0x2c] sm:$0xf] }
 0x5e3   : > { %2795 = vmatmul.msk.bf16.vlgmr.msra.gmra.mxu2 %vm543_vm1, %v771_v55  ;;  %v3469_v55 = vld [vmem:[%s4565_s7 + $0x44] sm:$0xf0] }
 0x5e4   : > { %898 = vmatpush.bf16.msrb.mxu2 %v889_v60  ;;  %v2811_v57 = vor.u32 %v3469_v55, %v2810_v54  ;;  %v2842_v54 = vld [vmem:[%s4565_s7 + $0x28] sm:$0xf] }
 0x5e5   : > { %v3473_v55 = vld [vmem:[%s4565_s7 + $0x64] sm:$0xf0] }
 0x5f0   : > { %863 = vrot.lane.b32.xlu2 %v3803_v7, %s3691_s21 }
 0x64b   : > { %v846_v58 = vpop.xlane.xlu2 %845 }
 0x64c   : > { %3663 = vrcp.f32 %v846_v58  ;;  %v858_v1 = vand.u32 2147483648, %v846_v58  ;;  %v856_v4 = vand.u32 2147483647, %v846_v58  ;;  %vm852_vm3 = vweird.f32 %v846_v58 }
 0x64d   : > { %3665 = vrcp.f32 %v3692_v26 }
 0x64e   : > { %v859_v6 = vor.u32 1.1754944e-38, %v858_v1  ;;  %vm857_vm5 = vcmp.eq.f32.partialorder %v856_v4, 8.507059e+37  ;;  %v2890_v4 = vld [vmem:[%s4565_s7 + $0x98] sm:$0xf] }
 0x652   : > { %v3664_v61 = vpop.eup %3663 }
 0x653   : > { %v848_v62 = vmul.f32 %v3664_v61, %v846_v58  ;;  %v864_v63 = vpop.permute.xlu2 %863  ;;  %vm853_vm15 = vweird.f32 %v3664_v61  ;;  %v3666_v27 = vpop.eup %3665  ;;  %v3461_v58 = vld [vmem:[%s4565_s7 + $0xc] sm:$0xf] }
 0x654   : > { %v869_v7 = vsel %vm594_vm2, %v864_v63, 0  ;;  %vm854_vm4 = vmor %vm852_vm3, %vm853_vm15  ;;  %v912_v28 = vmul.f32 32.0, %v3666_v27  ;;  %v2815_v60 = vor.u32 %v3461_v58, %v2812_v59  ;;  %v3486_v63 = vld [vmem:[%s4565_s7 + $0xcc] sm:$0xf0]  ;;  %v2839_v59 = vor.u32 %v3464_v52, %v2836_v53  ;;  %v3500_v52 = vld [vmem:[%s4567_s9 + $0x40] sm:$0xff] }
 0x655   : > { %v849_v0 = vsub.f32 1.0, %v848_v62  ;;  %878 = vmatpush.bf16.msra.mxu1 %v869_v7  ;;  %v2882_v62 = vld [vmem:[%s4565_s7 + $0x90] sm:$0xf]  ;;  %v3478_v7 = vld [vmem:[%s4565_s7 + $0x94] sm:$0xf]  ;;  %v3508_v53 = vld [vmem:[%s4567_s9 + $0x80] sm:$0xff] }
 0x656   : > { %v913_v29 = vsub.f32 1.0, %v912_v28  ;;  %v2883_v1 = vor.u32 %v3486_v63, %v2882_v62  ;;  %v2914_v62 = vld [vmem:[%s4565_s7 + $0xb0] sm:$0xf] }
 0x657   : > { %v850_v3 = vmul.f32 %v3664_v61, %v849_v0  ;;  %v3490_v63 = vld [vmem:[%s4565_s7 + $0xec] sm:$0xf0] }
 0x658   : > { %v914_v31 = vmul.f32 %v3666_v27, %v913_v29 }
 0x659   : > { %v851_v5 = vadd.f32 %v3664_v61, %v850_v3  ;;  %1209 = vmatpush.bf16.msrb.mxu1 %v2875_v45  ;;  %v2884_v3 = vld [vmem:[%s4565_s7 + $0xd0] sm:$0xf0] }
 0x65a   : > { %v915_v32 = vadd.f32 %v3666_v27, %v914_v31 }
 0x65b   : > { %v855_v8 = vsel %vm854_vm4, %v3664_v61, %v851_v5  ;;  %v3487_v5 = vld [vmem:[%s4565_s7 + $0xd4] sm:$0xf0] }
 0x65c   : > { %v860_v9 = vsel %vm857_vm5, %v859_v6, %v855_v8  ;;  %v2887_v6 = vor.u32 %v3478_v7, %v2884_v3  ;;  %v2891_v8 = vor.u32 %v3487_v5, %v2890_v4  ;;  %v3482_v7 = vld [vmem:[%s4565_s7 + $0xb4] sm:$0xf]  ;;  %v3491_v3 = vld [vmem:[%s4565_s7 + $0xf4] sm:$0xf0]  ;;  %v3483_v4 = vld [vmem:[%s4565_s7 + $0xbc] sm:$0xf] }
 0x65d   : > { %v861_v10 = vmul.f32 %v3662_v47, %v860_v9  ;;  %v2876_v47 = vld [vmem:[%s4565_s7 + $0xc8] sm:$0xf0]  ;;  %1210 = vmatpush.bf16.msrb.mxu1 %v2811_v57  ;;  %v3479_v9 = vld [vmem:[%s4565_s7 + $0x9c] sm:$0xf] }
 0x65e   : > { %v2879_v48 = vor.u32 %v3477_v46, %v2876_v47  ;;  %1248 = vmatpush.bf16.msra.mxu0 %v2887_v6  ;;  %v2899_v46 = vor.u32 %v3488_v38, %v2898_v37  ;;  %v2903_v47 = vor.u32 %v3480_v39, %v2900_v40  ;;  %v2844_v57 = vld [vmem:[%s4565_s7 + $0x68] sm:$0xf0]  ;;  %v2924_v5 = vld [vmem:[%s4565_s7 + $0xf8] sm:$0xf0]  ;;  %v2915_v6 = vor.u32 %v3490_v63, %v2914_v62  ;;  %v3512_v37 = vld [vmem:[%s4567_s9 + $0xa0] sm:$0xff] }
 0x65f   : > { %v862_v11 = vpack.c.bf16 %v861_v10, %v861_v10  ;;  %v2892_v10 = vld [vmem:[%s4565_s7 + $0xd8] sm:$0xf0]  ;;  %v3496_v38 = vld [vmem:[%s4567_s9 + $0x20] sm:$0xff]  ;;  %v3530_v62 = vld [vmem:[%s4567_s9 + $0x130] sm:$0xff] }
 0x660   : > { %1222 = vmatpush.bf16.msra.mxu2 %v2879_v48  ;;  %v2834_v48 = vld [vmem:[%s4565_s7 + $0x20] sm:$0xf]  ;;  %v3503_v40 = vld [vmem:[%s4567_s9 + $0x58] sm:$0xff]  ;;  %v3554_v63 = vld [vmem:[%s4567_s9 + $0x1f0] sm:$0xff] }
 0x661   : > { %2798 = vmatmul.msk.bf16.vlgmr.msra.gmra.mxu1 %vm543_vm1, %v862_v11  ;;  %v2818_v11 = vld [vmem:[%s4565_s7 + $0x10] sm:$0xf]  ;;  %v2835_v58 = vor.u32 %v3472_v49, %v2834_v48  ;;  %v3520_v39 = vld [vmem:[%s4567_s9 + $0xe0] sm:$0xff]  ;;  %v3501_v48 = vld [vmem:[%s4567_s9 + $0x48] sm:$0xff] }
 0x662   : > { %1261 = vmatpush.bf16.msra.mxu1 %v2891_v8  ;;  %v3509_v49 = vld [vmem:[%s4567_s9 + $0x88] sm:$0xff] }
 0x664   : > { %1223 = vmatpush.bf16.msra.mxu2 %v2815_v60  ;;  %v2843_v60 = vor.u32 %v3473_v55, %v2842_v54  ;;  %v3539_v54 = vld [vmem:[%s4567_s9 + $0x178] sm:$0xff] }
 0x665   : > { %v3547_v55 = vld [vmem:[%s4567_s9 + $0x1b8] sm:$0xff] }
 0x666   : > { %v789_v12 = vpop.f32.mrf.mxu2 }
 0x667   : > { %v793_v13 = vpack.c.bf16 %v789_v12, %v789_v12 }
 0x669   : > { %2796 = vmatmul.msk.bf16.vlgmr.msra.gmra.mxu3 %vm543_vm1, %v793_v13  ;;  %v2895_v13 = vor.u32 %v3479_v9, %v2892_v10  ;;  %v2850_v9 = vld [vmem:[%s4565_s7 + $0x30] sm:$0xf] }
 0x66a   : > { %1235 = vmatpush.bf16.msra.mxu3 %v2883_v1  ;;  %v2922_v1 = vld [vmem:[%s4565_s7 + $0xb8] sm:$0xf]  ;;  %v3474_v10 = vld [vmem:[%s4565_s7 + $0x6c] sm:$0xf0] }
 0x66e   : > { %v791_v14 = vpop.f32.mrf.mxu2 }
 0x66f   : > { %v3470_v14 = vld [vmem:[%s4565_s7 + $0x4c] sm:$0xf0] }
 0x6de   : > { %v880_v15 = vpop.f32.mrf.mxu1 }
 0x6df   : > { %v884_v16 = vpack.c.bf16 %v880_v15, %v880_v15  ;;  %v3462_v15 = vld [vmem:[%s4565_s7 + $0x14] sm:$0xf] }
 0x6e1   : > { %2799 = vmatmul.msk.bf16.vlgmr.msrb.gmra.mxu2 %vm543_vm1, %v884_v16  ;;  %vm916_vm1 = vweird.f32 %v3666_v27  ;;  %v2819_v16 = vor.u32 %v3470_v14, %v2818_v11  ;;  %v2923_v11 = vor.u32 %v3491_v3, %v2922_v1  ;;  %v2852_v14 = vld [vmem:[%s4565_s7 + $0x70] sm:$0xf0]  ;;  %v3529_v1 = vld [vmem:[%s4567_s9 + $0x128] sm:$0xff] }
 0x6e2   : > { %v3869_v33 = vsel %vm916_vm1, %v3666_v27, %v915_v32  ;;  %1274 = vmatpush.bf16.msrb.mxu2 %v2895_v13  ;;  %v3642_v32 = vld [vmem:[%s4563_s5] ss:$0 sm:$0xff]  ;;  %v3466_v13 = vld [vmem:[%s4565_s7 + $0x34] sm:$0xf]  ;;  %v3553_v3 = vld [vmem:[%s4567_s9 + $0x1e8] sm:$0xff] }
 0x6e3   : > { %1236 = vmatpush.bf16.msra.mxu3 %v2819_v16  ;;  %v3475_v16 = vld [vmem:[%s4565_s7 + $0x74] sm:$0xf0] }
 0x6e6   : > { %v882_v17 = vpop.f32.mrf.mxu1 }
 0x6e7   : > { %v2820_v17 = vld [vmem:[%s4565_s7 + $0x50] sm:$0xf0] }
 0x6ec   : > { %v809_v18 = vpop.f32.mrf.mxu3 }
 0x6ed   : > { %v813_v19 = vadd.f32 %v809_v18, %v3846_v30  ;;  %v2826_v18 = vld [vmem:[%s4565_s7 + $0x18] sm:$0xf] }
 0x6f4   : > { %v811_v20 = vpop.f32.mrf.mxu3 }
 0x6f5   : > { %v2823_v20 = vor.u32 %v3462_v15, %v2820_v17  ;;  %v2858_v15 = vld [vmem:[%s4565_s7 + $0x38] sm:$0xf]  ;;  %v3467_v17 = vld [vmem:[%s4565_s7 + $0x3c] sm:$0xf] }
 0x6f7   : > { %1249 = vmatpush.bf16.msra.mxu0 %v2823_v20  ;;  %v2855_v20 = vor.u32 %v3466_v13, %v2852_v14  ;;  %v3527_v13 = vld [vmem:[%s4567_s9 + $0x118] sm:$0xff] }
 0x6f8   : > { %v3551_v14 = vld [vmem:[%s4567_s9 + $0x1d8] sm:$0xff] }
 0x764   : > { %v900_v21 = vpop.f32.mrf.mxu2 }
 0x765   : > { %v904_v22 = vadd.f32 %v900_v21, %v813_v19  ;;  %v3471_v19 = vld [vmem:[%s4565_s7 + $0x54] sm:$0xf0] }
 0x766   : > { %v2827_v21 = vor.u32 %v3471_v19, %v2826_v18  ;;  %v2860_v18 = vld [vmem:[%s4565_s7 + $0x78] sm:$0xf0]  ;;  %v2851_v19 = vor.u32 %v3474_v10, %v2850_v9 }
 0x767   : > { %v905_v23 = vadd.f32 %v904_v22, %v3795_v2  ;;  %v3463_v22 = vld [vmem:[%s4565_s7 + $0x1c] sm:$0xf] }
 0x768   : > { %1262 = vmatpush.bf16.msra.mxu1 %v2827_v21  ;;  %v2859_v21 = vor.u32 %v3475_v16, %v2858_v15  ;;  %v3535_v9 = vld [vmem:[%s4567_s9 + $0x158] sm:$0xff]  ;;  %v3533_v15 = vld [vmem:[%s4567_s9 + $0x148] sm:$0xff] }
 0x769   : > { %v908_v24 = vsel %vm513_vm0, %v905_v23, 0.0  ;;  %v3543_v10 = vld [vmem:[%s4567_s9 + $0x198] sm:$0xff]  ;;  %v3541_v16 = vld [vmem:[%s4567_s9 + $0x188] sm:$0xff] }
 0x76a   : > { %909 = vadd.xlane.f32.xlu1 %v908_v24 }
 0x76c   : > { %v902_v25 = vpop.f32.mrf.mxu2 }
 0x7dd   : > { %v910_v30 = vpop.xlane.xlu1 %909 }
 0x7de   : > { %v918_v34 = vmul.f32 %v3869_v33, %v910_v30 }
 0x7e0   : > { %v3872_v35 = vsub.f32 %v905_v23, %v918_v34  ;;  %v2828_v23 = vld [vmem:[%s4565_s7 + $0x58] sm:$0xf0]  ;;  %v3643_v34 = vld [vmem:[%s4564_s6] ss:$0 sm:$0xff] }
 0x7e1   : > { %v2831_v24 = vor.u32 %v3463_v22, %v2828_v23  ;;  %v2863_v22 = vor.u32 %v3467_v17, %v2860_v18  ;;  %v3507_v23 = vld [vmem:[%s4567_s9 + $0x78] sm:$0xff]  ;;  %v3526_v17 = vld [vmem:[%s4567_s9 + $0x110] sm:$0xff] }
 0x7e2   : > { %v920_v2 = vmul.f32 %v3872_v35, %v3872_v35  ;;  %v3550_v18 = vld [vmem:[%s4567_s9 + $0x1d0] sm:$0xff] }
 0x7e3   : > { %1275 = vmatpush.bf16.msrb.mxu2 %v2831_v24  ;;  %v3515_v24 = vld [vmem:[%s4567_s9 + $0xb8] sm:$0xff] }
 0x7e4   : > { %v921_v36 = vsel %vm513_vm0, %v920_v2, 0.0 }
 0x7e5   : > { %922 = vadd.xlane.f32.xlu0 %v921_v36 }
 0x858   : > { %v923_v61 = vpop.xlane.xlu0 %922 }
 0x859   : > { %v924_v0 = vmul.f32 %v923_v61, %v3869_v33  ;;  %v2847_v61 = vor.u32 %v3465_v56, %v2844_v57  ;;  %v3492_v56 = vld [vmem:[%s4567_s9] sm:$0xff] }
 0x85a   : > { %v3516_v57 = vld [vmem:[%s4567_s9 + $0xc0] sm:$0xff] }
 0x85b   : > { %v925_v12 = vadd.f32 1e-05, %v924_v0  ;;  %v2916_v0 = vld [vmem:[%s4565_s7 + $0xf0] sm:$0xf0] }
 0x85c   : > { %v2919_v8 = vor.u32 %v3482_v7, %v2916_v0  ;;  %v3537_v7 = vld [vmem:[%s4567_s9 + $0x168] sm:$0xff] }
 0x85d   : > { %3667 = vrsqrt.f32 %v925_v12  ;;  %vm932_vm6 = vweird.f32 %v925_v12  ;;  %v3545_v0 = vld [vmem:[%s4567_s9 + $0x1a8] sm:$0xff] }
 0x863   : > { %v3668_v25 = vpop.eup %3667 }
 0x864   : > { %v927_v26 = vmul.f32 %v3668_v25, %v925_v12  ;;  %vm933_vm2 = vweird.f32 %v3668_v25  ;;  %v2927_v12 = vor.u32 %v3483_v4, %v2924_v5  ;;  %v3536_v4 = vld [vmem:[%s4567_s9 + $0x160] sm:$0xff] }
 0x865   : > { %vm934_vm7 = vmor %vm932_vm6, %vm933_vm2  ;;  %v3544_v5 = vld [vmem:[%s4567_s9 + $0x1a0] sm:$0xff] }
 0x866   : > { %v928_v27 = vmul.f32 %v3668_v25, %v927_v26  ;;  %v3523_v26 = vld [vmem:[%s4567_s9 + $0xf8] sm:$0xff] }
 0x868   : > { %v929_v28 = vmul.f32 0.5, %v928_v27  ;;  %v3506_v27 = vld [vmem:[%s4567_s9 + $0x70] sm:$0xff] }
 0x86a   : > { %v930_v29 = vsub.f32 1.5, %v929_v28  ;;  %v3514_v28 = vld [vmem:[%s4567_s9 + $0xb0] sm:$0xff] }
 0x86c   : > { %v931_v31 = vmul.f32 %v3668_v25, %v930_v29  ;;  %v3498_v29 = vld [vmem:[%s4567_s9 + $0x30] sm:$0xff] }
 0x86e   : > { %v935_v30 = vsel %vm934_vm7, %v3668_v25, %v931_v31  ;;  %v3499_v25 = vld [vmem:[%s4567_s9 + $0x38] sm:$0xff]  ;;  %v3522_v31 = vld [vmem:[%s4567_s9 + $0xf0] sm:$0xff] }
 0x86f   : > { %v936_v2 = vmul.f32 %v935_v30, %v3872_v35  ;;  %v2906_v35 = vld [vmem:[%s4565_s7 + $0xa8] sm:$0xf] }
 0x870   : > { %v2907_v50 = vor.u32 %v3489_v42, %v2906_v35  ;;  %v3513_v30 = vld [vmem:[%s4567_s9 + $0xa8] sm:$0xff]  ;;  %v3511_v35 = vld [vmem:[%s4567_s9 + $0x98] sm:$0xff] }
 0x871   : > { %v940_v36 = vmul.f32 %v3642_v32, %v936_v2  ;;  %v3505_v32 = vld [vmem:[%s4567_s9 + $0x68] sm:$0xff]  ;;  %v3495_v42 = vld [vmem:[%s4567_s9 + $0x18] sm:$0xff] }
 0x872   : > { %v3521_v2 = vld [vmem:[%s4567_s9 + $0xe8] sm:$0xff] }
 0x873   : > { %v3996_v41 = vadd.f32 %v3643_v34, %v940_v36  ;;  %v3497_v34 = vld [vmem:[%s4567_s9 + $0x28] sm:$0xff]  ;;  %v3504_v36 = vld [vmem:[%s4567_s9 + $0x60] sm:$0xff] }
 0x875   : > { %v4009_v45 = vpack.c.bf16 %v3996_v41, %v3996_v41 }
 0x877   : > { %2928 = vmatmul.msk.bf16.vlgmr.msrb.gmra.mxu3 %vm513_vm0, %v4009_v45  ;;  %2929 = vmatmul.msk.bf16.vlgmr.msrb.gmra.mxu0 %vm513_vm0, %v4009_v45 }
 0x878   : > { %2930 = vmatmul.msk.bf16.vlgmr.msrb.gmra.mxu1 %vm513_vm0, %v4009_v45  ;;  %2931 = vmatmul.msk.bf16.vlgmr.msra.gmra.mxu2 %vm513_vm0, %v4009_v45 }
 0x879   : > { %1287 = vmatpush.bf16.msrb.mxu3 %v2899_v46  ;;  %1300 = vmatpush.bf16.msrb.mxu0 %v2903_v47  ;;  %v3510_v46 = vld [vmem:[%s4567_s9 + $0x90] sm:$0xff] }
 0x87a   : > { %1313 = vmatpush.bf16.msrb.mxu1 %v2907_v50  ;;  %1326 = vmatpush.bf16.msra.mxu2 %v2911_v51  ;;  %v3494_v47 = vld [vmem:[%s4567_s9 + $0x10] sm:$0xff]  ;;  %v3493_v50 = vld [vmem:[%s4567_s9 + $0x8] sm:$0xff] }
 0x87b   : > { %v3517_v51 = vld [vmem:[%s4567_s9 + $0xc8] sm:$0xff] }
 0x87d   : > { %1288 = vmatpush.bf16.msrb.mxu3 %v2835_v58  ;;  %1301 = vmatpush.bf16.msrb.mxu0 %v2839_v59  ;;  %v3531_v58 = vld [vmem:[%s4567_s9 + $0x138] sm:$0xff] }
 0x87e   : > { %1314 = vmatpush.bf16.msrb.mxu1 %v2843_v60  ;;  %1327 = vmatpush.bf16.msra.mxu2 %v2847_v61  ;;  %v3555_v59 = vld [vmem:[%s4567_s9 + $0x1f8] sm:$0xff]  ;;  %v3538_v60 = vld [vmem:[%s4567_s9 + $0x170] sm:$0xff] }
 0x87f   : > { %v3546_v61 = vld [vmem:[%s4567_s9 + $0x1b0] sm:$0xff] }
 0x887   : > { %2932 = vmatmul.msk.bf16.vlgmr.msra.gmra.mxu3 %vm513_vm0, %v4009_v45  ;;  %2933 = vmatmul.msk.bf16.vlgmr.msra.gmra.mxu0 %vm513_vm0, %v4009_v45 }
 0x888   : > { %2934 = vmatmul.msk.bf16.vlgmr.msra.gmra.mxu1 %vm513_vm0, %v4009_v45  ;;  %2935 = vmatmul.msk.bf16.vlgmr.msrb.gmra.mxu2 %vm513_vm0, %v4009_v45 }
 0x889   : > { %1339 = vmatpush.bf16.msra.mxu3 %v2915_v6  ;;  %1352 = vmatpush.bf16.msra.mxu0 %v2919_v8  ;;  %v3528_v6 = vld [vmem:[%s4567_s9 + $0x120] sm:$0xff] }
 0x88a   : > { %1365 = vmatpush.bf16.msra.mxu1 %v2923_v11  ;;  %1378 = vmatpush.bf16.msrb.mxu2 %v2927_v12  ;;  %v3552_v8 = vld [vmem:[%s4567_s9 + $0x1e0] sm:$0xff]  ;;  %v3534_v11 = vld [vmem:[%s4567_s9 + $0x150] sm:$0xff] }
 0x88b   : > { %v3542_v12 = vld [vmem:[%s4567_s9 + $0x190] sm:$0xff] }
 0x88d   : > { %1340 = vmatpush.bf16.msra.mxu3 %v2851_v19  ;;  %1353 = vmatpush.bf16.msra.mxu0 %v2855_v20  ;;  %v3532_v19 = vld [vmem:[%s4567_s9 + $0x140] sm:$0xff] }
 0x88e   : > { %1366 = vmatpush.bf16.msra.mxu1 %v2859_v21  ;;  %1379 = vmatpush.bf16.msrb.mxu2 %v2863_v22  ;;  %v3540_v20 = vld [vmem:[%s4567_s9 + $0x180] sm:$0xff]  ;;  %v3525_v21 = vld [vmem:[%s4567_s9 + $0x108] sm:$0xff] }
 0x88f   : > { %v3549_v22 = vld [vmem:[%s4567_s9 + $0x1c8] sm:$0xff] }
 0x897   : > { %2936 = vmatmul.msk.bf16.vlgmr.msrb.gmra.mxu3 %vm513_vm0, %v4009_v45  ;;  %2937 = vmatmul.msk.bf16.vlgmr.msrb.gmra.mxu0 %vm513_vm0, %v4009_v45 }
 0x898   : > { %2938 = vmatmul.msk.bf16.vlgmr.msrb.gmra.mxu1 %vm513_vm0, %v4009_v45  ;;  %2939 = vmatmul.msk.bf16.vlgmr.msra.gmra.mxu2 %vm513_vm0, %v4009_v45 }
 0x899   : > { %2458 = vmatpush.bf16.msrb.mxu0 %v3507_v23  ;;  %2471 = vmatpush.bf16.msrb.mxu1 %v3515_v24  ;;  %v3524_v23 = vld [vmem:[%s4567_s9 + $0x100] sm:$0xff] }
 0x89a   : > { %2445 = vmatpush.bf16.msrb.mxu3 %v3499_v25  ;;  %2484 = vmatpush.bf16.msra.mxu2 %v3523_v26  ;;  %v3548_v24 = vld [vmem:[%s4567_s9 + $0x1c0] sm:$0xff] }
 0x89b   : > { %v4310_v25 = vld [vmem:[%s4566_s8] sm:$0xff] }
 0x89c   : > { %v983_v26 = vperm.slane %v4310_v25, 1 }
 0x89d   : > { %2459 = vmatpush.bf16.msrb.mxu0 %v3506_v27  ;;  %2472 = vmatpush.bf16.msrb.mxu1 %v3514_v28  ;;  %v984_v27 = vperm.slane %v4310_v25, 2 }
 0x89e   : > { %2446 = vmatpush.bf16.msrb.mxu3 %v3498_v29  ;;  %2485 = vmatpush.bf16.msra.mxu2 %v3522_v31 }
 0x8a1   : > { %2460 = vmatpush.bf16.msrb.mxu0 %v3505_v32  ;;  %2473 = vmatpush.bf16.msrb.mxu1 %v3513_v30 }
 0x8a2   : > { %2447 = vmatpush.bf16.msrb.mxu3 %v3497_v34  ;;  %2486 = vmatpush.bf16.msra.mxu2 %v3521_v2  ;;  %v982_v34 = vperm.slane %v4310_v25, 0 }
 0x8a5   : > { %2461 = vmatpush.bf16.msrb.mxu0 %v3504_v36  ;;  %2474 = vmatpush.bf16.msrb.mxu1 %v3512_v37  ;;  %v985_v36 = vperm.slane %v4310_v25, 3  ;;  %v3571_v37 = vld [vmem:[%s4567_s9 + $0x278] sm:$0xff] }
 0x8a6   : > { %2448 = vmatpush.bf16.msrb.mxu3 %v3496_v38  ;;  %2487 = vmatpush.bf16.msra.mxu2 %v3520_v39  ;;  %v3579_v39 = vld [vmem:[%s4567_s9 + $0x2b8] sm:$0xff] }
 0x8a7   : > { %2940 = vmatmul.msk.bf16.vlgmr.msra.gmra.mxu3 %vm513_vm0, %v4009_v45  ;;  %2941 = vmatmul.msk.bf16.vlgmr.msra.gmra.mxu0 %vm513_vm0, %v4009_v45 }
 0x8a8   : > { %2942 = vmatmul.msk.bf16.vlgmr.msra.gmra.mxu1 %vm513_vm0, %v4009_v45  ;;  %2943 = vmatmul.msk.bf16.vlgmr.msrb.gmra.mxu2 %vm513_vm0, %v4009_v45  ;;  %v3518_v45 = vld [vmem:[%s4567_s9 + $0xd0] sm:$0xff] }
 0x8a9   : > { %2462 = vmatpush.bf16.msrb.mxu0 %v3503_v40  ;;  %2475 = vmatpush.bf16.msrb.mxu1 %v3511_v35 }
 0x8aa   : > { %2449 = vmatpush.bf16.msrb.mxu3 %v3495_v42  ;;  %2488 = vmatpush.bf16.msra.mxu2 %v3519_v43 }
 0x8ad   : > { %2463 = vmatpush.bf16.msrb.mxu0 %v3502_v44  ;;  %2476 = vmatpush.bf16.msrb.mxu1 %v3510_v46 }
 0x8ae   : > { %2450 = vmatpush.bf16.msrb.mxu3 %v3494_v47  ;;  %2489 = vmatpush.bf16.msra.mxu2 %v3518_v45  ;;  %v3570_v47 = vld [vmem:[%s4567_s9 + $0x270] sm:$0xff] }
 0x8b1   : > { %2464 = vmatpush.bf16.msrb.mxu0 %v3501_v48  ;;  %2477 = vmatpush.bf16.msrb.mxu1 %v3509_v49  ;;  %v3578_v49 = vld [vmem:[%s4567_s9 + $0x2b0] sm:$0xff] }
 0x8b2   : > { %2451 = vmatpush.bf16.msrb.mxu3 %v3493_v50  ;;  %2490 = vmatpush.bf16.msra.mxu2 %v3517_v51  ;;  %v3563_v51 = vld [vmem:[%s4567_s9 + $0x238] sm:$0xff] }
 0x8b5   : > { %2465 = vmatpush.bf16.msrb.mxu0 %v3500_v52  ;;  %2478 = vmatpush.bf16.msrb.mxu1 %v3508_v53  ;;  %v3587_v53 = vld [vmem:[%s4567_s9 + $0x2f8] sm:$0xff] }
 0x8b6   : > { %2452 = vmatpush.bf16.msrb.mxu3 %v3492_v56  ;;  %2491 = vmatpush.bf16.msra.mxu2 %v3516_v57  ;;  %v3577_v56 = vld [vmem:[%s4567_s9 + $0x2a8] sm:$0xff]  ;;  %v987_v57 = vperm.slane %v4310_v25, 5 }
 0x8b9   : > { %2510 = vmatpush.bf16.msra.mxu0 %v3539_v54  ;;  %2523 = vmatpush.bf16.msra.mxu1 %v3547_v55  ;;  %v3569_v55 = vld [vmem:[%s4567_s9 + $0x268] sm:$0xff] }
 0x8ba   : > { %2497 = vmatpush.bf16.msra.mxu3 %v3531_v58  ;;  %2536 = vmatpush.bf16.msrb.mxu2 %v3555_v59  ;;  %v988_v59 = vperm.slane %v4310_v25, 6 }
 0x8bd   : > { %2511 = vmatpush.bf16.msra.mxu0 %v3538_v60  ;;  %2524 = vmatpush.bf16.msra.mxu1 %v3546_v61  ;;  %v3562_v60 = vld [vmem:[%s4567_s9 + $0x230] sm:$0xff] }
 0x8be   : > { %2498 = vmatpush.bf16.msra.mxu3 %v3530_v62  ;;  %2537 = vmatpush.bf16.msrb.mxu2 %v3554_v63  ;;  %v3586_v62 = vld [vmem:[%s4567_s9 + $0x2f0] sm:$0xff] }
 0x8c1   : > { %2512 = vmatpush.bf16.msra.mxu0 %v3537_v7  ;;  %2525 = vmatpush.bf16.msra.mxu1 %v3545_v0  ;;  %v3568_v7 = vld [vmem:[%s4567_s9 + $0x260] sm:$0xff] }
 0x8c2   : > { %2499 = vmatpush.bf16.msra.mxu3 %v3529_v1  ;;  %2538 = vmatpush.bf16.msrb.mxu2 %v3553_v3  ;;  %v3576_v3 = vld [vmem:[%s4567_s9 + $0x2a0] sm:$0xff] }
 0x8c5   : > { %2513 = vmatpush.bf16.msra.mxu0 %v3536_v4  ;;  %2526 = vmatpush.bf16.msra.mxu1 %v3544_v5  ;;  %v3561_v5 = vld [vmem:[%s4567_s9 + $0x228] sm:$0xff] }
 0x8c6   : > { %2500 = vmatpush.bf16.msra.mxu3 %v3528_v6  ;;  %2539 = vmatpush.bf16.msrb.mxu2 %v3552_v8  ;;  %v3585_v8 = vld [vmem:[%s4567_s9 + $0x2e8] sm:$0xff] }
 0x8c9   : > { %2514 = vmatpush.bf16.msra.mxu0 %v3535_v9  ;;  %2527 = vmatpush.bf16.msra.mxu1 %v3543_v10  ;;  %v986_v9 = vperm.slane %v4310_v25, 4 }
 0x8ca   : > { %2501 = vmatpush.bf16.msra.mxu3 %v3527_v13  ;;  %2540 = vmatpush.bf16.msrb.mxu2 %v3551_v14  ;;  %v3575_v14 = vld [vmem:[%s4567_s9 + $0x298] sm:$0xff] }
 0x8cd   : > { %2515 = vmatpush.bf16.msra.mxu0 %v3534_v11  ;;  %2528 = vmatpush.bf16.msra.mxu1 %v3542_v12  ;;  %v989_v11 = vperm.slane %v4310_v25, 7  ;;  %v3567_v12 = vld [vmem:[%s4567_s9 + $0x258] sm:$0xff] }
 0x8ce   : > { %2502 = vmatpush.bf16.msra.mxu3 %v3526_v17  ;;  %2541 = vmatpush.bf16.msrb.mxu2 %v3550_v18  ;;  %v3560_v17 = vld [vmem:[%s4567_s9 + $0x220] sm:$0xff] }
 0x8d1   : > { %2516 = vmatpush.bf16.msra.mxu0 %v3533_v15  ;;  %2529 = vmatpush.bf16.msra.mxu1 %v3541_v16 }
 0x8d2   : > { %2503 = vmatpush.bf16.msra.mxu3 %v3525_v21  ;;  %2542 = vmatpush.bf16.msrb.mxu2 %v3549_v22 }
 0x8d5   : > { %2517 = vmatpush.bf16.msra.mxu0 %v3532_v19  ;;  %2530 = vmatpush.bf16.msra.mxu1 %v3540_v20  ;;  %v3584_v20 = vld [vmem:[%s4567_s9 + $0x2e0] sm:$0xff] }
 0x8d6   : > { %2504 = vmatpush.bf16.msra.mxu3 %v3524_v23  ;;  %2543 = vmatpush.bf16.msrb.mxu2 %v3548_v24  ;;  %v3566_v23 = vld [vmem:[%s4567_s9 + $0x250] sm:$0xff] }
 0x8f4   : > { %v1199_v28 = vpop.f32.mrf.mxu0 }
 0x8f5   : > { %v1200_v29 = vadd.f32 %v1199_v28, %v983_v26  ;;  %v1212_v31 = vpop.f32.mrf.mxu1  ;;  %v3574_v26 = vld [vmem:[%s4567_s9 + $0x290] sm:$0xff]  ;;  %v3559_v28 = vld [vmem:[%s4567_s9 + $0x218] sm:$0xff] }
 0x8f6   : > { %v1213_v32 = vadd.f32 %v1212_v31, %v984_v27 }
 0x8f7   : > { %v1386_v30 = vmax.f32 %v1200_v29, 0.0  ;;  %v4386_v29 = vld [vmem:[%s4566_s8 + $0x8] sm:$0xff] }
 0x8f8   : > { %v1387_v2 = vmax.f32 %v1213_v32, 0.0  ;;  %v3583_v32 = vld [vmem:[%s4567_s9 + $0x2d8] sm:$0xff] }
 0x8f9   : > { %v1402_v38 = vpack.c.bf16 %v1386_v30, %v1386_v30 }
 0x8fa   : > { %v1403_v40 = vpack.c.bf16 %v1387_v2, %v1387_v2  ;;  %v1186_v35 = vpop.f32.mrf.mxu3  ;;  %v3573_v2 = vld [vmem:[%s4567_s9 + $0x288] sm:$0xff] }
 0x8fb   : > { %v1187_v42 = vadd.f32 %v1186_v35, %v982_v34  ;;  %v1225_v43 = vpop.f32.mrf.mxu2  ;;  %2466 = vmatmul.bf16.vlgmr.msrb.gmra.mxu0 %v1402_v38  ;;  %v3565_v34 = vld [vmem:[%s4567_s9 + $0x248] sm:$0xff]  ;;  %v992_v38 = vperm.slane %v4386_v29, 2  ;;  %v3582_v35 = vld [vmem:[%s4567_s9 + $0x2d0] sm:$0xff] }
 0x8fc   : > { %v1226_v44 = vadd.f32 %v1225_v43, %v985_v36  ;;  %2479 = vmatmul.bf16.vlgmr.msrb.gmra.mxu1 %v1403_v40  ;;  %2562 = vmatpush.bf16.msrb.mxu0 %v3571_v37  ;;  %v1201_v46 = vpop.f32.mrf.mxu0  ;;  %v991_v36 = vperm.slane %v4386_v29, 1  ;;  %v3564_v43 = vld [vmem:[%s4567_s9 + $0x240] sm:$0xff] }
 0x8fd   : > { %v1385_v45 = vmax.f32 %v1187_v42, 0.0  ;;  %2575 = vmatpush.bf16.msrb.mxu1 %v3579_v39  ;;  %v1214_v48 = vpop.f32.mrf.mxu1  ;;  %v3558_v39 = vld [vmem:[%s4567_s9 + $0x210] sm:$0xff] }
 0x8fe   : > { %v1388_v50 = vmax.f32 %v1226_v44, 0.0 }
 0x8ff   : > { %v1401_v52 = vpack.c.bf16 %v1385_v45, %v1385_v45  ;;  %v3603_v45 = vld [vmem:[%s4567_s9 + $0x378] sm:$0xff] }
 0x900   : > { %v1404_v54 = vpack.c.bf16 %v1388_v50, %v1388_v50  ;;  %2563 = vmatpush.bf16.msrb.mxu0 %v3570_v47  ;;  %v3572_v47 = vld [vmem:[%s4567_s9 + $0x280] sm:$0xff]  ;;  %v3557_v50 = vld [vmem:[%s4567_s9 + $0x208] sm:$0xff] }
 0x901   : > { %2576 = vmatpush.bf16.msrb.mxu1 %v3578_v49  ;;  %2453 = vmatmul.bf16.vlgmr.msrb.gmra.mxu3 %v1401_v52  ;;  %v3611_v49 = vld [vmem:[%s4567_s9 + $0x3b8] sm:$0xff]  ;;  %v3581_v52 = vld [vmem:[%s4567_s9 + $0x2c8] sm:$0xff] }
 0x902   : > { %2492 = vmatmul.bf16.vlgmr.msra.gmra.mxu2 %v1404_v54  ;;  %2549 = vmatpush.bf16.msrb.mxu3 %v3563_v51  ;;  %v1188_v58 = vpop.f32.mrf.mxu3 }
 0x903   : > { %2588 = vmatpush.bf16.msra.mxu2 %v3587_v53  ;;  %v1227_v61 = vpop.f32.mrf.mxu2  ;;  %v990_v53 = vperm.slane %v4386_v29, 0 }
 0x904   : > { %2564 = vmatpush.bf16.msrb.mxu0 %v3569_v55  ;;  %v1251_v63 = vpop.f32.mrf.mxu0  ;;  %v993_v55 = vperm.slane %v4386_v29, 3  ;;  %v3556_v61 = vld [vmem:[%s4567_s9 + $0x200] sm:$0xff] }
 0x905   : > { %2577 = vmatpush.bf16.msrb.mxu1 %v3577_v56  ;;  %v1252_v0 = vadd.f32 %v1251_v63, %v987_v57  ;;  %v1264_v1 = vpop.f32.mrf.mxu1  ;;  %v3602_v57 = vld [vmem:[%s4567_s9 + $0x370] sm:$0xff] }
 0x906   : > { %v1265_v4 = vadd.f32 %v1264_v1, %v988_v59  ;;  %2550 = vmatpush.bf16.msrb.mxu3 %v3562_v60  ;;  %v3610_v60 = vld [vmem:[%s4567_s9 + $0x3b0] sm:$0xff] }
 0x907   : > { %v1390_v6 = vmax.f32 %v1252_v0, 0.0  ;;  %2589 = vmatpush.bf16.msra.mxu2 %v3586_v62  ;;  %v3595_v0 = vld [vmem:[%s4567_s9 + $0x338] sm:$0xff] }
 0x908   : > { %v1391_v10 = vmax.f32 %v1265_v4, 0.0  ;;  %2565 = vmatpush.bf16.msrb.mxu0 %v3568_v7  ;;  %v3580_v7 = vld [vmem:[%s4567_s9 + $0x2c0] sm:$0xff]  ;;  %v3619_v4 = vld [vmem:[%s4567_s9 + $0x3f8] sm:$0xff] }
 0x909   : > { %v1406_v13 = vpack.c.bf16 %v1390_v6, %v1390_v6  ;;  %2578 = vmatpush.bf16.msrb.mxu1 %v3576_v3 }
 0x90a   : > { %v1407_v15 = vpack.c.bf16 %v1391_v10, %v1391_v10  ;;  %2551 = vmatpush.bf16.msrb.mxu3 %v3561_v5  ;;  %v1238_v16 = vpop.f32.mrf.mxu3  ;;  %v3609_v10 = vld [vmem:[%s4567_s9 + $0x3a8] sm:$0xff] }
 0x90b   : > { %2590 = vmatpush.bf16.msra.mxu2 %v3585_v8  ;;  %v1239_v18 = vadd.f32 %v1238_v16, %v986_v9  ;;  %v1277_v19 = vpop.f32.mrf.mxu2  ;;  %2518 = vmatmul.bf16.vlgmr.msra.gmra.mxu0 %v1406_v13  ;;  %v3601_v8 = vld [vmem:[%s4567_s9 + $0x368] sm:$0xff] }
 0x90c   : > { %v1278_v21 = vadd.f32 %v1277_v19, %v989_v11  ;;  %2531 = vmatmul.bf16.vlgmr.msra.gmra.mxu1 %v1407_v15  ;;  %2566 = vmatpush.bf16.msrb.mxu0 %v3567_v12  ;;  %v1253_v22 = vpop.f32.mrf.mxu0  ;;  %v3594_v12 = vld [vmem:[%s4567_s9 + $0x330] sm:$0xff]  ;;  %v3600_v15 = vld [vmem:[%s4567_s9 + $0x360] sm:$0xff]  ;;  %v3593_v19 = vld [vmem:[%s4567_s9 + $0x328] sm:$0xff] }
 0x90d   : > { %v1389_v24 = vmax.f32 %v1239_v18, 0.0  ;;  %2579 = vmatpush.bf16.msrb.mxu1 %v3575_v14  ;;  %v1266_v25 = vpop.f32.mrf.mxu1  ;;  %v3618_v14 = vld [vmem:[%s4567_s9 + $0x3f0] sm:$0xff] }
 0x90e   : > { %v1392_v27 = vmax.f32 %v1278_v21, 0.0  ;;  %2552 = vmatpush.bf16.msrb.mxu3 %v3560_v17  ;;  %v3608_v17 = vld [vmem:[%s4567_s9 + $0x3a0] sm:$0xff]  ;;  %v3617_v21 = vld [vmem:[%s4567_s9 + $0x3e8] sm:$0xff] }
 0x90f   : > { %v1405_v31 = vpack.c.bf16 %v1389_v24, %v1389_v24  ;;  %2591 = vmatpush.bf16.msra.mxu2 %v3584_v20  ;;  %v3607_v24 = vld [vmem:[%s4567_s9 + $0x398] sm:$0xff]  ;;  %v3592_v25 = vld [vmem:[%s4567_s9 + $0x320] sm:$0xff] }
 0x910   : > { %v1408_v30 = vpack.c.bf16 %v1392_v27, %v1392_v27  ;;  %2567 = vmatpush.bf16.msrb.mxu0 %v3566_v23  ;;  %v3599_v23 = vld [vmem:[%s4567_s9 + $0x358] sm:$0xff]  ;;  %v3598_v27 = vld [vmem:[%s4567_s9 + $0x350] sm:$0xff] }
 0x911   : > { %2580 = vmatpush.bf16.msrb.mxu1 %v3574_v26  ;;  %2505 = vmatmul.bf16.vlgmr.msra.gmra.mxu3 %v1405_v31  ;;  %v3616_v26 = vld [vmem:[%s4567_s9 + $0x3e0] sm:$0xff] }
 0x912   : > { %2544 = vmatmul.bf16.vlgmr.msrb.gmra.mxu2 %v1408_v30  ;;  %2553 = vmatpush.bf16.msrb.mxu3 %v3559_v28  ;;  %v1240_v37 = vpop.f32.mrf.mxu3  ;;  %v995_v28 = vperm.slane %v4386_v29, 5  ;;  %v996_v30 = vperm.slane %v4386_v29, 6 }
 0x913   : > { %2592 = vmatpush.bf16.msra.mxu2 %v3583_v32  ;;  %v1279_v40 = vpop.f32.mrf.mxu2  ;;  %v3606_v32 = vld [vmem:[%s4567_s9 + $0x390] sm:$0xff]  ;;  %v3615_v37 = vld [vmem:[%s4567_s9 + $0x3d8] sm:$0xff] }
 0x914   : > { %2568 = vmatpush.bf16.msrb.mxu0 %v3565_v34  ;;  %v1303_v42 = vpop.f32.mrf.mxu0 }
 0x915   : > { %2581 = vmatpush.bf16.msrb.mxu1 %v3573_v2  ;;  %v1304_v44 = vadd.f32 %v1303_v42, %v991_v36  ;;  %v1316_v46 = vpop.f32.mrf.mxu1  ;;  %v3591_v2 = vld [vmem:[%s4567_s9 + $0x318] sm:$0xff] }
 0x916   : > { %v1317_v48 = vadd.f32 %v1316_v46, %v992_v38  ;;  %2554 = vmatpush.bf16.msrb.mxu3 %v3558_v39  ;;  %v3597_v39 = vld [vmem:[%s4567_s9 + $0x348] sm:$0xff]  ;;  %v3614_v46 = vld [vmem:[%s4567_s9 + $0x3d0] sm:$0xff] }
 0x917   : > { %v1394_v51 = vmax.f32 %v1304_v44, 0.0  ;;  %2593 = vmatpush.bf16.msra.mxu2 %v3582_v35  ;;  %v3605_v35 = vld [vmem:[%s4567_s9 + $0x388] sm:$0xff]  ;;  %v994_v44 = vperm.slane %v4386_v29, 4 }
 0x918   : > { %v1395_v54 = vmax.f32 %v1317_v48, 0.0  ;;  %2569 = vmatpush.bf16.msrb.mxu0 %v3564_v43  ;;  %v3590_v43 = vld [vmem:[%s4567_s9 + $0x310] sm:$0xff] }
 0x919   : > { %v1410_v56 = vpack.c.bf16 %v1394_v51, %v1394_v51  ;;  %2582 = vmatpush.bf16.msrb.mxu1 %v3572_v47  ;;  %v997_v47 = vperm.slane %v4386_v29, 7 }
 0x91a   : > { %v1411_v58 = vpack.c.bf16 %v1395_v54, %v1395_v54  ;;  %2555 = vmatpush.bf16.msrb.mxu3 %v3557_v50  ;;  %v1290_v59 = vpop.f32.mrf.mxu3  ;;  %v3604_v50 = vld [vmem:[%s4567_s9 + $0x380] sm:$0xff]  ;;  %v3613_v54 = vld [vmem:[%s4567_s9 + $0x3c8] sm:$0xff] }
 0x91b   : > { %2594 = vmatpush.bf16.msra.mxu2 %v3581_v52  ;;  %v1291_v62 = vadd.f32 %v1290_v59, %v990_v53  ;;  %v1329_v63 = vpop.f32.mrf.mxu2  ;;  %2570 = vmatmul.bf16.vlgmr.msrb.gmra.mxu0 %v1410_v56  ;;  %v3589_v53 = vld [vmem:[%s4567_s9 + $0x308] sm:$0xff] }
 0x91c   : > { %2614 = vmatpush.bf16.msra.mxu0 %v3603_v45  ;;  %v1330_v1 = vadd.f32 %v1329_v63, %v993_v55  ;;  %2583 = vmatmul.bf16.vlgmr.msrb.gmra.mxu1 %v1411_v58  ;;  %v1305_v3 = vpop.f32.mrf.mxu0  ;;  %v3596_v45 = vld [vmem:[%s4567_s9 + $0x340] sm:$0xff] }
 0x91d   : > { %2627 = vmatpush.bf16.msra.mxu1 %v3611_v49  ;;  %v1393_v5 = vmax.f32 %v1291_v62, 0.0  ;;  %v1318_v6 = vpop.f32.mrf.mxu1  ;;  %v3588_v58 = vld [vmem:[%s4567_s9 + $0x300] sm:$0xff] }
 0x91e   : > { %v1396_v9 = vmax.f32 %v1330_v1, 0.0  ;;  %2556 = vmatpush.bf16.msrb.mxu3 %v3556_v61 }
 0x91f   : > { %v1409_v11 = vpack.c.bf16 %v1393_v5, %v1393_v5  ;;  %2595 = vmatpush.bf16.msra.mxu2 %v3580_v7 }
 0x920   : > { %2615 = vmatpush.bf16.msra.mxu0 %v3602_v57  ;;  %v1412_v13 = vpack.c.bf16 %v1396_v9, %v1396_v9 }
 0x921   : > { %2628 = vmatpush.bf16.msra.mxu1 %v3610_v60  ;;  %2557 = vmatmul.bf16.vlgmr.msrb.gmra.mxu3 %v1409_v11  ;;  %v3612_v60 = vld [vmem:[%s4567_s9 + $0x3c0] sm:$0xff] }
 0x922   : > { %2601 = vmatpush.bf16.msra.mxu3 %v3595_v0  ;;  %2596 = vmatmul.bf16.vlgmr.msra.gmra.mxu2 %v1412_v13  ;;  %v1292_v16 = vpop.f32.mrf.mxu3  ;;  %v3644_v13 = vld [vmem:[%s4568_s10] ss:$0 sm:$0xff] }
 0x923   : > { %2640 = vmatpush.bf16.msrb.mxu2 %v3619_v4  ;;  %v1331_v18 = vpop.f32.mrf.mxu2 }
 0x924   : > { %2616 = vmatpush.bf16.msra.mxu0 %v3601_v8  ;;  %v1355_v20 = vpop.f32.mrf.mxu0 }
 0x925   : > { %2629 = vmatpush.bf16.msra.mxu1 %v3609_v10  ;;  %v1368_v22 = vpop.f32.mrf.mxu1  ;;  %v1356_v40 = vadd.f32 %v1355_v20, %v995_v28 }
 0x926   : > { %2602 = vmatpush.bf16.msra.mxu3 %v3594_v12  ;;  %v1369_v42 = vadd.f32 %v1368_v22, %v996_v30 }
 0x927   : > { %2641 = vmatpush.bf16.msrb.mxu2 %v3618_v14  ;;  %v1398_v48 = vmax.f32 %v1356_v40, 0.0 }
 0x928   : > { %2617 = vmatpush.bf16.msra.mxu0 %v3600_v15  ;;  %v1399_v51 = vmax.f32 %v1369_v42, 0.0 }
 0x929   : > { %2630 = vmatpush.bf16.msra.mxu1 %v3608_v17  ;;  %v1414_v56 = vpack.c.bf16 %v1398_v48, %v1398_v48 }
 0x92a   : > { %2603 = vmatpush.bf16.msra.mxu3 %v3593_v19  ;;  %v1342_v31 = vpop.f32.mrf.mxu3  ;;  %v1415_v57 = vpack.c.bf16 %v1399_v51, %v1399_v51 }
 0x92b   : > { %2642 = vmatpush.bf16.msrb.mxu2 %v3617_v21  ;;  %v1381_v34 = vpop.f32.mrf.mxu2  ;;  %v1343_v29 = vadd.f32 %v1342_v31, %v994_v44 }
 0x92c   : > { %2618 = vmatpush.bf16.msra.mxu0 %v3599_v23  ;;  %v1357_v36 = vpop.f32.mrf.mxu0  ;;  %v1382_v55 = vadd.f32 %v1381_v34, %v997_v47 }
 0x92d   : > { %2631 = vmatpush.bf16.msra.mxu1 %v3607_v24  ;;  %v1370_v38 = vpop.f32.mrf.mxu1  ;;  %v1397_v59 = vmax.f32 %v1343_v29, 0.0 }
 0x92e   : > { %2604 = vmatpush.bf16.msra.mxu3 %v3592_v25  ;;  %v1400_v61 = vmax.f32 %v1382_v55, 0.0 }
 0x92f   : > { %2643 = vmatpush.bf16.msrb.mxu2 %v3616_v26  ;;  %v1413_v62 = vpack.c.bf16 %v1397_v59, %v1397_v59 }
 0x930   : > { %2619 = vmatpush.bf16.msra.mxu0 %v3598_v27  ;;  %v1416_v63 = vpack.c.bf16 %v1400_v61, %v1400_v61 }
 0x931   : > { %2632 = vmatpush.bf16.msra.mxu1 %v3606_v32 }
 0x932   : > { %2605 = vmatpush.bf16.msra.mxu3 %v3591_v2  ;;  %v1344_v49 = vpop.f32.mrf.mxu3 }
 0x933   : > { %2644 = vmatpush.bf16.msrb.mxu2 %v3615_v37  ;;  %v1383_v52 = vpop.f32.mrf.mxu2 }
 0x934   : > { %2620 = vmatpush.bf16.msra.mxu0 %v3597_v39 }
 0x935   : > { %2633 = vmatpush.bf16.msra.mxu1 %v3605_v35 }
 0x936   : > { %2606 = vmatpush.bf16.msra.mxu3 %v3590_v43 }
 0x937   : > { %2645 = vmatpush.bf16.msrb.mxu2 %v3614_v46 }
 0x938   : > { %2621 = vmatpush.bf16.msra.mxu0 %v3596_v45 }
 0x939   : > { %2634 = vmatpush.bf16.msra.mxu1 %v3604_v50 }
 0x93a   : > { %2607 = vmatpush.bf16.msra.mxu3 %v3589_v53 }
 0x93b   : > { %2646 = vmatpush.bf16.msrb.mxu2 %v3613_v54  ;;  %2622 = vmatmul.bf16.vlgmr.msra.gmra.mxu0 %v1414_v56 }
 0x93c   : > { %2635 = vmatmul.bf16.vlgmr.msra.gmra.mxu1 %v1415_v57 }
 0x93e   : > { %2608 = vmatpush.bf16.msra.mxu3 %v3588_v58 }
 0x93f   : > { %2647 = vmatpush.bf16.msrb.mxu2 %v3612_v60 }
 0x941   : > { %2609 = vmatmul.bf16.vlgmr.msra.gmra.mxu3 %v1413_v62 }
 0x942   : > { %2648 = vmatmul.bf16.vlgmr.msrb.gmra.mxu2 %v1416_v63 }
 0x978   : > { %v2467_v7 = vpop.f32.mrf.mxu0 }
 0x979   : > { %v2480_v0 = vpop.f32.mrf.mxu1 }
 0x980   : > { %v2469_v1 = vpop.f32.mrf.mxu0 }
 0x981   : > { %v2482_v3 = vpop.f32.mrf.mxu1  ;;  %v3645_v1 = vld [vmem:[%s4569_s11] ss:$0 sm:$0xff] }
 0x984   : > { %v2454_v4 = vpop.f32.mrf.mxu3 }
 0x985   : > { %v2493_v5 = vpop.f32.mrf.mxu2  ;;  %v2455_v16 = vadd.f32 %v3644_v13, %v2454_v4 }
 0x987   : > { %v2468_v19 = vadd.f32 %v2467_v7, %v2455_v16 }
 0x988   : > { %v2519_v6 = vpop.f32.mrf.mxu0 }
 0x989   : > { %v2532_v8 = vpop.f32.mrf.mxu1  ;;  %v2481_v22 = vadd.f32 %v2480_v0, %v2468_v19 }
 0x98b   : > { %v2494_v25 = vadd.f32 %v2493_v5, %v2481_v22  ;;  %v3646_v5 = vld [vmem:[%s4570_s12] ss:$0 sm:$0xff] }
 0x98c   : > { %v2456_v9 = vpop.f32.mrf.mxu3 }
 0x98d   : > { %v2495_v10 = vpop.f32.mrf.mxu2 }
 0x990   : > { %v2521_v11 = vpop.f32.mrf.mxu0 }
 0x991   : > { %v2534_v12 = vpop.f32.mrf.mxu1 }
 0x994   : > { %v2506_v14 = vpop.f32.mrf.mxu3 }
 0x995   : > { %v2545_v15 = vpop.f32.mrf.mxu2  ;;  %v2507_v28 = vadd.f32 %v2506_v14, %v2494_v25 }
 0x997   : > { %v2520_v31 = vadd.f32 %v2519_v6, %v2507_v28 }
 0x998   : > { %v2571_v17 = vpop.f32.mrf.mxu0 }
 0x999   : > { %v2584_v18 = vpop.f32.mrf.mxu1  ;;  %v2533_v34 = vadd.f32 %v2532_v8, %v2520_v31 }
 0x99b   : > { %v2546_v2 = vadd.f32 %v2545_v15, %v2533_v34 }
 0x99c   : > { %v2508_v20 = vpop.f32.mrf.mxu3 }
 0x99d   : > { %v2547_v21 = vpop.f32.mrf.mxu2 }
 0x9a0   : > { %v2573_v23 = vpop.f32.mrf.mxu0 }
 0x9a1   : > { %v2586_v24 = vpop.f32.mrf.mxu1 }
 0x9a2   : > { %v3647_v24 = vld [vmem:[%s4571_s13] ss:$0 sm:$0xff] }
 0x9a4   : > { %v2558_v26 = vpop.f32.mrf.mxu3 }
 0x9a5   : > { %v2597_v27 = vpop.f32.mrf.mxu2  ;;  %v2559_v36 = vadd.f32 %v2558_v26, %v2546_v2 }
 0x9a7   : > { %v2572_v39 = vadd.f32 %v2571_v17, %v2559_v36 }
 0x9a9   : > { %v2585_v40 = vadd.f32 %v2584_v18, %v2572_v39 }
 0x9ab   : > { %v2598_v43 = vadd.f32 %v2597_v27, %v2585_v40 }
 0x9ac   : > { %v2560_v32 = vpop.f32.mrf.mxu3 }
 0x9ad   : > { %v2599_v30 = vpop.f32.mrf.mxu2 }
 0x9b8   : > { %v2623_v37 = vpop.f32.mrf.mxu0 }
 0x9b9   : > { %v2636_v38 = vpop.f32.mrf.mxu1 }
 0x9c0   : > { %v2625_v35 = vpop.f32.mrf.mxu0 }
 0x9c1   : > { %v2638_v42 = vpop.f32.mrf.mxu1 }
 0x9c4   : > { %v2610_v44 = vpop.f32.mrf.mxu3 }
 0x9c5   : > { %v2611_v46 = vadd.f32 %v2610_v44, %v2598_v43  ;;  %v2649_v47 = vpop.f32.mrf.mxu2 }
 0x9c7   : > { %v2624_v45 = vadd.f32 %v2623_v37, %v2611_v46 }
 0x9c9   : > { %v2637_v48 = vadd.f32 %v2636_v38, %v2624_v45 }
 0x9cb   : > { %v2650_v49 = vadd.f32 %v2649_v47, %v2637_v48 }
 0x9cc   : > { %v2612_v50 = vpop.f32.mrf.mxu3 }
 0x9cd   : > { %v2651_v51 = vpop.f32.mrf.mxu2  ;;  %v2653_v52 = vadd.f32 %v2650_v49, %v3996_v41 }
 0x9cf   : > { %v2656_v53 = vsel %vm513_vm0, %v2653_v52, 0.0 }
 0x9d0   : > { %2657 = vadd.xlane.f32.xlu1 %v2656_v53 }
 0xa43   : > { %v2658_v29 = vpop.xlane.xlu1 %2657 }
 0xa44   : > { %v2659_v54 = vmul.f32 %v2658_v29, %v3869_v33 }
 0xa46   : > { %v2660_v55 = vsub.f32 %v2653_v52, %v2659_v54 }
 0xa48   : > { %v2661_v56 = vmul.f32 %v2660_v55, %v2660_v55 }
 0xa4a   : > { %v2662_v57 = vsel %vm513_vm0, %v2661_v56, 0.0 }
 0xa4b   : > { %2663 = vadd.xlane.f32.xlu2 %v2662_v57 }
 0xabe   : > { %v2664_v58 = vpop.xlane.xlu2 %2663 }
 0xabf   : > { %v2665_v59 = vmul.f32 %v2664_v58, %v3869_v33 }
 0xac1   : > { %v2666_v60 = vadd.f32 1e-05, %v2665_v59 }
 0xac3   : > { %3669 = vrsqrt.f32 %v2666_v60  ;;  %vm2673_vm9 = vweird.f32 %v2666_v60 }
 0xac9   : > { %v3670_v61 = vpop.eup %3669 }
 0xaca   : > { %v2668_v62 = vmul.f32 %v3670_v61, %v2666_v60  ;;  %vm2674_vm8 = vweird.f32 %v3670_v61 }
 0xacb   : > { %vm2675_vm10 = vmor %vm2673_vm9, %vm2674_vm8 }
 0xacc   : > { %v2669_v63 = vmul.f32 %v3670_v61, %v2668_v62 }
 0xace   : > { %v2670_v41 = vmul.f32 0.5, %v2669_v63 }
 0xad0   : > { %v2671_v7 = vsub.f32 1.5, %v2670_v41 }
 0xad2   : > { %v2672_v0 = vmul.f32 %v3670_v61, %v2671_v7 }
 0xad4   : > { %v2676_v3 = vsel %vm2675_vm10, %v3670_v61, %v2672_v0 }
 0xad5   : > { %v2677_v4 = vmul.f32 %v2676_v3, %v2660_v55 }
 0xad7   : > { %v2681_v6 = vmul.f32 %v3645_v1, %v2677_v4 }
 0xad9   : > { %v2685_v8 = vadd.f32 %v3646_v5, %v2681_v6 }
 0xadb   : > { %v2688_v9 = vsel %vm513_vm0, %v2685_v8, 0.0 }
 0xadc   : > { %2689 = vadd.xlane.f32.xlu1 %v2688_v9 }
 0xb4f   : > { %v2690_v10 = vpop.xlane.xlu1 %2689 }
 0xb50   : > { %v2691_v11 = vmul.f32 %v2690_v10, %v3869_v33 }
 0xb52   : > { %v2692_v12 = vsub.f32 %v2685_v8, %v2691_v11 }
 0xb54   : > { %v2693_v13 = vmul.f32 %v2692_v12, %v2692_v12 }
 0xb56   : > { %v2694_v14 = vsel %vm513_vm0, %v2693_v13, 0.0 }
 0xb57   : > { %2695 = vadd.xlane.f32.xlu1 %v2694_v14 }
 0xbca   : > { %v2696_v15 = vpop.xlane.xlu1 %2695 }
 0xbcb   : > { %v2697_v16 = vmul.f32 %v2696_v15, %v3869_v33  ;;  %v3648_v33 = vld [vmem:[%s4572_s14] ss:$0 sm:$0xff] }
 0xbcd   : > { %v2698_v17 = vadd.f32 1e-05, %v2697_v16 }
 0xbcf   : > { %3671 = vrsqrt.f32 %v2698_v17  ;;  %vm2705_vm12 = vweird.f32 %v2698_v17 }
 0xbd5   : > { %v3672_v18 = vpop.eup %3671 }
 0xbd6   : > { %v2700_v19 = vmul.f32 %v3672_v18, %v2698_v17  ;;  %vm2706_vm11 = vweird.f32 %v3672_v18 }
 0xbd7   : > { %vm2707_vm13 = vmor %vm2705_vm12, %vm2706_vm11 }
 0xbd8   : > { %v2701_v20 = vmul.f32 %v3672_v18, %v2700_v19 }
 0xbda   : > { %v2702_v21 = vmul.f32 0.5, %v2701_v20 }
 0xbdc   : > { %v2703_v22 = vsub.f32 1.5, %v2702_v21 }
 0xbde   : > { %v2704_v23 = vmul.f32 %v3672_v18, %v2703_v22 }
 0xbe0   : > { %v2708_v25 = vsel %vm2707_vm13, %v3672_v18, %v2704_v23 }
 0xbe1   : > { %v2709_v26 = vmul.f32 %v2708_v25, %v2692_v12 }
 0xbe3   : > { %v2713_v27 = vmul.f32 %v3647_v24, %v2709_v26 }
 0xbe5   : > { %v2717_v28 = vadd.f32 %v3648_v33, %v2713_v27 }
 0xbe7   : > { %2718 = vst.msk [vmem:[%s489_s22] sm:$0xff] %vm513_vm0, %v2717_v28 }
 0xbe8 PF: > { %s25_s18 = sadd.s32 1, %s3679_s18  }
 0xbe9   : > { %p22_p4 = scmp.ge.s32.totalorder %s25_s18, 4  }
 0xbeb   :  { %24 = sbr.rel (!%p22_p4) target bundleno = 1 (0x1), region = 110 }

// kernel: transformer_block_a.4
= control target key start
LH: loop header
LB: loop body
LE: loop exit
PB: predicated region body
PF: predicated region fallthrough
CT: control target
= control target key end

     0   :  { %s5417_s0 = inlined_call_operand.vmem [shape: f32[2,8,32], index: 0, kind: input, shape index: {}]   ;;  %s5418_s1 = inlined_call_operand.vmem [shape: f32[2,8,32], index: 1, kind: input, shape index: {}]   ;;  %s5419_s2 = inlined_call_operand.vmem [shape: bf16[32,96], index: 2, kind: input, shape index: {}]   ;;  %s5420_s3 = inlined_call_operand.vmem [shape: f32[1,96], index: 3, kind: input, shape index: {}]   ;;  %s5421_s4 = inlined_call_operand.vmem [shape: bf16[32,32], index: 4, kind: input, shape index: {}]   ;;  %s5422_s5 = inlined_call_operand.vmem [shape: f32[1,32], index: 5, kind: input, shape index: {}]   ;;  %s5423_s6 = inlined_call_operand.vmem [shape: f32[1,32], index: 6, kind: input, shape index: {}]   ;;  %s5424_s7 = inlined_call_operand.vmem [shape: f32[1,32], index: 7, kind: input, shape index: {}]   ;;  %s5425_s8 = inlined_call_operand.vmem [shape: bf16[32,32], index: 8, kind: input, shape index: {}]   ;;  %s5426_s9 = inlined_call_operand.vmem [shape: f32[1,32], index: 9, kind: input, shape index: {}]   ;;  %s5427_s10 = inlined_call_operand.vmem [shape: bf16[32,64], index: 10, kind: input, shape index: {}]   ;;  %s5428_s11 = inlined_call_operand.vmem [shape: f32[1,64], index: 11, kind: input, shape index: {}]   ;;  %s5429_s12 = inlined_call_operand.vmem [shape: bf16[32,32], index: 12, kind: input, shape index: {}]   ;;  %s5430_s13 = inlined_call_operand.vmem [shape: f32[1,32], index: 13, kind: input, shape index: {}]   ;;  %s5431_s14 = inlined_call_operand.vmem [shape: f32[1,32], index: 14, kind: input, shape index: {}]   ;;  %s5432_s15 = inlined_call_operand.vmem [shape: f32[1,32], index: 15, kind: input, shape index: {}]   ;;  %s5433_s16 = inlined_call_operand.vmem [shape: bf16[32,2048], index: 16, kind: input, shape index: {}]   ;;  %s5434_s17 = inlined_call_operand.vmem [shape: f32[1,2048], index: 17, kind: input, shape index: {}]   ;;  %s5435_s18 = inlined_call_operand.vmem [shape: bf16[2048,32], index: 18, kind: input, shape index: {}]   ;;  %s5436_s19 = inlined_call_operand.vmem [shape: f32[1,32], index: 19, kind: input, shape index: {}]   ;;  %s5437_s20 = inlined_call_operand.vmem [shape: f32[1,32], index: 20, kind: input, shape index: {}]   ;;  %s5438_s21 = inlined_call_operand.vmem [shape: f32[1,32], index: 21, kind: input, shape index: {}]   ;;  %s5439_s22 = inlined_call_operand.vmem [shape: f32[2,8,32], index: 22, kind: output, shape index: {}]  }
   0x1   :  { %5448 = sst [smem:[#allocation2_spill]] %s5417_s0 }
   0x2   :  { %5449 = sst [smem:[#allocation3_spill]] %s5418_s1 }
   0x3   :  { %5450 = sst [smem:[#allocation4_spill]] %s5419_s2 }
   0x4   :  { %5451 = sst [smem:[#allocation5_spill]] %s5420_s3  ;;  %s4529_s3 = smov 0  }
   0x5   :  { %5452 = sst [smem:[#allocation6_spill]] %s5421_s4 }
   0x6   :  { %5453 = sst [smem:[#allocation7_spill]] %s5422_s5 }
   0x7   :  { %5454 = sst [smem:[#allocation8_spill]] %s5423_s6 }
   0x8 LB: > { %s3439_s28 = sadd.s32 4294967295, %s4400_s3   ;;  %p3443_p0 = scmp.ge.s32.totalorder %s4400_s3, 1  ;;  %s4400_s3 = sphi %s4529_s3, %s32_s3  }
   0x9   : > { %p620_p1 = scmp.lt.s32.totalorder %s4400_s3, 3 }
   0xb   : > { %p621_p2 = pnand %p3443_p0, %p620_p1 }
   0xc   : > { %s5455_s4 = sld [smem:[#allocation4_spill]] (!%p621_p2)  ;;  %p684_p3 = scmp.lt.s32.totalorder (!%p621_p2), %s3439_s28, 1 }
   0xd   : > { %624 = sbr.rel (%p621_p2) target bundleno = 4489 (0x1189), region = 108  ;;  %s5456_s6 = sld [smem:[#allocation2_spill]] (!%p621_p2) }
   0xe   : > { %s5457_s27 = sld [smem:[#allocation5_spill]] (!%p621_p2)  ;;  %s4403_s29 = smov (!%p621_p2), 96  }
   0xf   : > { %s4404_s30 = smov (!%p621_p2), 120   ;;  %s4405_s0 = smov (!%p621_p2), 56  }
  0x10   : > { %s5444_s23 = smov (!%p621_p2), 112   ;;  %s4407_s5 = smov (!%p621_p2), 104  }
  0x11   : > { %s4408_s26 = smov (!%p621_p2), 64   ;;  %s5442_s2 = smov (!%p621_p2), 80  }
  0x12   : > { %v4157_v0 = vld [vmem:[%s5455_s4 + $0x8] sm:$0xff]  ;;  %v4156_v1 = vld [vmem:[%s5455_s4] sm:$0xff]  ;;  %s5467_s28 = smov (!%p684_p3, %s3439_s28), 1  ;;  %vm720_vm0 = vcmask 261120   ;;  %vm750_vm1 = vcmask 64512   ;;  %vm801_vm2 = vcmask 1043456  }
  0x13   : > { %730 = vmatpush.bf16.msra.mxu0 %v4157_v0  ;;  %s4543_s1 = sshll.u32 %s5467_s28, 3  ;;  %s5446_s28 = smov 88  }
  0x14   : > { %s687_s25 = scalar_lea.vmem %s5456_s6, %s4543_s1  ;;  %v4342_v4 = vld [vmem:[%s5457_s27] ss:$0 sm:$0xff]  ;;  %s5443_s27 = smov 72  }
  0x15   : > { %v4549_v2 = vld [vmem:[%s687_s25] sm:$0xff]  ;;  %s5458_s25 = sld [smem:[#allocation6_spill]]  ;;  %s4411_s24 = smov 48  }
  0x16   : > { %v699_v3 = vpack.c.bf16 %v4549_v2, %v4549_v2  ;;  %s4412_s6 = smov 40  }
  0x17   : > { %731 = vmatpush.bf16.msra.mxu0 %v4156_v1 }
  0x1a   : > { %3455 = vmatmul.msk.bf16.vlgmr.msra.gmra.mxu0 %vm720_vm0, %v699_v3 }
  0x1b   : > { %v737_v15 = vld [vmem:[%s5458_s25] sm:$0xf]  ;;  %v738_v59 = vld [vmem:[%s5458_s25 + $0x4] sm:$0xf] }
  0x1c   : > { %v823_v16 = vsel %vm801_vm2, %v737_v15, 0  ;;  %v914_v60 = vsel %vm801_vm2, %v738_v59, 0 }
  0x1d   : > { %832 = vmatpush.bf16.msra.mxu3 %v823_v16  ;;  %923 = vmatpush.bf16.msrb.mxu0 %v914_v60 }
  0x97   : > { %v733_v5 = vpop.f32.mrf.mxu0 }
  0x98   : > { %v734_v6 = vadd.f32 %v4342_v4, %v733_v5 }
  0x9a   : > { %v4557_v7 = vpack.c.bf16 %v734_v6, %v734_v6 }
  0x9c   : > { %841 = vrot.lane.b32.xlu2 %v4557_v7, %s5446_s28  ;;  %748 = vrot.lane.b32.xlu0 %v4557_v7, %s4403_s29  ;;  %s5461_s28 = sld [smem:[#allocation8_spill]] }
  0x9f   : > { %v735_v8 = vpop.f32.mrf.mxu0 }
  0xa4   : > { %839 = vrot.lane.b32.xlu2 %v4557_v7, %s4404_s30 }
  0xf6   : > { %v842_v35 = vpop.permute.xlu2 %841 }
  0xf7   : > { %v847_v39 = vsel %vm750_vm1, %v842_v35, 0 }
  0xfe   : > { %v840_v41 = vpop.permute.xlu2 %839 }
 0x10e   : > { %v749_v9 = vpop.permute.xlu0 %748 }
 0x10f   : > { %v755_v10 = vsel %vm750_vm1, %v749_v9, 0 }
 0x110   : > { %764 = vmatpush.bf16.xpose.msra.mxu1 %v755_v10 }
 0x117   : > { %3456 = vmatmul.msk.bf16.vlgmr.msra.gmra.mxu1 %vm750_vm1, %v4557_v7 }
 0x194   : > { %v766_v11 = vpop.f32.mrf.mxu1 }
 0x195   : > { %v770_v12 = vmul.f32 0.35355338, %v766_v11 }
 0x197   : > { %v771_v13 = vsel %vm750_vm1, %v770_v12, -inf }
 0x198   : > { %772 = vmax.xlane.f32.xlu0 %v771_v13 }
 0x19c   : > { %v768_v14 = vpop.f32.mrf.mxu1 }
 0x1ac   : > { %888 = vrot.lane.b32.xlu0 %v4557_v7, %s4405_s0  ;;  %s5459_s0 = sld [smem:[#allocation7_spill]] }
 0x1b4   : > { %930 = vrot.lane.b32.xlu0 %v4557_v7, %s5444_s23 }
 0x1bc   : > { %1021 = vrot.lane.b32.xlu0 %v4557_v7, %s4407_s5 }
 0x20b   : > { %v773_v17 = vpop.xlane.xlu0 %772 }
 0x20c   : > { %v774_v18 = vsub.f32 %v770_v12, %v773_v17 }
 0x20e   : > { %v775_v19 = vmul.f32 1.442695, %v774_v18 }
 0x210   : > { %4354 = vpow2.f32 %v775_v19 }
 0x216   : > { %v4355_v20 = vpop.eup %4354 }
 0x217   : > { %v777_v21 = vsel %vm750_vm1, %v4355_v20, 0.0 }
 0x218   : > { %778 = vadd.xlane.f32.xlu1 %v777_v21 }
 0x21e   : > { %v889_v22 = vpop.permute.xlu0 %888 }
 0x21f   : > { %v894_v23 = vsel %vm801_vm2, %v889_v22, 0 }
 0x220   : > { %903 = vmatpush.bf16.msrb.mxu3 %v894_v23 }
 0x226   : > { %v931_v58 = vpop.permute.xlu0 %930 }
 0x231   : > { %796 = vrot.lane.b32.xlu1 %v4557_v7, %s4408_s26 }
 0x28b   : > { %v779_v24 = vpop.xlane.xlu1 %778 }
 0x28c   : > { %4356 = vrcp.f32 %v779_v24  ;;  %v791_v29 = vand.u32 2147483648, %v779_v24  ;;  %vm785_vm4 = vweird.f32 %v779_v24  ;;  %v789_v31 = vand.u32 2147483647, %v779_v24 }
 0x28e   : > { %v792_v33 = vor.u32 1.1754944e-38, %v791_v29  ;;  %vm790_vm6 = vcmp.eq.f32.partialorder %v789_v31, 8.507059e+37 }
 0x292   : > { %v4357_v25 = vpop.eup %4356 }
 0x293   : > { %v781_v26 = vmul.f32 %v4357_v25, %v779_v24  ;;  %vm786_vm3 = vweird.f32 %v4357_v25 }
 0x294   : > { %vm787_vm5 = vmor %vm785_vm4, %vm786_vm3 }
 0x295   : > { %v782_v27 = vsub.f32 1.0, %v781_v26  ;;  %v1022_v26 = vpop.permute.xlu0 %1021 }
 0x297   : > { %v783_v28 = vmul.f32 %v4357_v25, %v782_v27  ;;  %v4343_v27 = vld [vmem:[%s5459_s0] ss:$0 sm:$0xff]  ;;  %s5463_s0 = smov 112  }
 0x299   : > { %v784_v30 = vadd.f32 %v4357_v25, %v783_v28 }
 0x29b   : > { %v788_v32 = vsel %vm787_vm5, %v4357_v25, %v784_v30 }
 0x29c   : > { %v793_v34 = vsel %vm790_vm6, %v792_v33, %v788_v32 }
 0x29d   : > { %v794_v36 = vmul.f32 %v4355_v20, %v793_v34 }
 0x29f   : > { %v795_v40 = vpack.c.bf16 %v794_v36, %v794_v36 }
 0x2a3   : > { %v797_v37 = vpop.permute.xlu1 %796 }
 0x2a4   : > { %v803_v38 = vsel %vm801_vm2, %v797_v37, 0 }
 0x2a5   : > { %812 = vmatpush.bf16.msra.mxu2 %v803_v38 }
 0x2a8   : > { %3457 = vmatmul.msk.bf16.vlgmr.msra.gmra.mxu2 %vm750_vm1, %v795_v40 }
 0x2a9   : > { %856 = vmatpush.bf16.xpose.msrb.mxu2 %v847_v39 }
 0x2b8   : > { %3459 = vmatmul.msk.bf16.vlgmr.msrb.gmra.mxu2 %vm750_vm1, %v840_v41 }
 0x32b   : > { %v814_v42 = vpop.f32.mrf.mxu2 }
 0x32c   : > { %v818_v43 = vpack.c.bf16 %v814_v42, %v814_v42 }
 0x32e   : > { %3458 = vmatmul.msk.bf16.vlgmr.msra.gmra.mxu3 %vm750_vm1, %v818_v43 }
 0x333   : > { %v816_v44 = vpop.f32.mrf.mxu2 }
 0x33b   : > { %v858_v45 = vpop.f32.mrf.mxu2 }
 0x33c   : > { %v862_v46 = vmul.f32 0.35355338, %v858_v45 }
 0x33e   : > { %v863_v47 = vsel %vm750_vm1, %v862_v46, -inf }
 0x33f   : > { %864 = vmax.xlane.f32.xlu2 %v863_v47 }
 0x343   : > { %v860_v48 = vpop.f32.mrf.mxu2 }
 0x357   : > { %932 = vrot.lane.b32.xlu2 %v4557_v7, %s5442_s2 }
 0x3b1   : > { %v834_v49 = vpop.f32.mrf.mxu3 }
 0x3b2   : > { %v865_v50 = vpop.xlane.xlu2 %864  ;;  %v838_v28 = vadd.f32 %v4343_v27, %v834_v49  ;;  %v4161_v27 = vld [vmem:[%s5427_s10 + $0x8] sm:$0xff] }
 0x3b3   : > { %v866_v51 = vsub.f32 %v862_v46, %v865_v50 }
 0x3b5   : > { %v867_v52 = vmul.f32 1.442695, %v866_v51 }
 0x3b7   : > { %4358 = vpow2.f32 %v867_v52 }
 0x3b9   : > { %v836_v53 = vpop.f32.mrf.mxu3 }
 0x3ba   : > { %v933_v54 = vpop.permute.xlu2 %932 }
 0x3bb   : > { %v938_v55 = vsel %vm750_vm1, %v933_v54, 0 }
 0x3bc   : > { %947 = vmatpush.bf16.xpose.msrb.mxu1 %v938_v55 }
 0x3bd   : > { %v4359_v56 = vpop.eup %4358 }
 0x3be   : > { %v869_v57 = vsel %vm750_vm1, %v4359_v56, 0.0 }
 0x3bf   : > { %870 = vadd.xlane.f32.xlu1 %v869_v57 }
 0x3c3   : > { %3462 = vmatmul.msk.bf16.vlgmr.msrb.gmra.mxu1 %vm750_vm1, %v931_v58 }
 0x3d8   : > { %1023 = vrot.lane.b32.xlu1 %v4557_v7, %s5443_s27  ;;  %s5465_s27 = smov 80  }
 0x432   : > { %v871_v61 = vpop.xlane.xlu1 %870 }
 0x433   : > { %4360 = vrcp.f32 %v871_v61  ;;  %v883_v1 = vand.u32 2147483648, %v871_v61  ;;  %v881_v4 = vand.u32 2147483647, %v871_v61  ;;  %vm877_vm8 = vweird.f32 %v871_v61 }
 0x435   : > { %v884_v8 = vor.u32 1.1754944e-38, %v883_v1  ;;  %vm882_vm10 = vcmp.eq.f32.partialorder %v881_v4, 8.507059e+37 }
 0x439   : > { %v4361_v62 = vpop.eup %4360 }
 0x43a   : > { %v873_v63 = vmul.f32 %v4361_v62, %v871_v61  ;;  %vm878_vm7 = vweird.f32 %v4361_v62 }
 0x43b   : > { %vm879_vm9 = vmor %vm877_vm8, %vm878_vm7 }
 0x43c   : > { %v874_v0 = vsub.f32 1.0, %v873_v63 }
 0x43e   : > { %v875_v3 = vmul.f32 %v4361_v62, %v874_v0 }
 0x440   : > { %v876_v5 = vadd.f32 %v4361_v62, %v875_v3  ;;  %v949_v6 = vpop.f32.mrf.mxu1 }
 0x441   : > { %v953_v9 = vmul.f32 0.35355338, %v949_v6 }
 0x442   : > { %v880_v10 = vsel %vm879_vm9, %v4361_v62, %v876_v5 }
 0x443   : > { %v954_v11 = vsel %vm750_vm1, %v953_v9, -inf  ;;  %v885_v12 = vsel %vm882_vm10, %v884_v8, %v880_v10 }
 0x444   : > { %955 = vmax.xlane.f32.xlu2 %v954_v11  ;;  %v886_v13 = vmul.f32 %v4359_v56, %v885_v12  ;;  %v739_v56 = vld [vmem:[%s5458_s25 + $0x8] sm:$0xf] }
 0x445   : > { %v1005_v57 = vsel %vm801_vm2, %v739_v56, 0 }
 0x446   : > { %v887_v14 = vpack.c.bf16 %v886_v13, %v886_v13  ;;  %1014 = vmatpush.bf16.msra.mxu3 %v1005_v57  ;;  %v740_v13 = vld [vmem:[%s5458_s25 + $0xc] sm:$0xf] }
 0x448   : > { %3460 = vmatmul.msk.bf16.vlgmr.msrb.gmra.mxu3 %vm750_vm1, %v887_v14  ;;  %v951_v15 = vpop.f32.mrf.mxu1  ;;  %v1096_v14 = vsel %vm801_vm2, %v740_v13, 0 }
 0x44a   : > { %v1024_v16 = vpop.permute.xlu1 %1023 }
 0x44b   : > { %v1029_v17 = vsel %vm750_vm1, %v1024_v16, 0 }
 0x44c   : > { %1038 = vmatpush.bf16.xpose.msra.mxu0 %v1029_v17 }
 0x4b7   : > { %v956_v18 = vpop.xlane.xlu2 %955 }
 0x4b8   : > { %v957_v19 = vsub.f32 %v953_v9, %v956_v18 }
 0x4ba   : > { %v958_v20 = vmul.f32 1.442695, %v957_v19 }
 0x4bc   : > { %4362 = vpow2.f32 %v958_v20 }
 0x4c2   : > { %v4363_v21 = vpop.eup %4362 }
 0x4c3   : > { %v960_v22 = vsel %vm750_vm1, %v4363_v21, 0.0 }
 0x4c4   : > { %961 = vadd.xlane.f32.xlu1 %v960_v22 }
 0x4cb   : > { %v905_v23 = vpop.f32.mrf.mxu3 }
 0x4cc   : > { %v909_v24 = vpack.c.bf16 %v905_v23, %v905_v23 }
 0x4ce   : > { %3461 = vmatmul.msk.bf16.vlgmr.msrb.gmra.mxu0 %vm750_vm1, %v909_v24 }
 0x4cf   : > { %1219 = vmatpush.bf16.msrb.mxu0 %v4161_v27 }
 0x4d3   : > { %v907_v25 = vpop.f32.mrf.mxu3 }
 0x4de   : > { %3465 = vmatmul.msk.bf16.vlgmr.msra.gmra.mxu0 %vm750_vm1, %v1022_v26  ;;  %v4413_v26 = vmov 32.0  }
 0x537   : > { %v962_v36 = vpop.xlane.xlu1 %961 }
 0x538   : > { %4364 = vrcp.f32 %v962_v36  ;;  %v974_v45 = vand.u32 2147483648, %v962_v36  ;;  %vm968_vm12 = vweird.f32 %v962_v36  ;;  %v972_v46 = vand.u32 2147483647, %v962_v36 }
 0x53a   : > { %v975_v50 = vor.u32 1.1754944e-38, %v974_v45  ;;  %vm973_vm14 = vcmp.eq.f32.partialorder %v972_v46, 8.507059e+37 }
 0x53e   : > { %v4365_v37 = vpop.eup %4364 }
 0x53f   : > { %v964_v38 = vmul.f32 %v4365_v37, %v962_v36  ;;  %vm969_vm11 = vweird.f32 %v4365_v37 }
 0x540   : > { %vm970_vm13 = vmor %vm968_vm12, %vm969_vm11 }
 0x541   : > { %v965_v39 = vsub.f32 1.0, %v964_v38 }
 0x543   : > { %v966_v43 = vmul.f32 %v4365_v37, %v965_v39 }
 0x545   : > { %v967_v44 = vadd.f32 %v4365_v37, %v966_v43  ;;  %v4346_v43 = vld [vmem:[%s5428_s11] ss:$0 sm:$0xff] }
 0x547   : > { %v971_v48 = vsel %vm970_vm13, %v4365_v37, %v967_v44 }
 0x548   : > { %v976_v51 = vsel %vm973_vm14, %v975_v50, %v971_v48 }
 0x549   : > { %v977_v52 = vmul.f32 %v4363_v21, %v976_v51 }
 0x54b   : > { %v925_v29 = vpop.f32.mrf.mxu0  ;;  %v978_v55 = vpack.c.bf16 %v977_v52, %v977_v52 }
 0x54c   : > { %v4607_v30 = vadd.f32 %v925_v29, %v838_v28 }
 0x553   : > { %v927_v31 = vpop.f32.mrf.mxu0 }
 0x55b   : > { %v1040_v32 = vpop.f32.mrf.mxu0 }
 0x55c   : > { %v1044_v33 = vmul.f32 0.35355338, %v1040_v32 }
 0x55e   : > { %v1045_v34 = vsel %vm750_vm1, %v1044_v33, -inf }
 0x55f   : > { %1046 = vmax.xlane.f32.xlu0 %v1045_v34 }
 0x563   : > { %v1042_v35 = vpop.f32.mrf.mxu0 }
 0x573   : > { %979 = vrot.lane.b32.xlu0 %v4557_v7, %s4411_s24  ;;  %s5460_s24 = sld [smem:[#allocation3_spill]] }
 0x5d2   : > { %v1047_v40 = vpop.xlane.xlu0 %1046 }
 0x5d3   : > { %v1048_v41 = vsub.f32 %v1044_v33, %v1047_v40 }
 0x5d5   : > { %v1049_v42 = vmul.f32 1.442695, %v1048_v41  ;;  %v4159_v41 = vld [vmem:[%s5425_s8 + $0x8] sm:$0xff] }
 0x5d6   : > { %1182 = vmatpush.bf16.msrb.mxu3 %v4159_v41 }
 0x5d7   : > { %4366 = vpow2.f32 %v1049_v42  ;;  %v4158_v42 = vld [vmem:[%s5425_s8] sm:$0xff] }
 0x5da   : > { %1183 = vmatpush.bf16.msrb.mxu3 %v4158_v42 }
 0x5dd   : > { %v4367_v47 = vpop.eup %4366 }
 0x5de   : > { %v1051_v49 = vsel %vm750_vm1, %v4367_v47, 0.0 }
 0x5df   : > { %1052 = vadd.xlane.f32.xlu2 %v1051_v49 }
 0x5e5   : > { %v980_v53 = vpop.permute.xlu0 %979 }
 0x5e6   : > { %v985_v54 = vsel %vm801_vm2, %v980_v53, 0 }
 0x5e7   : > { %994 = vmatpush.bf16.msra.mxu2 %v985_v54 }
 0x5ea   : > { %3463 = vmatmul.msk.bf16.vlgmr.msra.gmra.mxu2 %vm750_vm1, %v978_v55 }
 0x5eb   : > { %1105 = vmatpush.bf16.msrb.mxu2 %v1096_v14 }
 0x5f7   : > { %1070 = vrot.lane.b32.xlu2 %v4557_v7, %s4412_s6  ;;  %s691_s6 = scalar_lea.vmem %s5460_s24, %s4543_s1  ;;  %s695_s24 = scalar_lea.vmem %s5439_s22, %s4543_s1 }
 0x5f8   : > { %v698_v28 = vld [vmem:[%s691_s6] sm:$0xff] }
 0x652   : > { %v1053_v58 = vpop.xlane.xlu2 %1052 }
 0x653   : > { %4368 = vrcp.f32 %v1053_v58  ;;  %v1065_v0 = vand.u32 2147483648, %v1053_v58  ;;  %v1063_v7 = vand.u32 2147483647, %v1053_v58  ;;  %vm1059_vm3 = vweird.f32 %v1053_v58 }
 0x654   : > { %4370 = vrcp.f32 %v4413_v26 }
 0x655   : > { %v1066_v4 = vor.u32 1.1754944e-38, %v1065_v0  ;;  %vm1064_vm5 = vcmp.eq.f32.partialorder %v1063_v7, 8.507059e+37 }
 0x659   : > { %v4369_v59 = vpop.eup %4368 }
 0x65a   : > { %v1055_v60 = vmul.f32 %v4369_v59, %v1053_v58  ;;  %v1071_v61 = vpop.permute.xlu2 %1070  ;;  %vm1060_vm15 = vweird.f32 %v4369_v59  ;;  %v4371_v29 = vpop.eup %4370  ;;  %v4344_v58 = vld [vmem:[%s5461_s28] ss:$0 sm:$0xff]  ;;  %s5464_s28 = smov 72  }
 0x65b   : > { %v1076_v62 = vsel %vm801_vm2, %v1071_v61, 0  ;;  %vm1061_vm4 = vmor %vm1059_vm3, %vm1060_vm15  ;;  %v1119_v31 = vmul.f32 32.0, %v4371_v29  ;;  %vm1123_vm6 = vweird.f32 %v4371_v29 }
 0x65c   : > { %v1056_v63 = vsub.f32 1.0, %v1055_v60  ;;  %1085 = vmatpush.bf16.msra.mxu1 %v1076_v62  ;;  %v4345_v60 = vld [vmem:[%s5424_s7] ss:$0 sm:$0xff] }
 0x65d   : > { %v1120_v32 = vsub.f32 1.0, %v1119_v31 }
 0x65e   : > { %v1057_v1 = vmul.f32 %v4369_v59, %v1056_v63 }
 0x65f   : > { %v1121_v33 = vmul.f32 %v4371_v29, %v1120_v32 }
 0x660   : > { %v1058_v3 = vadd.f32 %v4369_v59, %v1057_v1 }
 0x661   : > { %v1122_v34 = vadd.f32 %v4371_v29, %v1121_v33 }
 0x662   : > { %v1062_v5 = vsel %vm1061_vm4, %v4369_v59, %v1058_v3  ;;  %v4347_v3 = vld [vmem:[%s5426_s9] ss:$0 sm:$0xff] }
 0x663   : > { %v1067_v6 = vsel %vm1064_vm5, %v1066_v4, %v1062_v5  ;;  %v4641_v35 = vsel %vm1123_vm6, %v4371_v29, %v1122_v34  ;;  %v1227_v29 = vld [vmem:[%s5429_s12 + $0x4] sm:$0xf] }
 0x664   : > { %v1068_v8 = vmul.f32 %v4367_v47, %v1067_v6 }
 0x666   : > { %v1069_v9 = vpack.c.bf16 %v1068_v8, %v1068_v8 }
 0x668   : > { %3466 = vmatmul.msk.bf16.vlgmr.msra.gmra.mxu1 %vm750_vm1, %v1069_v9 }
 0x66d   : > { %v996_v10 = vpop.f32.mrf.mxu2 }
 0x66e   : > { %v1000_v11 = vpack.c.bf16 %v996_v10, %v996_v10 }
 0x670   : > { %3464 = vmatmul.msk.bf16.vlgmr.msra.gmra.mxu3 %vm750_vm1, %v1000_v11 }
 0x675   : > { %v998_v12 = vpop.f32.mrf.mxu2 }
 0x6e5   : > { %v1087_v15 = vpop.f32.mrf.mxu1 }
 0x6e6   : > { %v1091_v16 = vpack.c.bf16 %v1087_v15, %v1087_v15 }
 0x6e8   : > { %3467 = vmatmul.msk.bf16.vlgmr.msrb.gmra.mxu2 %vm750_vm1, %v1091_v16 }
 0x6ed   : > { %v1089_v17 = vpop.f32.mrf.mxu1 }
 0x6f3   : > { %v1016_v18 = vpop.f32.mrf.mxu3 }
 0x6f4   : > { %v1020_v19 = vadd.f32 %v1016_v18, %v4607_v30  ;;  %v1189_v30 = vpack.c.bf16 %v698_v28, %v698_v28 }
 0x6fb   : > { %v1018_v20 = vpop.f32.mrf.mxu3 }
 0x76b   : > { %v1107_v21 = vpop.f32.mrf.mxu2 }
 0x76c   : > { %v1111_v22 = vadd.f32 %v1107_v21, %v1020_v19 }
 0x76e   : > { %v1112_v23 = vadd.f32 %v1111_v22, %v4549_v2  ;;  %v4160_v2 = vld [vmem:[%s5427_s10] sm:$0xff] }
 0x76f   : > { %1220 = vmatpush.bf16.msrb.mxu0 %v4160_v2 }
 0x770   : > { %v1115_v24 = vsel %vm720_vm0, %v1112_v23, 0.0 }
 0x771   : > { %1116 = vadd.xlane.f32.xlu1 %v1115_v24 }
 0x772   : > { %3485 = vmatmul.msk.bf16.vlgmr.msrb.gmra.mxu0 %vm720_vm0, %v1189_v30  ;;  %v1401_v30 = vsel %vm801_vm2, %v1227_v29, 0 }
 0x773   : > { %v1109_v25 = vpop.f32.mrf.mxu2 }
 0x7e4   : > { %v1117_v36 = vpop.xlane.xlu1 %1116 }
 0x7e5   : > { %v1125_v37 = vmul.f32 %v4641_v35, %v1117_v36 }
 0x7e7   : > { %v1126_v38 = vsub.f32 %v1112_v23, %v1125_v37 }
 0x7e9   : > { %v1127_v39 = vmul.f32 %v1126_v38, %v1126_v38 }
 0x7eb   : > { %v1128_v40 = vsel %vm720_vm0, %v1127_v39, 0.0 }
 0x7ec   : > { %1129 = vadd.xlane.f32.xlu0 %v1128_v40 }
 0x7ef   : > { %v1222_v44 = vpop.f32.mrf.mxu0 }
 0x7f0   : > { %v1223_v47 = vadd.f32 %v4346_v43, %v1222_v44 }
 0x7f2   : > { %v4655_v49 = vpack.c.bf16 %v1223_v47, %v1223_v47  ;;  %v1226_v47 = vld [vmem:[%s5429_s12] sm:$0xf] }
 0x7f4   : > { %1328 = vrot.lane.b32.xlu1 %v4655_v49, %s4404_s30  ;;  %v1241_v50 = vsel %vm750_vm1, %v4655_v49, 0 }
 0x7f5   : > { %1250 = vmatpush.bf16.xpose.msrb.mxu1 %v1241_v50 }
 0x7f7   : > { %v1224_v51 = vpop.f32.mrf.mxu0 }
 0x85f   : > { %v1130_v45 = vpop.xlane.xlu0 %1129 }
 0x860   : > { %v1131_v46 = vmul.f32 %v1130_v45, %v4641_v35 }
 0x862   : > { %v1132_v48 = vadd.f32 1e-05, %v1131_v46 }
 0x864   : > { %4372 = vrsqrt.f32 %v1132_v48  ;;  %vm1139_vm8 = vweird.f32 %v1132_v48 }
 0x866   : > { %v1329_v1 = vpop.permute.xlu1 %1328 }
 0x867   : > { %v1334_v7 = vsel %vm750_vm1, %v1329_v1, 0 }
 0x868   : > { %1343 = vmatpush.bf16.xpose.msra.mxu0 %v1334_v7 }
 0x86a   : > { %v4373_v52 = vpop.eup %4372 }
 0x86b   : > { %v1134_v53 = vmul.f32 %v4373_v52, %v1132_v48  ;;  %vm1140_vm7 = vweird.f32 %v4373_v52  ;;  %v1309_v48 = vsel %vm801_vm2, %v1226_v47, 0 }
 0x86c   : > { %vm1141_vm9 = vmor %vm1139_vm8, %vm1140_vm7  ;;  %1318 = vmatpush.bf16.msra.mxu3 %v1309_v48 }
 0x86d   : > { %v1135_v54 = vmul.f32 %v4373_v52, %v1134_v53 }
 0x86f   : > { %v1136_v55 = vmul.f32 0.5, %v1135_v54 }
 0x871   : > { %v1137_v56 = vsub.f32 1.5, %v1136_v55 }
 0x873   : > { %v1138_v57 = vmul.f32 %v4373_v52, %v1137_v56 }
 0x875   : > { %v1142_v59 = vsel %vm1141_vm9, %v4373_v52, %v1138_v57 }
 0x876   : > { %v1143_v61 = vmul.f32 %v1142_v59, %v1126_v38 }
 0x878   : > { %v1147_v62 = vmul.f32 %v4344_v58, %v1143_v61 }
 0x87a   : > { %v4667_v63 = vadd.f32 %v4345_v60, %v1147_v62 }
 0x87c   : > { %v1152_v0 = vpack.c.bf16 %v4667_v63, %v4667_v63 }
 0x87e   : > { %3476 = vmatmul.msk.bf16.vlgmr.msrb.gmra.mxu3 %vm720_vm0, %v1152_v0 }
 0x901   : > { %v1185_v4 = vpop.f32.mrf.mxu3 }
 0x902   : > { %v1186_v5 = vadd.f32 %v4347_v3, %v1185_v4 }
 0x904   : > { %v1235_v6 = vpack.c.bf16 %v1186_v5, %v1186_v5 }
 0x906   : > { %1326 = vrot.lane.b32.xlu2 %v1235_v6, %s4404_s30  ;;  %3486 = vmatmul.msk.bf16.vlgmr.msrb.gmra.mxu1 %vm750_vm1, %v1235_v6 }
 0x909   : > { %v1187_v8 = vpop.f32.mrf.mxu3 }
 0x960   : > { %v1327_v9 = vpop.permute.xlu2 %1326 }
 0x961   : > { %3489 = vmatmul.msk.bf16.vlgmr.msra.gmra.mxu0 %vm750_vm1, %v1327_v9 }
 0x983   : > { %v1252_v10 = vpop.f32.mrf.mxu1 }
 0x984   : > { %v1256_v11 = vmul.f32 0.35355338, %v1252_v10 }
 0x986   : > { %v1257_v12 = vsel %vm750_vm1, %v1256_v11, -inf }
 0x987   : > { %1258 = vmax.xlane.f32.xlu2 %v1257_v12 }
 0x98b   : > { %v1254_v13 = vpop.f32.mrf.mxu1 }
 0x99f   : > { %1283 = vrot.lane.b32.xlu2 %v4655_v49, %s4403_s29 }
 0x9a7   : > { %1508 = vrot.lane.b32.xlu2 %v1235_v6, %s4407_s5 }
 0x9de   : > { %v1345_v14 = vpop.f32.mrf.mxu0 }
 0x9df   : > { %v1349_v15 = vmul.f32 0.35355338, %v1345_v14 }
 0x9e1   : > { %v1350_v16 = vsel %vm750_vm1, %v1349_v15, -inf }
 0x9e2   : > { %1351 = vmax.xlane.f32.xlu1 %v1350_v16 }
 0x9e6   : > { %v1347_v17 = vpop.f32.mrf.mxu0 }
 0x9fa   : > { %v1259_v18 = vpop.xlane.xlu2 %1258 }
 0x9fb   : > { %v1260_v19 = vsub.f32 %v1256_v11, %v1259_v18  ;;  %1510 = vrot.lane.b32.xlu1 %v4655_v49, %s4407_s5  ;;  %s5462_s5 = smov 88  }
 0x9fd   : > { %v1261_v20 = vmul.f32 1.442695, %v1260_v19  ;;  %v4348_v19 = vld [vmem:[%s5430_s13] ss:$0 sm:$0xff] }
 0x9ff   : > { %4374 = vpow2.f32 %v1261_v20 }
 0xa02   : > { %v1284_v21 = vpop.permute.xlu2 %1283 }
 0xa03   : > { %v1289_v22 = vsel %vm801_vm2, %v1284_v21, 0 }
 0xa04   : > { %1298 = vmatpush.bf16.msra.mxu2 %v1289_v22 }
 0xa05   : > { %v4375_v23 = vpop.eup %4374 }
 0xa06   : > { %v1263_v24 = vsel %vm750_vm1, %v4375_v23, 0.0 }
 0xa07   : > { %1264 = vadd.xlane.f32.xlu0 %v1263_v24 }
 0xa08   : > { %1410 = vmatpush.bf16.msrb.mxu2 %v1401_v30 }
 0xa0a   : > { %v1509_v12 = vpop.permute.xlu2 %1508 }
 0xa55   : > { %v1352_v25 = vpop.xlane.xlu1 %1351 }
 0xa56   : > { %v1353_v26 = vsub.f32 %v1349_v15, %v1352_v25 }
 0xa58   : > { %v1354_v27 = vmul.f32 1.442695, %v1353_v26 }
 0xa5a   : > { %4376 = vpow2.f32 %v1354_v27 }
 0xa60   : > { %v4377_v28 = vpop.eup %4376 }
 0xa61   : > { %v1356_v2 = vsel %vm750_vm1, %v4377_v28, 0.0 }
 0xa62   : > { %1357 = vadd.xlane.f32.xlu0 %v1356_v2 }
 0xa6d   : > { %v1511_v44 = vpop.permute.xlu1 %1510 }
 0xa6e   : > { %v1516_v46 = vsel %vm750_vm1, %v1511_v44, 0 }
 0xa76   : > { %1375 = vrot.lane.b32.xlu0 %v4655_v49, %s5462_s5 }
 0xa7a   : > { %v1265_v31 = vpop.xlane.xlu0 %1264 }
 0xa7b   : > { %4378 = vrcp.f32 %v1265_v31  ;;  %v1277_v36 = vand.u32 2147483648, %v1265_v31  ;;  %v1275_v38 = vand.u32 2147483647, %v1265_v31  ;;  %vm1271_vm11 = vweird.f32 %v1265_v31 }
 0xa7d   : > { %v1278_v40 = vor.u32 1.1754944e-38, %v1277_v36  ;;  %vm1276_vm13 = vcmp.eq.f32.partialorder %v1275_v38, 8.507059e+37 }
 0xa7e   : > { %1419 = vrot.lane.b32.xlu0 %v4655_v49, %s5463_s0 }
 0xa81   : > { %v4379_v32 = vpop.eup %4378 }
 0xa82   : > { %v1267_v33 = vmul.f32 %v4379_v32, %v1265_v31  ;;  %vm1272_vm10 = vweird.f32 %v4379_v32 }
 0xa83   : > { %vm1273_vm12 = vmor %vm1271_vm11, %vm1272_vm10 }
 0xa84   : > { %v1268_v34 = vsub.f32 1.0, %v1267_v33 }
 0xa86   : > { %v1269_v37 = vmul.f32 %v4379_v32, %v1268_v34  ;;  %1417 = vrot.lane.b32.xlu0 %v1235_v6, %s5463_s0 }
 0xa88   : > { %v1270_v39 = vadd.f32 %v4379_v32, %v1269_v37 }
 0xa8a   : > { %v1274_v41 = vsel %vm1273_vm12, %v4379_v32, %v1270_v39 }
 0xa8b   : > { %v1279_v42 = vsel %vm1276_vm13, %v1278_v40, %v1274_v41 }
 0xa8c   : > { %v1280_v43 = vmul.f32 %v4375_v23, %v1279_v42 }
 0xa8e   : > { %v1281_v45 = vpack.c.bf16 %v1280_v43, %v1280_v43 }
 0xa90   : > { %3487 = vmatmul.msk.bf16.vlgmr.msra.gmra.mxu2 %vm750_vm1, %v1281_v45 }
 0xa91   : > { %1525 = vmatpush.bf16.xpose.msra.mxu2 %v1516_v46 }
 0xad5   : > { %v1358_v50 = vpop.xlane.xlu0 %1357 }
 0xad6   : > { %4380 = vrcp.f32 %v1358_v50  ;;  %v1370_v54 = vand.u32 2147483648, %v1358_v50  ;;  %v1368_v56 = vand.u32 2147483647, %v1358_v50  ;;  %vm1364_vm15 = vweird.f32 %v1358_v50 }
 0xad8   : > { %v1371_v58 = vor.u32 1.1754944e-38, %v1370_v54  ;;  %vm1369_vm4 = vcmp.eq.f32.partialorder %v1368_v56, 8.507059e+37 }
 0xadc   : > { %v4381_v51 = vpop.eup %4380 }
 0xadd   : > { %v1360_v52 = vmul.f32 %v4381_v51, %v1358_v50  ;;  %vm1365_vm14 = vweird.f32 %v4381_v51 }
 0xade   : > { %vm1366_vm3 = vmor %vm1364_vm15, %vm1365_vm14 }
 0xadf   : > { %v1361_v53 = vsub.f32 1.0, %v1360_v52 }
 0xae1   : > { %v1362_v55 = vmul.f32 %v4381_v51, %v1361_v53 }
 0xae3   : > { %v1363_v57 = vadd.f32 %v4381_v51, %v1362_v55 }
 0xae5   : > { %v1367_v59 = vsel %vm1366_vm3, %v4381_v51, %v1363_v57 }
 0xae6   : > { %v1372_v60 = vsel %vm1369_vm4, %v1371_v58, %v1367_v59 }
 0xae7   : > { %v1373_v61 = vmul.f32 %v4377_v28, %v1372_v60 }
 0xae8   : > { %v1376_v62 = vpop.permute.xlu0 %1375 }
 0xae9   : > { %v1381_v0 = vsel %vm801_vm2, %v1376_v62, 0  ;;  %v1374_v1 = vpack.c.bf16 %v1373_v61, %v1373_v61 }
 0xaea   : > { %1390 = vmatpush.bf16.msra.mxu1 %v1381_v0 }
 0xaed   : > { %3490 = vmatmul.msk.bf16.vlgmr.msra.gmra.mxu1 %vm750_vm1, %v1374_v1 }
 0xaf0   : > { %v1420_v7 = vpop.permute.xlu0 %1419 }
 0xaf1   : > { %v1425_v3 = vsel %vm750_vm1, %v1420_v7, 0 }
 0xaf2   : > { %1434 = vmatpush.bf16.xpose.msrb.mxu3 %v1425_v3 }
 0xaf8   : > { %v1418_v8 = vpop.permute.xlu0 %1417 }
 0xb13   : > { %v1300_v4 = vpop.f32.mrf.mxu2 }
 0xb14   : > { %v1304_v5 = vpack.c.bf16 %v1300_v4, %v1300_v4 }
 0xb16   : > { %3488 = vmatmul.msk.bf16.vlgmr.msra.gmra.mxu3 %vm750_vm1, %v1304_v5  ;;  %v1229_v5 = vld [vmem:[%s5429_s12 + $0xc] sm:$0xf] }
 0xb1b   : > { %v1302_v6 = vpop.f32.mrf.mxu2 }
 0xb1c   : > { %v1583_v6 = vsel %vm801_vm2, %v1229_v5, 0  ;;  %v4172_v5 = vld [vmem:[%s5433_s16 + $0x4c] sm:$0xf0] }
 0xb26   : > { %3492 = vmatmul.msk.bf16.vlgmr.msrb.gmra.mxu3 %vm750_vm1, %v1418_v8  ;;  %v1228_v8 = vld [vmem:[%s5429_s12 + $0x8] sm:$0xf] }
 0xb6a   : > { %v1392_v9 = vpop.f32.mrf.mxu1 }
 0xb6b   : > { %v1396_v10 = vpack.c.bf16 %v1392_v9, %v1392_v9  ;;  %v1492_v9 = vsel %vm801_vm2, %v1228_v8, 0 }
 0xb6c   : > { %1501 = vmatpush.bf16.msrb.mxu1 %v1492_v9  ;;  %v3518_v9 = vld [vmem:[%s5433_s16 + $0x50] sm:$0xf0] }
 0xb6d   : > { %3491 = vmatmul.msk.bf16.vlgmr.msrb.gmra.mxu2 %vm750_vm1, %v1396_v10 }
 0xb72   : > { %v1394_v11 = vpop.f32.mrf.mxu1 }
 0xb7d   : > { %3495 = vmatmul.msk.bf16.vlgmr.msra.gmra.mxu2 %vm750_vm1, %v1509_v12 }
 0xb99   : > { %v1320_v13 = vpop.f32.mrf.mxu3 }
 0xb9a   : > { %v1324_v20 = vadd.f32 %v4348_v19, %v1320_v13 }
 0xba1   : > { %v1322_v14 = vpop.f32.mrf.mxu3 }
 0xba9   : > { %v1436_v15 = vpop.f32.mrf.mxu3 }
 0xbaa   : > { %v1440_v16 = vmul.f32 0.35355338, %v1436_v15 }
 0xbac   : > { %v1441_v17 = vsel %vm750_vm1, %v1440_v16, -inf }
 0xbad   : > { %1442 = vmax.xlane.f32.xlu0 %v1441_v17 }
 0xbb1   : > { %v1438_v18 = vpop.f32.mrf.mxu3 }
 0xbc1   : > { %1557 = vrot.lane.b32.xlu0 %v4655_v49, %s5464_s28 }
 0xbf0   : > { %v1412_v21 = vpop.f32.mrf.mxu2 }
 0xbf1   : > { %v4717_v22 = vadd.f32 %v1412_v21, %v1324_v20 }
 0xbf8   : > { %v1414_v23 = vpop.f32.mrf.mxu2 }
 0xc00   : > { %v1527_v24 = vpop.f32.mrf.mxu2 }
 0xc01   : > { %v1531_v25 = vmul.f32 0.35355338, %v1527_v24 }
 0xc03   : > { %v1532_v26 = vsel %vm750_vm1, %v1531_v25, -inf }
 0xc04   : > { %1533 = vmax.xlane.f32.xlu2 %v1532_v26 }
 0xc08   : > { %v1529_v27 = vpop.f32.mrf.mxu2 }
 0xc20   : > { %v1443_v28 = vpop.xlane.xlu0 %1442 }
 0xc21   : > { %v1444_v2 = vsub.f32 %v1440_v16, %v1443_v28 }
 0xc23   : > { %v1445_v29 = vmul.f32 1.442695, %v1444_v2 }
 0xc25   : > { %4382 = vpow2.f32 %v1445_v29  ;;  %v4178_v29 = vld [vmem:[%s5433_s16 + $0x84] sm:$0xf] }
 0xc2b   : > { %v4383_v30 = vpop.eup %4382 }
 0xc2c   : > { %v1447_v31 = vsel %vm750_vm1, %v4383_v30, 0.0 }
 0xc2d   : > { %1448 = vadd.xlane.f32.xlu2 %v1447_v31  ;;  %v3566_v31 = vld [vmem:[%s5433_s16 + $0xc0] sm:$0xf0] }
 0xc33   : > { %v1558_v32 = vpop.permute.xlu0 %1557 }
 0xc34   : > { %v1563_v33 = vsel %vm801_vm2, %v1558_v32, 0  ;;  %v3572_v32 = vld [vmem:[%s5433_s16 + $0x88] sm:$0xf] }
 0xc35   : > { %1572 = vmatpush.bf16.msra.mxu3 %v1563_v33  ;;  %v4187_v33 = vld [vmem:[%s5433_s16 + $0xc4] sm:$0xf0] }
 0xc77   : > { %v1534_v34 = vpop.xlane.xlu2 %1533 }
 0xc78   : > { %v1535_v36 = vsub.f32 %v1531_v25, %v1534_v34  ;;  %v3569_v34 = vor.u32 %v4178_v29, %v3566_v31  ;;  %v4182_v29 = vld [vmem:[%s5433_s16 + $0xa4] sm:$0xf] }
 0xc7a   : > { %v1536_v37 = vmul.f32 1.442695, %v1535_v36  ;;  %v3573_v36 = vor.u32 %v4187_v33, %v3572_v32  ;;  %1883 = vmatpush.bf16.msrb.mxu2 %v3569_v34  ;;  %v4191_v32 = vld [vmem:[%s5433_s16 + $0xe4] sm:$0xf0]  ;;  %v4183_v33 = vld [vmem:[%s5433_s16 + $0xac] sm:$0xf] }
 0xc7b   : > { %v3606_v34 = vld [vmem:[%s5433_s16 + $0xe8] sm:$0xf0] }
 0xc7c   : > { %4384 = vpow2.f32 %v1536_v37  ;;  %v4179_v37 = vld [vmem:[%s5433_s16 + $0x8c] sm:$0xf]  ;;  %1896 = vmatpush.bf16.msrb.mxu3 %v3573_v36 }
 0xc82   : > { %v4385_v38 = vpop.eup %4384 }
 0xc83   : > { %v1538_v39 = vsel %vm750_vm1, %v4385_v38, 0.0 }
 0xc84   : > { %1539 = vadd.xlane.f32.xlu1 %v1538_v39 }
 0xc9d   : > { %1466 = vrot.lane.b32.xlu1 %v4655_v49, %s5465_s27 }
 0xca0   : > { %v1449_v40 = vpop.xlane.xlu2 %1448 }
 0xca1   : > { %4386 = vrcp.f32 %v1449_v40  ;;  %v1461_v54 = vand.u32 2147483648, %v1449_v40  ;;  %vm1455_vm8 = vweird.f32 %v1449_v40  ;;  %v1459_v49 = vand.u32 2147483647, %v1449_v40 }
 0xca3   : > { %v1462_v60 = vor.u32 1.1754944e-38, %v1461_v54  ;;  %vm1460_vm12 = vcmp.eq.f32.partialorder %v1459_v49, 8.507059e+37  ;;  %v3580_v54 = vld [vmem:[%s5433_s16 + $0x90] sm:$0xf]  ;;  %v4180_v49 = vld [vmem:[%s5433_s16 + $0x94] sm:$0xf] }
 0xca7   : > { %v4387_v41 = vpop.eup %4386 }
 0xca8   : > { %v1451_v43 = vmul.f32 %v4387_v41, %v1449_v40  ;;  %vm1456_vm6 = vweird.f32 %v4387_v41  ;;  %v3500_v40 = vld [vmem:[%s5433_s16] sm:$0xf] }
 0xca9   : > { %vm1457_vm10 = vmor %vm1455_vm8, %vm1456_vm6 }
 0xcaa   : > { %v1452_v44 = vsub.f32 1.0, %v1451_v43 }
 0xcac   : > { %v1453_v47 = vmul.f32 %v4387_v41, %v1452_v44  ;;  %v3502_v44 = vld [vmem:[%s5433_s16 + $0x40] sm:$0xf0] }
 0xcae   : > { %v1454_v53 = vadd.f32 %v4387_v41, %v1453_v47 }
 0xcb0   : > { %v1458_v58 = vsel %vm1457_vm10, %v4387_v41, %v1454_v53  ;;  %v4170_v41 = vld [vmem:[%s5433_s16 + $0x3c] sm:$0xf0] }
 0xcb1   : > { %v1463_v62 = vsel %vm1460_vm12, %v1462_v60, %v1458_v58  ;;  %v3501_v43 = vor.u32 %v4170_v41, %v3500_v40  ;;  %v3582_v58 = vld [vmem:[%s5433_s16 + $0xd0] sm:$0xf0]  ;;  %v4189_v60 = vld [vmem:[%s5433_s16 + $0xd4] sm:$0xf0]  ;;  %v4174_v40 = vld [vmem:[%s5433_s16 + $0x5c] sm:$0xf0] }
 0xcb2   : > { %v1464_v1 = vmul.f32 %v4383_v30, %v1463_v62 }
 0xcb4   : > { %v1465_v4 = vpack.c.bf16 %v1464_v1, %v1464_v1  ;;  %v3590_v1 = vld [vmem:[%s5433_s16 + $0xd8] sm:$0xf0] }
 0xcf7   : > { %v1540_v42 = vpop.xlane.xlu1 %1539 }
 0xcf8   : > { %4388 = vrcp.f32 %v1540_v42  ;;  %v1552_v50 = vand.u32 2147483648, %v1540_v42  ;;  %v1550_v52 = vand.u32 2147483647, %v1540_v42  ;;  %vm1546_vm7 = vweird.f32 %v1540_v42 }
 0xcfa   : > { %v1553_v56 = vor.u32 1.1754944e-38, %v1552_v50  ;;  %vm1551_vm11 = vcmp.eq.f32.partialorder %v1550_v52, 8.507059e+37  ;;  %v4163_v50 = vld [vmem:[%s5433_s16 + $0xc] sm:$0xf] }
 0xcfe   : > { %v4389_v45 = vpop.eup %4388 }
 0xcff   : > { %v1542_v46 = vmul.f32 %v4389_v45, %v1540_v42  ;;  %vm1547_vm5 = vweird.f32 %v4389_v45  ;;  %v4162_v42 = vld [vmem:[%s5433_s16 + $0x4] sm:$0xf] }
 0xd00   : > { %vm1548_vm9 = vmor %vm1546_vm7, %vm1547_vm5  ;;  %v3505_v47 = vor.u32 %v4162_v42, %v3502_v44  ;;  %v3609_v42 = vor.u32 %v4183_v33, %v3606_v34  ;;  %v3534_v44 = vld [vmem:[%s5433_s16 + $0x60] sm:$0xf0]  ;;  %v4213_v33 = vld [vmem:[%s5435_s18 + $0x98] sm:$0xff] }
 0xd01   : > { %v1543_v48 = vsub.f32 1.0, %v1542_v46  ;;  %v4171_v46 = vld [vmem:[%s5433_s16 + $0x44] sm:$0xf0]  ;;  %v4196_v34 = vld [vmem:[%s5435_s18 + $0x10] sm:$0xff] }
 0xd02   : > { %1884 = vmatpush.bf16.msrb.mxu2 %v3505_v47  ;;  %v4167_v47 = vld [vmem:[%s5433_s16 + $0x2c] sm:$0xf] }
 0xd03   : > { %v1544_v51 = vmul.f32 %v4389_v45, %v1543_v48 }
 0xd05   : > { %v1545_v55 = vadd.f32 %v4389_v45, %v1544_v51  ;;  %v3510_v51 = vld [vmem:[%s5433_s16 + $0x48] sm:$0xf0] }
 0xd06   : > { %v3513_v52 = vor.u32 %v4163_v50, %v3510_v51 }
 0xd07   : > { %v1549_v57 = vsel %vm1548_vm9, %v4389_v45, %v1545_v55  ;;  %v3508_v45 = vld [vmem:[%s5433_s16 + $0x8] sm:$0xf]  ;;  %v4188_v55 = vld [vmem:[%s5433_s16 + $0xcc] sm:$0xf0] }
 0xd08   : > { %v1554_v59 = vsel %vm1551_vm11, %v1553_v56, %v1549_v57  ;;  %v3509_v48 = vor.u32 %v4171_v46, %v3508_v45  ;;  %v3581_v57 = vor.u32 %v4188_v55, %v3580_v54  ;;  %v3540_v45 = vld [vmem:[%s5433_s16 + $0x28] sm:$0xf]  ;;  %v3612_v54 = vld [vmem:[%s5433_s16 + $0xb0] sm:$0xf] }
 0xd09   : > { %v1555_v61 = vmul.f32 %v4385_v38, %v1554_v59  ;;  %v3574_v38 = vld [vmem:[%s5433_s16 + $0xc8] sm:$0xf0]  ;;  %v3588_v59 = vld [vmem:[%s5433_s16 + $0x98] sm:$0xf]  ;;  %v4175_v46 = vld [vmem:[%s5433_s16 + $0x64] sm:$0xf0] }
 0xd0a   : > { %v3577_v39 = vor.u32 %v4179_v37, %v3574_v38  ;;  %1897 = vmatpush.bf16.msrb.mxu3 %v3509_v48  ;;  %v3589_v62 = vor.u32 %v4189_v60, %v3588_v59  ;;  %v3542_v48 = vld [vmem:[%s5433_s16 + $0x68] sm:$0xf0]  ;;  %v4192_v55 = vld [vmem:[%s5433_s16 + $0xec] sm:$0xf0]  ;;  %v4185_v59 = vld [vmem:[%s5433_s16 + $0xbc] sm:$0xf] }
 0xd0b   : > { %v1556_v0 = vpack.c.bf16 %v1555_v61, %v1555_v61  ;;  %v3585_v61 = vor.u32 %v4180_v49, %v3582_v58  ;;  %v4184_v49 = vld [vmem:[%s5433_s16 + $0xb4] sm:$0xf]  ;;  %v4193_v58 = vld [vmem:[%s5433_s16 + $0xf4] sm:$0xf0]  ;;  %v3622_v60 = vld [vmem:[%s5433_s16 + $0xf8] sm:$0xf0] }
 0xd0d   : > { %3496 = vmatmul.msk.bf16.vlgmr.msra.gmra.mxu3 %vm750_vm1, %v1556_v0  ;;  %v4181_v0 = vld [vmem:[%s5433_s16 + $0x9c] sm:$0xf]  ;;  %1935 = vmatpush.bf16.msra.mxu2 %v3585_v61  ;;  %v3613_v61 = vor.u32 %v4192_v55, %v3612_v54  ;;  %v4240_v54 = vld [vmem:[%s5435_s18 + $0x170] sm:$0xff] }
 0xd0e   : > { %1948 = vmatpush.bf16.msra.mxu3 %v3589_v62  ;;  %v4248_v55 = vld [vmem:[%s5435_s18 + $0x1b0] sm:$0xff] }
 0xd0f   : > { %v1467_v7 = vpop.permute.xlu1 %1466 }
 0xd10   : > { %v1472_v3 = vsel %vm801_vm2, %v1467_v7, 0  ;;  %v3516_v7 = vld [vmem:[%s5433_s16 + $0x10] sm:$0xf] }
 0xd11   : > { %1481 = vmatpush.bf16.msrb.mxu0 %v1472_v3  ;;  %v3517_v8 = vor.u32 %v4172_v5, %v3516_v7  ;;  %v3550_v5 = vld [vmem:[%s5433_s16 + $0x70] sm:$0xf0] }
 0xd14   : > { %3493 = vmatmul.msk.bf16.vlgmr.msrb.gmra.mxu0 %vm750_vm1, %v1465_v4  ;;  %v3593_v4 = vor.u32 %v4181_v0, %v3590_v1  ;;  %v3548_v0 = vld [vmem:[%s5433_s16 + $0x30] sm:$0xf] }
 0xd15   : > { %1592 = vmatpush.bf16.msra.mxu0 %v1583_v6  ;;  %v4164_v6 = vld [vmem:[%s5433_s16 + $0x14] sm:$0xf]  ;;  %v4176_v1 = vld [vmem:[%s5433_s16 + $0x6c] sm:$0xf0] }
 0xd19   : > { %1909 = vmatpush.bf16.msrb.mxu0 %v3577_v39  ;;  %v3532_v39 = vld [vmem:[%s5433_s16 + $0x20] sm:$0xf] }
 0xd1a   : > { %v3533_v50 = vor.u32 %v4174_v40, %v3532_v39  ;;  %v4195_v39 = vld [vmem:[%s5435_s18 + $0x8] sm:$0xff] }
 0xd1b   : > { %v4219_v40 = vld [vmem:[%s5435_s18 + $0xc8] sm:$0xff] }
 0xd1d   : > { %1910 = vmatpush.bf16.msrb.mxu0 %v3513_v52  ;;  %v3541_v52 = vor.u32 %v4175_v46, %v3540_v45  ;;  %v4233_v45 = vld [vmem:[%s5435_s18 + $0x138] sm:$0xff] }
 0xd1e   : > { %v4257_v46 = vld [vmem:[%s5435_s18 + $0x1f8] sm:$0xff] }
 0xd90   : > { %v1574_v10 = vpop.f32.mrf.mxu3 }
 0xd91   : > { %v1578_v11 = vpack.c.bf16 %v1574_v10, %v1574_v10  ;;  %v1483_v12 = vpop.f32.mrf.mxu0  ;;  %v3524_v10 = vld [vmem:[%s5433_s16 + $0x18] sm:$0xf] }
 0xd92   : > { %v1487_v13 = vpack.c.bf16 %v1483_v12, %v1483_v12  ;;  %v3521_v12 = vor.u32 %v4164_v6, %v3518_v9  ;;  %v3556_v6 = vld [vmem:[%s5433_s16 + $0x38] sm:$0xf]  ;;  %v4169_v9 = vld [vmem:[%s5433_s16 + $0x3c] sm:$0xf] }
 0xd93   : > { %3497 = vmatmul.msk.bf16.vlgmr.msra.gmra.mxu0 %vm750_vm1, %v1578_v11  ;;  %v4173_v11 = vld [vmem:[%s5433_s16 + $0x54] sm:$0xf0] }
 0xd94   : > { %3494 = vmatmul.msk.bf16.vlgmr.msrb.gmra.mxu1 %vm750_vm1, %v1487_v13  ;;  %1961 = vmatpush.bf16.msra.mxu0 %v3593_v4  ;;  %v3525_v13 = vor.u32 %v4173_v11, %v3524_v10  ;;  %v4168_v4 = vld [vmem:[%s5433_s16 + $0x34] sm:$0xf]  ;;  %v3558_v10 = vld [vmem:[%s5433_s16 + $0x78] sm:$0xf0]  ;;  %v3549_v11 = vor.u32 %v4176_v1, %v3548_v0 }
 0xd95   : > { %1936 = vmatpush.bf16.msra.mxu2 %v3521_v12  ;;  %v3553_v12 = vor.u32 %v4168_v4, %v3550_v5  ;;  %v4229_v0 = vld [vmem:[%s5435_s18 + $0x118] sm:$0xff] }
 0xd96   : > { %1949 = vmatpush.bf16.msra.mxu3 %v3525_v13  ;;  %v4253_v1 = vld [vmem:[%s5435_s18 + $0x1d8] sm:$0xff] }
 0xd97   : > { %v4237_v4 = vld [vmem:[%s5435_s18 + $0x158] sm:$0xff] }
 0xd98   : > { %v1576_v14 = vpop.f32.mrf.mxu3  ;;  %v4245_v5 = vld [vmem:[%s5435_s18 + $0x198] sm:$0xff] }
 0xd99   : > { %v1485_v15 = vpop.f32.mrf.mxu0  ;;  %v4165_v14 = vld [vmem:[%s5433_s16 + $0x1c] sm:$0xf] }
 0xd9a   : > { %v3526_v15 = vld [vmem:[%s5433_s16 + $0x58] sm:$0xf0] }
 0xe10   : > { %v1594_v16 = vpop.f32.mrf.mxu0 }
 0xe11   : > { %v1503_v17 = vpop.f32.mrf.mxu1 }
 0xe12   : > { %v1507_v18 = vadd.f32 %v1503_v17, %v4717_v22  ;;  %v4186_v22 = vld [vmem:[%s5433_s16 + $0xbc] sm:$0xf0] }
 0xe14   : > { %v1598_v19 = vadd.f32 %v1594_v16, %v1507_v18  ;;  %v3529_v16 = vor.u32 %v4165_v14, %v3526_v15  ;;  %v3561_v14 = vor.u32 %v4169_v9, %v3558_v10  ;;  %v4201_v15 = vld [vmem:[%s5435_s18 + $0x38] sm:$0xff]  ;;  %v4236_v9 = vld [vmem:[%s5435_s18 + $0x150] sm:$0xff] }
 0xe15   : > { %v4244_v10 = vld [vmem:[%s5435_s18 + $0x190] sm:$0xff] }
 0xe16   : > { %v1599_v20 = vadd.f32 %v1598_v19, %v4667_v63  ;;  %v3564_v63 = vld [vmem:[%s5433_s16 + $0x80] sm:$0xf]  ;;  %1962 = vmatpush.bf16.msra.mxu0 %v3529_v16  ;;  %v4225_v16 = vld [vmem:[%s5435_s18 + $0xf8] sm:$0xff] }
 0xe17   : > { %v3565_v30 = vor.u32 %v4186_v22, %v3564_v63  ;;  %v3596_v63 = vld [vmem:[%s5433_s16 + $0xa0] sm:$0xf] }
 0xe18   : > { %v1596_v21 = vpop.f32.mrf.mxu0  ;;  %v1602_v23 = vsel %vm720_vm0, %v1599_v20, 0.0  ;;  %v4190_v22 = vld [vmem:[%s5433_s16 + $0xdc] sm:$0xf0] }
 0xe19   : > { %1603 = vadd.xlane.f32.xlu2 %v1602_v23  ;;  %v1505_v24 = vpop.f32.mrf.mxu1  ;;  %1870 = vmatpush.bf16.msra.mxu1 %v3565_v30  ;;  %v3598_v30 = vld [vmem:[%s5433_s16 + $0xe0] sm:$0xf0]  ;;  %v3597_v37 = vor.u32 %v4190_v22, %v3596_v63 }
 0xe1a   : > { %v4349_v24 = vld [vmem:[%s5431_s14] ss:$0 sm:$0xff]  ;;  %v3601_v38 = vor.u32 %v4182_v29, %v3598_v30  ;;  %v4197_v30 = vld [vmem:[%s5435_s18 + $0x18] sm:$0xff] }
 0xe1b   : > { %v4222_v63 = vld [vmem:[%s5435_s18 + $0xe0] sm:$0xff] }
 0xe1c   : > { %v4206_v22 = vld [vmem:[%s5435_s18 + $0x60] sm:$0xff] }
 0xe1d   : > { %1871 = vmatpush.bf16.msra.mxu1 %v3501_v43  ;;  %v4166_v43 = vld [vmem:[%s5433_s16 + $0x24] sm:$0xf] }
 0xe1e   : > { %v3537_v51 = vor.u32 %v4166_v43, %v3534_v44  ;;  %v4214_v29 = vld [vmem:[%s5435_s18 + $0xa0] sm:$0xff] }
 0xe1f   : > { %v4194_v43 = vld [vmem:[%s5435_s18] sm:$0xff] }
 0xe20   : > { %v4218_v44 = vld [vmem:[%s5435_s18 + $0xc0] sm:$0xff] }
 0xe21   : > { %1922 = vmatpush.bf16.msrb.mxu1 %v3581_v57  ;;  %v3620_v57 = vld [vmem:[%s5433_s16 + $0xb8] sm:$0xf] }
 0xe22   : > { %v3621_v7 = vor.u32 %v4193_v58, %v3620_v57  ;;  %v4239_v57 = vld [vmem:[%s5435_s18 + $0x168] sm:$0xff] }
 0xe23   : > { %v4247_v58 = vld [vmem:[%s5435_s18 + $0x1a8] sm:$0xff] }
 0xe25   : > { %1923 = vmatpush.bf16.msrb.mxu1 %v3517_v8  ;;  %v4177_v8 = vld [vmem:[%s5433_s16 + $0x74] sm:$0xf0] }
 0xe26   : > { %v3557_v13 = vor.u32 %v4177_v8, %v3556_v6  ;;  %v4227_v6 = vld [vmem:[%s5435_s18 + $0x108] sm:$0xff] }
 0xe27   : > { %v4251_v8 = vld [vmem:[%s5435_s18 + $0x1c8] sm:$0xff] }
 0xe8c   : > { %v1604_v25 = vpop.xlane.xlu2 %1603 }
 0xe8d   : > { %v1605_v26 = vmul.f32 %v1604_v25, %v4641_v35 }
 0xe8f   : > { %v4742_v27 = vsub.f32 %v1599_v20, %v1605_v26  ;;  %v4350_v26 = vld [vmem:[%s5432_s15] ss:$0 sm:$0xff] }
 0xe91   : > { %v1607_v28 = vmul.f32 %v4742_v27, %v4742_v27 }
 0xe93   : > { %v1608_v2 = vsel %vm720_vm0, %v1607_v28, 0.0 }
 0xe94   : > { %1609 = vadd.xlane.f32.xlu2 %v1608_v2 }
 0xf07   : > { %v1610_v53 = vpop.xlane.xlu2 %1609 }
 0xf08   : > { %v1611_v56 = vmul.f32 %v1610_v53, %v4641_v35  ;;  %v3545_v53 = vor.u32 %v4167_v47, %v3542_v48  ;;  %v4202_v47 = vld [vmem:[%s5435_s18 + $0x40] sm:$0xff] }
 0xf09   : > { %v4210_v48 = vld [vmem:[%s5435_s18 + $0x80] sm:$0xff] }
 0xf0a   : > { %v1612_v3 = vadd.f32 1e-05, %v1611_v56  ;;  %v3614_v56 = vld [vmem:[%s5433_s16 + $0xf0] sm:$0xf0] }
 0xf0b   : > { %v3617_v62 = vor.u32 %v4184_v49, %v3614_v56  ;;  %v4231_v49 = vld [vmem:[%s5435_s18 + $0x128] sm:$0xff] }
 0xf0c   : > { %4390 = vrsqrt.f32 %v1612_v3  ;;  %vm1619_vm2 = vweird.f32 %v1612_v3  ;;  %v4255_v56 = vld [vmem:[%s5435_s18 + $0x1e8] sm:$0xff] }
 0xf12   : > { %v4391_v17 = vpop.eup %4390 }
 0xf13   : > { %v1614_v18 = vmul.f32 %v4391_v17, %v1612_v3  ;;  %vm1620_vm1 = vweird.f32 %v4391_v17  ;;  %v3625_v3 = vor.u32 %v4185_v59, %v3622_v60  ;;  %v4230_v59 = vld [vmem:[%s5435_s18 + $0x120] sm:$0xff] }
 0xf14   : > { %vm1621_vm13 = vmor %vm1619_vm2, %vm1620_vm1  ;;  %v4254_v60 = vld [vmem:[%s5435_s18 + $0x1e0] sm:$0xff] }
 0xf15   : > { %v1615_v19 = vmul.f32 %v4391_v17, %v1614_v18  ;;  %v4217_v18 = vld [vmem:[%s5435_s18 + $0xb8] sm:$0xff] }
 0xf17   : > { %v1616_v20 = vmul.f32 0.5, %v1615_v19  ;;  %v4200_v19 = vld [vmem:[%s5435_s18 + $0x30] sm:$0xff] }
 0xf19   : > { %v1617_v21 = vsub.f32 1.5, %v1616_v20  ;;  %v4224_v20 = vld [vmem:[%s5435_s18 + $0xf0] sm:$0xff] }
 0xf1b   : > { %v1618_v23 = vmul.f32 %v4391_v17, %v1617_v21  ;;  %v4208_v21 = vld [vmem:[%s5435_s18 + $0x70] sm:$0xff] }
 0xf1d   : > { %v1622_v25 = vsel %vm1621_vm13, %v4391_v17, %v1618_v23  ;;  %v4209_v17 = vld [vmem:[%s5435_s18 + $0x78] sm:$0xff]  ;;  %v4216_v23 = vld [vmem:[%s5435_s18 + $0xb0] sm:$0xff] }
 0xf1e   : > { %v1623_v28 = vmul.f32 %v1622_v25, %v4742_v27  ;;  %v3604_v27 = vld [vmem:[%s5433_s16 + $0xa8] sm:$0xf] }
 0xf1f   : > { %v3605_v41 = vor.u32 %v4191_v32, %v3604_v27  ;;  %v4223_v25 = vld [vmem:[%s5435_s18 + $0xe8] sm:$0xff]  ;;  %v4221_v27 = vld [vmem:[%s5435_s18 + $0xd8] sm:$0xff] }
 0xf20   : > { %v1627_v2 = vmul.f32 %v4349_v24, %v1623_v28  ;;  %v4199_v24 = vld [vmem:[%s5435_s18 + $0x28] sm:$0xff]  ;;  %v4205_v32 = vld [vmem:[%s5435_s18 + $0x58] sm:$0xff] }
 0xf21   : > { %v4215_v28 = vld [vmem:[%s5435_s18 + $0xa8] sm:$0xff] }
 0xf22   : > { %v4866_v31 = vadd.f32 %v4350_v26, %v1627_v2  ;;  %v4207_v26 = vld [vmem:[%s5435_s18 + $0x68] sm:$0xff]  ;;  %v4198_v2 = vld [vmem:[%s5435_s18 + $0x20] sm:$0xff] }
 0xf24   : > { %v4879_v36 = vpack.c.bf16 %v4866_v31, %v4866_v31 }
 0xf26   : > { %3626 = vmatmul.msk.bf16.vlgmr.msra.gmra.mxu1 %vm720_vm0, %v4879_v36  ;;  %3627 = vmatmul.msk.bf16.vlgmr.msrb.gmra.mxu2 %vm720_vm0, %v4879_v36 }
 0xf27   : > { %3628 = vmatmul.msk.bf16.vlgmr.msrb.gmra.mxu3 %vm720_vm0, %v4879_v36  ;;  %3629 = vmatmul.msk.bf16.vlgmr.msrb.gmra.mxu0 %vm720_vm0, %v4879_v36 }
 0xf28   : > { %1974 = vmatpush.bf16.msra.mxu1 %v3597_v37  ;;  %1987 = vmatpush.bf16.msrb.mxu2 %v3601_v38  ;;  %v4220_v37 = vld [vmem:[%s5435_s18 + $0xd0] sm:$0xff] }
 0xf29   : > { %2000 = vmatpush.bf16.msrb.mxu3 %v3605_v41  ;;  %2013 = vmatpush.bf16.msrb.mxu0 %v3609_v42  ;;  %v4204_v38 = vld [vmem:[%s5435_s18 + $0x50] sm:$0xff]  ;;  %v4203_v41 = vld [vmem:[%s5435_s18 + $0x48] sm:$0xff] }
 0xf2a   : > { %v4211_v42 = vld [vmem:[%s5435_s18 + $0x88] sm:$0xff] }
 0xf2c   : > { %1975 = vmatpush.bf16.msra.mxu1 %v3533_v50  ;;  %1988 = vmatpush.bf16.msrb.mxu2 %v3537_v51  ;;  %v4241_v50 = vld [vmem:[%s5435_s18 + $0x178] sm:$0xff] }
 0xf2d   : > { %2001 = vmatpush.bf16.msrb.mxu3 %v3541_v52  ;;  %2014 = vmatpush.bf16.msrb.mxu0 %v3545_v53  ;;  %v4249_v51 = vld [vmem:[%s5435_s18 + $0x1b8] sm:$0xff]  ;;  %v4232_v52 = vld [vmem:[%s5435_s18 + $0x130] sm:$0xff] }
 0xf2e   : > { %v4256_v53 = vld [vmem:[%s5435_s18 + $0x1f0] sm:$0xff] }
 0xf36   : > { %3630 = vmatmul.msk.bf16.vlgmr.msrb.gmra.mxu1 %vm720_vm0, %v4879_v36  ;;  %3631 = vmatmul.msk.bf16.vlgmr.msra.gmra.mxu2 %vm720_vm0, %v4879_v36 }
 0xf37   : > { %3632 = vmatmul.msk.bf16.vlgmr.msra.gmra.mxu3 %vm720_vm0, %v4879_v36  ;;  %3633 = vmatmul.msk.bf16.vlgmr.msra.gmra.mxu0 %vm720_vm0, %v4879_v36 }
 0xf38   : > { %2026 = vmatpush.bf16.msrb.mxu1 %v3613_v61  ;;  %2039 = vmatpush.bf16.msra.mxu2 %v3617_v62  ;;  %v4238_v61 = vld [vmem:[%s5435_s18 + $0x160] sm:$0xff] }
 0xf39   : > { %2052 = vmatpush.bf16.msra.mxu3 %v3621_v7  ;;  %2065 = vmatpush.bf16.msra.mxu0 %v3625_v3  ;;  %v4246_v62 = vld [vmem:[%s5435_s18 + $0x1a0] sm:$0xff]  ;;  %v4228_v7 = vld [vmem:[%s5435_s18 + $0x110] sm:$0xff] }
 0xf3a   : > { %v4252_v3 = vld [vmem:[%s5435_s18 + $0x1d0] sm:$0xff] }
 0xf3c   : > { %2027 = vmatpush.bf16.msrb.mxu1 %v3549_v11  ;;  %2040 = vmatpush.bf16.msra.mxu2 %v3553_v12  ;;  %v4226_v11 = vld [vmem:[%s5435_s18 + $0x100] sm:$0xff] }
 0xf3d   : > { %2053 = vmatpush.bf16.msra.mxu3 %v3557_v13  ;;  %2066 = vmatpush.bf16.msra.mxu0 %v3561_v14  ;;  %v4250_v12 = vld [vmem:[%s5435_s18 + $0x1c0] sm:$0xff]  ;;  %v4235_v13 = vld [vmem:[%s5435_s18 + $0x148] sm:$0xff] }
 0xf3e   : > { %v4243_v14 = vld [vmem:[%s5435_s18 + $0x188] sm:$0xff] }
 0xf46   : > { %3634 = vmatmul.msk.bf16.vlgmr.msra.gmra.mxu1 %vm720_vm0, %v4879_v36  ;;  %3635 = vmatmul.msk.bf16.vlgmr.msrb.gmra.mxu2 %vm720_vm0, %v4879_v36 }
 0xf47   : > { %3636 = vmatmul.msk.bf16.vlgmr.msrb.gmra.mxu3 %vm720_vm0, %v4879_v36  ;;  %3637 = vmatmul.msk.bf16.vlgmr.msrb.gmra.mxu0 %vm720_vm0, %v4879_v36 }
 0xf48   : > { %3132 = vmatpush.bf16.msra.mxu1 %v4201_v15  ;;  %3171 = vmatpush.bf16.msrb.mxu0 %v4225_v16  ;;  %v4234_v15 = vld [vmem:[%s5435_s18 + $0x140] sm:$0xff] }
 0xf49   : > { %3145 = vmatpush.bf16.msrb.mxu2 %v4209_v17  ;;  %3158 = vmatpush.bf16.msrb.mxu3 %v4217_v18  ;;  %v4242_v16 = vld [vmem:[%s5435_s18 + $0x180] sm:$0xff] }
 0xf4a   : > { %v5180_v17 = vld [vmem:[%s5434_s17] sm:$0xff] }
 0xf4b   : > { %v1669_v18 = vperm.slane %v5180_v17, 0 }
 0xf4c   : > { %3133 = vmatpush.bf16.msra.mxu1 %v4200_v19  ;;  %3172 = vmatpush.bf16.msrb.mxu0 %v4224_v20  ;;  %v1672_v19 = vperm.slane %v5180_v17, 3 }
 0xf4d   : > { %3146 = vmatpush.bf16.msrb.mxu2 %v4208_v21  ;;  %3159 = vmatpush.bf16.msrb.mxu3 %v4216_v23 }
 0xf50   : > { %3134 = vmatpush.bf16.msra.mxu1 %v4199_v24  ;;  %3173 = vmatpush.bf16.msrb.mxu0 %v4223_v25 }
 0xf51   : > { %3147 = vmatpush.bf16.msrb.mxu2 %v4207_v26  ;;  %3160 = vmatpush.bf16.msrb.mxu3 %v4215_v28  ;;  %v1670_v26 = vperm.slane %v5180_v17, 1 }
 0xf54   : > { %3135 = vmatpush.bf16.msra.mxu1 %v4198_v2  ;;  %3174 = vmatpush.bf16.msrb.mxu0 %v4222_v63  ;;  %v1671_v2 = vperm.slane %v5180_v17, 2  ;;  %v4265_v63 = vld [vmem:[%s5435_s18 + $0x238] sm:$0xff] }
 0xf55   : > { %3148 = vmatpush.bf16.msrb.mxu2 %v4206_v22  ;;  %3161 = vmatpush.bf16.msrb.mxu3 %v4214_v29  ;;  %v4289_v29 = vld [vmem:[%s5435_s18 + $0x2f8] sm:$0xff] }
 0xf56   : > { %3638 = vmatmul.msk.bf16.vlgmr.msrb.gmra.mxu1 %vm720_vm0, %v4879_v36  ;;  %3639 = vmatmul.msk.bf16.vlgmr.msra.gmra.mxu2 %vm720_vm0, %v4879_v36 }
 0xf57   : > { %3640 = vmatmul.msk.bf16.vlgmr.msra.gmra.mxu3 %vm720_vm0, %v4879_v36  ;;  %3641 = vmatmul.msk.bf16.vlgmr.msra.gmra.mxu0 %vm720_vm0, %v4879_v36  ;;  %v4212_v36 = vld [vmem:[%s5435_s18 + $0x90] sm:$0xff] }
 0xf58   : > { %3136 = vmatpush.bf16.msra.mxu1 %v4197_v30  ;;  %3175 = vmatpush.bf16.msrb.mxu0 %v4221_v27 }
 0xf59   : > { %3149 = vmatpush.bf16.msrb.mxu2 %v4205_v32  ;;  %3162 = vmatpush.bf16.msrb.mxu3 %v4213_v33 }
 0xf5c   : > { %3137 = vmatpush.bf16.msra.mxu1 %v4196_v34  ;;  %3176 = vmatpush.bf16.msrb.mxu0 %v4220_v37 }
 0xf5d   : > { %3150 = vmatpush.bf16.msrb.mxu2 %v4204_v38  ;;  %3163 = vmatpush.bf16.msrb.mxu3 %v4212_v36  ;;  %v4264_v38 = vld [vmem:[%s5435_s18 + $0x230] sm:$0xff] }
 0xf60   : > { %3138 = vmatpush.bf16.msra.mxu1 %v4195_v39  ;;  %3177 = vmatpush.bf16.msrb.mxu0 %v4219_v40  ;;  %v4288_v40 = vld [vmem:[%s5435_s18 + $0x2f0] sm:$0xff] }
 0xf61   : > { %3151 = vmatpush.bf16.msrb.mxu2 %v4203_v41  ;;  %3164 = vmatpush.bf16.msrb.mxu3 %v4211_v42  ;;  %v4273_v42 = vld [vmem:[%s5435_s18 + $0x278] sm:$0xff] }
 0xf64   : > { %3139 = vmatpush.bf16.msra.mxu1 %v4194_v43  ;;  %3178 = vmatpush.bf16.msrb.mxu0 %v4218_v44  ;;  %v4281_v44 = vld [vmem:[%s5435_s18 + $0x2b8] sm:$0xff] }
 0xf65   : > { %3152 = vmatpush.bf16.msrb.mxu2 %v4202_v47  ;;  %3165 = vmatpush.bf16.msrb.mxu3 %v4210_v48  ;;  %v4287_v47 = vld [vmem:[%s5435_s18 + $0x2e8] sm:$0xff]  ;;  %v1673_v48 = vperm.slane %v5180_v17, 4 }
 0xf68   : > { %3184 = vmatpush.bf16.msrb.mxu1 %v4233_v45  ;;  %3223 = vmatpush.bf16.msra.mxu0 %v4257_v46  ;;  %v4263_v46 = vld [vmem:[%s5435_s18 + $0x228] sm:$0xff] }
 0xf69   : > { %3197 = vmatpush.bf16.msra.mxu2 %v4241_v50  ;;  %3210 = vmatpush.bf16.msra.mxu3 %v4249_v51  ;;  %v1676_v51 = vperm.slane %v5180_v17, 7 }
 0xf6c   : > { %3185 = vmatpush.bf16.msrb.mxu1 %v4232_v52  ;;  %3224 = vmatpush.bf16.msra.mxu0 %v4256_v53  ;;  %v4272_v52 = vld [vmem:[%s5435_s18 + $0x270] sm:$0xff] }
 0xf6d   : > { %3198 = vmatpush.bf16.msra.mxu2 %v4240_v54  ;;  %3211 = vmatpush.bf16.msra.mxu3 %v4248_v55  ;;  %v4280_v54 = vld [vmem:[%s5435_s18 + $0x2b0] sm:$0xff] }
 0xf70   : > { %3186 = vmatpush.bf16.msrb.mxu1 %v4231_v49  ;;  %3225 = vmatpush.bf16.msra.mxu0 %v4255_v56  ;;  %v4262_v49 = vld [vmem:[%s5435_s18 + $0x220] sm:$0xff] }
 0xf71   : > { %3199 = vmatpush.bf16.msra.mxu2 %v4239_v57  ;;  %3212 = vmatpush.bf16.msra.mxu3 %v4247_v58  ;;  %v4286_v58 = vld [vmem:[%s5435_s18 + $0x2e0] sm:$0xff] }
 0xf74   : > { %3187 = vmatpush.bf16.msrb.mxu1 %v4230_v59  ;;  %3226 = vmatpush.bf16.msra.mxu0 %v4254_v60  ;;  %v4271_v60 = vld [vmem:[%s5435_s18 + $0x268] sm:$0xff] }
 0xf75   : > { %3200 = vmatpush.bf16.msra.mxu2 %v4238_v61  ;;  %3213 = vmatpush.bf16.msra.mxu3 %v4246_v62  ;;  %v4279_v62 = vld [vmem:[%s5435_s18 + $0x2a8] sm:$0xff] }
 0xf78   : > { %3188 = vmatpush.bf16.msrb.mxu1 %v4229_v0  ;;  %3227 = vmatpush.bf16.msra.mxu0 %v4253_v1  ;;  %v1674_v0 = vperm.slane %v5180_v17, 5 }
 0xf79   : > { %3201 = vmatpush.bf16.msra.mxu2 %v4237_v4  ;;  %3214 = vmatpush.bf16.msra.mxu3 %v4245_v5  ;;  %v4285_v5 = vld [vmem:[%s5435_s18 + $0x2d8] sm:$0xff] }
 0xf7c   : > { %3189 = vmatpush.bf16.msrb.mxu1 %v4228_v7  ;;  %3228 = vmatpush.bf16.msra.mxu0 %v4252_v3  ;;  %v1675_v7 = vperm.slane %v5180_v17, 6  ;;  %v4261_v3 = vld [vmem:[%s5435_s18 + $0x218] sm:$0xff] }
 0xf7d   : > { %3202 = vmatpush.bf16.msra.mxu2 %v4236_v9  ;;  %3215 = vmatpush.bf16.msra.mxu3 %v4244_v10  ;;  %v4270_v9 = vld [vmem:[%s5435_s18 + $0x260] sm:$0xff] }
 0xf80   : > { %3190 = vmatpush.bf16.msrb.mxu1 %v4227_v6  ;;  %3229 = vmatpush.bf16.msra.mxu0 %v4251_v8 }
 0xf81   : > { %3203 = vmatpush.bf16.msra.mxu2 %v4235_v13  ;;  %3216 = vmatpush.bf16.msra.mxu3 %v4243_v14 }
 0xf84   : > { %3191 = vmatpush.bf16.msrb.mxu1 %v4226_v11  ;;  %3230 = vmatpush.bf16.msra.mxu0 %v4250_v12  ;;  %v4278_v12 = vld [vmem:[%s5435_s18 + $0x2a0] sm:$0xff] }
 0xf85   : > { %3204 = vmatpush.bf16.msra.mxu2 %v4234_v15  ;;  %3217 = vmatpush.bf16.msra.mxu3 %v4242_v16  ;;  %v4260_v15 = vld [vmem:[%s5435_s18 + $0x210] sm:$0xff] }
 0xfa3   : > { %v1873_v20 = vpop.f32.mrf.mxu1 }
 0xfa4   : > { %v1874_v21 = vadd.f32 %v1873_v20, %v1669_v18  ;;  %v1912_v23 = vpop.f32.mrf.mxu0  ;;  %v4284_v18 = vld [vmem:[%s5435_s18 + $0x2d0] sm:$0xff]  ;;  %v4269_v20 = vld [vmem:[%s5435_s18 + $0x258] sm:$0xff] }
 0xfa5   : > { %v1913_v24 = vadd.f32 %v1912_v23, %v1672_v19 }
 0xfa6   : > { %v2072_v25 = vmax.f32 %v1874_v21, 0.0  ;;  %v5256_v21 = vld [vmem:[%s5434_s17 + $0x8] sm:$0xff] }
 0xfa7   : > { %v2075_v28 = vmax.f32 %v1913_v24, 0.0  ;;  %v4277_v24 = vld [vmem:[%s5435_s18 + $0x298] sm:$0xff] }
 0xfa8   : > { %v2088_v22 = vpack.c.bf16 %v2072_v25, %v2072_v25 }
 0xfa9   : > { %v2091_v30 = vpack.c.bf16 %v2075_v28, %v2075_v28  ;;  %v1886_v27 = vpop.f32.mrf.mxu2  ;;  %v4283_v28 = vld [vmem:[%s5435_s18 + $0x2c8] sm:$0xff] }
 0xfaa   : > { %v1887_v32 = vadd.f32 %v1886_v27, %v1670_v26  ;;  %v1899_v33 = vpop.f32.mrf.mxu3  ;;  %3140 = vmatmul.bf16.vlgmr.msra.gmra.mxu1 %v2088_v22  ;;  %v4259_v26 = vld [vmem:[%s5435_s18 + $0x208] sm:$0xff]  ;;  %v1680_v22 = vperm.slane %v5256_v21, 3  ;;  %v4276_v27 = vld [vmem:[%s5435_s18 + $0x290] sm:$0xff] }
 0xfab   : > { %v1900_v34 = vadd.f32 %v1899_v33, %v1671_v2  ;;  %3179 = vmatmul.bf16.vlgmr.msrb.gmra.mxu0 %v2091_v30  ;;  %3236 = vmatpush.bf16.msra.mxu1 %v4265_v63  ;;  %v1875_v37 = vpop.f32.mrf.mxu1  ;;  %v1677_v2 = vperm.slane %v5256_v21, 0  ;;  %v4258_v33 = vld [vmem:[%s5435_s18 + $0x200] sm:$0xff] }
 0xfac   : > { %v2073_v36 = vmax.f32 %v1887_v32, 0.0  ;;  %3275 = vmatpush.bf16.msrb.mxu0 %v4289_v29  ;;  %v1914_v39 = vpop.f32.mrf.mxu0  ;;  %v4268_v29 = vld [vmem:[%s5435_s18 + $0x250] sm:$0xff] }
 0xfad   : > { %v2074_v41 = vmax.f32 %v1900_v34, 0.0 }
 0xfae   : > { %v2089_v43 = vpack.c.bf16 %v2073_v36, %v2073_v36  ;;  %v4297_v36 = vld [vmem:[%s5435_s18 + $0x338] sm:$0xff] }
 0xfaf   : > { %v2090_v45 = vpack.c.bf16 %v2074_v41, %v2074_v41  ;;  %3237 = vmatpush.bf16.msra.mxu1 %v4264_v38  ;;  %v4282_v38 = vld [vmem:[%s5435_s18 + $0x2c0] sm:$0xff]  ;;  %v4267_v41 = vld [vmem:[%s5435_s18 + $0x248] sm:$0xff] }
 0xfb0   : > { %3276 = vmatpush.bf16.msrb.mxu0 %v4288_v40  ;;  %3153 = vmatmul.bf16.vlgmr.msrb.gmra.mxu2 %v2089_v43  ;;  %v4321_v40 = vld [vmem:[%s5435_s18 + $0x3f8] sm:$0xff]  ;;  %v4275_v43 = vld [vmem:[%s5435_s18 + $0x288] sm:$0xff] }
 0xfb1   : > { %3166 = vmatmul.bf16.vlgmr.msrb.gmra.mxu3 %v2090_v45  ;;  %3249 = vmatpush.bf16.msrb.mxu2 %v4273_v42  ;;  %v1888_v50 = vpop.f32.mrf.mxu2 }
 0xfb2   : > { %3262 = vmatpush.bf16.msrb.mxu3 %v4281_v44  ;;  %v1901_v53 = vpop.f32.mrf.mxu3  ;;  %v1678_v44 = vperm.slane %v5256_v21, 1 }
 0xfb3   : > { %3238 = vmatpush.bf16.msra.mxu1 %v4263_v46  ;;  %v1925_v55 = vpop.f32.mrf.mxu1  ;;  %v1679_v46 = vperm.slane %v5256_v21, 2  ;;  %v4266_v53 = vld [vmem:[%s5435_s18 + $0x240] sm:$0xff] }
 0xfb4   : > { %3277 = vmatpush.bf16.msrb.mxu0 %v4287_v47  ;;  %v1926_v56 = vadd.f32 %v1925_v55, %v1673_v48  ;;  %v1964_v57 = vpop.f32.mrf.mxu0  ;;  %v4296_v48 = vld [vmem:[%s5435_s18 + $0x330] sm:$0xff] }
 0xfb5   : > { %v1965_v59 = vadd.f32 %v1964_v57, %v1676_v51  ;;  %3250 = vmatpush.bf16.msrb.mxu2 %v4272_v52  ;;  %v4320_v52 = vld [vmem:[%s5435_s18 + $0x3f0] sm:$0xff] }
 0xfb6   : > { %v2076_v61 = vmax.f32 %v1926_v56, 0.0  ;;  %3263 = vmatpush.bf16.msrb.mxu3 %v4280_v54  ;;  %v4305_v56 = vld [vmem:[%s5435_s18 + $0x378] sm:$0xff] }
 0xfb7   : > { %v2079_v1 = vmax.f32 %v1965_v59, 0.0  ;;  %3239 = vmatpush.bf16.msra.mxu1 %v4262_v49  ;;  %v4274_v49 = vld [vmem:[%s5435_s18 + $0x280] sm:$0xff]  ;;  %v4313_v59 = vld [vmem:[%s5435_s18 + $0x3b8] sm:$0xff] }
 0xfb8   : > { %v2092_v4 = vpack.c.bf16 %v2076_v61, %v2076_v61  ;;  %3278 = vmatpush.bf16.msrb.mxu0 %v4286_v58 }
 0xfb9   : > { %v2095_v6 = vpack.c.bf16 %v2079_v1, %v2079_v1  ;;  %3251 = vmatpush.bf16.msrb.mxu2 %v4271_v60  ;;  %v1938_v8 = vpop.f32.mrf.mxu2  ;;  %v4319_v1 = vld [vmem:[%s5435_s18 + $0x3e8] sm:$0xff] }
 0xfba   : > { %3264 = vmatpush.bf16.msrb.mxu3 %v4279_v62  ;;  %v1939_v10 = vadd.f32 %v1938_v8, %v1674_v0  ;;  %v1951_v11 = vpop.f32.mrf.mxu3  ;;  %3192 = vmatmul.bf16.vlgmr.msrb.gmra.mxu1 %v2092_v4  ;;  %v4295_v62 = vld [vmem:[%s5435_s18 + $0x328] sm:$0xff] }
 0xfbb   : > { %v1952_v13 = vadd.f32 %v1951_v11, %v1675_v7  ;;  %3231 = vmatmul.bf16.vlgmr.msra.gmra.mxu0 %v2095_v6  ;;  %3240 = vmatpush.bf16.msra.mxu1 %v4261_v3  ;;  %v1927_v14 = vpop.f32.mrf.mxu1  ;;  %v4304_v3 = vld [vmem:[%s5435_s18 + $0x370] sm:$0xff]  ;;  %v4294_v6 = vld [vmem:[%s5435_s18 + $0x320] sm:$0xff]  ;;  %v4303_v11 = vld [vmem:[%s5435_s18 + $0x368] sm:$0xff] }
 0xfbc   : > { %v2077_v16 = vmax.f32 %v1939_v10, 0.0  ;;  %3279 = vmatpush.bf16.msrb.mxu0 %v4285_v5  ;;  %v1966_v17 = vpop.f32.mrf.mxu0  ;;  %v4312_v5 = vld [vmem:[%s5435_s18 + $0x3b0] sm:$0xff] }
 0xfbd   : > { %v2078_v19 = vmax.f32 %v1952_v13, 0.0  ;;  %3252 = vmatpush.bf16.msrb.mxu2 %v4270_v9  ;;  %v4318_v9 = vld [vmem:[%s5435_s18 + $0x3e0] sm:$0xff]  ;;  %v4311_v13 = vld [vmem:[%s5435_s18 + $0x3a8] sm:$0xff] }
 0xfbe   : > { %v2093_v23 = vpack.c.bf16 %v2077_v16, %v2077_v16  ;;  %3265 = vmatpush.bf16.msrb.mxu3 %v4278_v12  ;;  %v4317_v16 = vld [vmem:[%s5435_s18 + $0x3d8] sm:$0xff]  ;;  %v4302_v17 = vld [vmem:[%s5435_s18 + $0x360] sm:$0xff] }
 0xfbf   : > { %v2094_v25 = vpack.c.bf16 %v2078_v19, %v2078_v19  ;;  %3241 = vmatpush.bf16.msra.mxu1 %v4260_v15  ;;  %v4293_v15 = vld [vmem:[%s5435_s18 + $0x318] sm:$0xff]  ;;  %v4292_v19 = vld [vmem:[%s5435_s18 + $0x310] sm:$0xff] }
 0xfc0   : > { %3280 = vmatpush.bf16.msrb.mxu0 %v4284_v18  ;;  %3205 = vmatmul.bf16.vlgmr.msra.gmra.mxu2 %v2093_v23  ;;  %v4310_v18 = vld [vmem:[%s5435_s18 + $0x3a0] sm:$0xff] }
 0xfc1   : > { %3218 = vmatmul.bf16.vlgmr.msra.gmra.mxu3 %v2094_v25  ;;  %3253 = vmatpush.bf16.msrb.mxu2 %v4269_v20  ;;  %v1940_v63 = vpop.f32.mrf.mxu2  ;;  %v1681_v20 = vperm.slane %v5256_v21, 4  ;;  %v1684_v25 = vperm.slane %v5256_v21, 7 }
 0xfc2   : > { %3266 = vmatpush.bf16.msrb.mxu3 %v4277_v24  ;;  %v1953_v30 = vpop.f32.mrf.mxu3  ;;  %v4316_v24 = vld [vmem:[%s5435_s18 + $0x3d0] sm:$0xff]  ;;  %v4309_v63 = vld [vmem:[%s5435_s18 + $0x398] sm:$0xff] }
 0xfc3   : > { %3242 = vmatpush.bf16.msra.mxu1 %v4259_v26  ;;  %v1977_v32 = vpop.f32.mrf.mxu1 }
 0xfc4   : > { %3281 = vmatpush.bf16.msrb.mxu0 %v4283_v28  ;;  %v1978_v34 = vadd.f32 %v1977_v32, %v1677_v2  ;;  %v2016_v37 = vpop.f32.mrf.mxu0  ;;  %v4301_v28 = vld [vmem:[%s5435_s18 + $0x358] sm:$0xff] }
 0xfc5   : > { %v2017_v39 = vadd.f32 %v2016_v37, %v1680_v22  ;;  %3254 = vmatpush.bf16.msrb.mxu2 %v4268_v29  ;;  %v4291_v29 = vld [vmem:[%s5435_s18 + $0x308] sm:$0xff]  ;;  %v4308_v37 = vld [vmem:[%s5435_s18 + $0x390] sm:$0xff] }
 0xfc6   : > { %v2080_v42 = vmax.f32 %v1978_v34, 0.0  ;;  %3267 = vmatpush.bf16.msrb.mxu3 %v4276_v27  ;;  %v4315_v27 = vld [vmem:[%s5435_s18 + $0x3c8] sm:$0xff]  ;;  %v1682_v34 = vperm.slane %v5256_v21, 5 }
 0xfc7   : > { %v2083_v45 = vmax.f32 %v2017_v39, 0.0  ;;  %3243 = vmatpush.bf16.msra.mxu1 %v4258_v33  ;;  %v4300_v33 = vld [vmem:[%s5435_s18 + $0x350] sm:$0xff] }
 0xfc8   : > { %v2096_v47 = vpack.c.bf16 %v2080_v42, %v2080_v42  ;;  %3282 = vmatpush.bf16.msrb.mxu0 %v4282_v38  ;;  %v1683_v38 = vperm.slane %v5256_v21, 6 }
 0xfc9   : > { %v2099_v50 = vpack.c.bf16 %v2083_v45, %v2083_v45  ;;  %3255 = vmatpush.bf16.msrb.mxu2 %v4267_v41  ;;  %v1990_v51 = vpop.f32.mrf.mxu2  ;;  %v4314_v41 = vld [vmem:[%s5435_s18 + $0x3c0] sm:$0xff]  ;;  %v4307_v45 = vld [vmem:[%s5435_s18 + $0x388] sm:$0xff] }
 0xfca   : > { %3268 = vmatpush.bf16.msrb.mxu3 %v4275_v43  ;;  %v1991_v54 = vadd.f32 %v1990_v51, %v1678_v44  ;;  %v2003_v55 = vpop.f32.mrf.mxu3  ;;  %3244 = vmatmul.bf16.vlgmr.msra.gmra.mxu1 %v2096_v47  ;;  %v4299_v44 = vld [vmem:[%s5435_s18 + $0x348] sm:$0xff] }
 0xfcb   : > { %3288 = vmatpush.bf16.msrb.mxu1 %v4297_v36  ;;  %v2004_v57 = vadd.f32 %v2003_v55, %v1679_v46  ;;  %3283 = vmatmul.bf16.vlgmr.msrb.gmra.mxu0 %v2099_v50  ;;  %v1979_v58 = vpop.f32.mrf.mxu1  ;;  %v4290_v36 = vld [vmem:[%s5435_s18 + $0x300] sm:$0xff] }
 0xfcc   : > { %3327 = vmatpush.bf16.msra.mxu0 %v4321_v40  ;;  %v2081_v60 = vmax.f32 %v1991_v54, 0.0  ;;  %v2018_v61 = vpop.f32.mrf.mxu0  ;;  %v4298_v50 = vld [vmem:[%s5435_s18 + $0x340] sm:$0xff] }
 0xfcd   : > { %v2082_v0 = vmax.f32 %v2004_v57, 0.0  ;;  %3256 = vmatpush.bf16.msrb.mxu2 %v4266_v53 }
 0xfce   : > { %v2097_v7 = vpack.c.bf16 %v2081_v60, %v2081_v60  ;;  %3269 = vmatpush.bf16.msrb.mxu3 %v4274_v49 }
 0xfcf   : > { %3289 = vmatpush.bf16.msrb.mxu1 %v4296_v48  ;;  %v2098_v4 = vpack.c.bf16 %v2082_v0, %v2082_v0 }
 0xfd0   : > { %3328 = vmatpush.bf16.msra.mxu0 %v4320_v52  ;;  %3257 = vmatmul.bf16.vlgmr.msrb.gmra.mxu2 %v2097_v7  ;;  %v4306_v52 = vld [vmem:[%s5435_s18 + $0x380] sm:$0xff] }
 0xfd1   : > { %3301 = vmatpush.bf16.msra.mxu2 %v4305_v56  ;;  %3270 = vmatmul.bf16.vlgmr.msrb.gmra.mxu3 %v2098_v4  ;;  %v1992_v8 = vpop.f32.mrf.mxu2  ;;  %v4351_v4 = vld [vmem:[%s5436_s19] ss:$0 sm:$0xff] }
 0xfd2   : > { %3314 = vmatpush.bf16.msra.mxu3 %v4313_v59  ;;  %v2005_v10 = vpop.f32.mrf.mxu3 }
 0xfd3   : > { %3290 = vmatpush.bf16.msrb.mxu1 %v4295_v62  ;;  %v2029_v12 = vpop.f32.mrf.mxu1 }
 0xfd4   : > { %3329 = vmatpush.bf16.msra.mxu0 %v4319_v1  ;;  %v2068_v14 = vpop.f32.mrf.mxu0  ;;  %v2030_v30 = vadd.f32 %v2029_v12, %v1681_v20 }
 0xfd5   : > { %3302 = vmatpush.bf16.msra.mxu2 %v4304_v3  ;;  %v2069_v32 = vadd.f32 %v2068_v14, %v1684_v25 }
 0xfd6   : > { %3315 = vmatpush.bf16.msra.mxu3 %v4312_v5  ;;  %v2084_v39 = vmax.f32 %v2030_v30, 0.0 }
 0xfd7   : > { %3291 = vmatpush.bf16.msrb.mxu1 %v4294_v6  ;;  %v2087_v42 = vmax.f32 %v2069_v32, 0.0 }
 0xfd8   : > { %3330 = vmatpush.bf16.msra.mxu0 %v4318_v9  ;;  %v2100_v47 = vpack.c.bf16 %v2084_v39, %v2084_v39 }
 0xfd9   : > { %3303 = vmatpush.bf16.msra.mxu2 %v4303_v11  ;;  %v2042_v23 = vpop.f32.mrf.mxu2  ;;  %v2103_v48 = vpack.c.bf16 %v2087_v42, %v2087_v42 }
 0xfda   : > { %3316 = vmatpush.bf16.msra.mxu3 %v4311_v13  ;;  %v2055_v26 = vpop.f32.mrf.mxu3  ;;  %v2043_v21 = vadd.f32 %v2042_v23, %v1682_v34 }
 0xfdb   : > { %3292 = vmatpush.bf16.msrb.mxu1 %v4293_v15  ;;  %v2031_v2 = vpop.f32.mrf.mxu1  ;;  %v2056_v46 = vadd.f32 %v2055_v26, %v1683_v38 }
 0xfdc   : > { %3331 = vmatpush.bf16.msra.mxu0 %v4317_v16  ;;  %v2070_v22 = vpop.f32.mrf.mxu0  ;;  %v2085_v51 = vmax.f32 %v2043_v21, 0.0 }
 0xfdd   : > { %3304 = vmatpush.bf16.msra.mxu2 %v4302_v17  ;;  %v2086_v53 = vmax.f32 %v2056_v46, 0.0 }
 0xfde   : > { %3317 = vmatpush.bf16.msra.mxu3 %v4310_v18  ;;  %v2101_v54 = vpack.c.bf16 %v2085_v51, %v2085_v51 }
 0xfdf   : > { %3293 = vmatpush.bf16.msrb.mxu1 %v4292_v19  ;;  %v2102_v55 = vpack.c.bf16 %v2086_v53, %v2086_v53 }
 0xfe0   : > { %3332 = vmatpush.bf16.msra.mxu0 %v4316_v24 }
 0xfe1   : > { %3305 = vmatpush.bf16.msra.mxu2 %v4301_v28  ;;  %v2044_v40 = vpop.f32.mrf.mxu2 }
 0xfe2   : > { %3318 = vmatpush.bf16.msra.mxu3 %v4309_v63  ;;  %v2057_v43 = vpop.f32.mrf.mxu3 }
 0xfe3   : > { %3294 = vmatpush.bf16.msrb.mxu1 %v4291_v29 }
 0xfe4   : > { %3333 = vmatpush.bf16.msra.mxu0 %v4315_v27 }
 0xfe5   : > { %3306 = vmatpush.bf16.msra.mxu2 %v4300_v33 }
 0xfe6   : > { %3319 = vmatpush.bf16.msra.mxu3 %v4308_v37 }
 0xfe7   : > { %3295 = vmatpush.bf16.msrb.mxu1 %v4290_v36 }
 0xfe8   : > { %3334 = vmatpush.bf16.msra.mxu0 %v4314_v41 }
 0xfe9   : > { %3307 = vmatpush.bf16.msra.mxu2 %v4299_v44 }
 0xfea   : > { %3320 = vmatpush.bf16.msra.mxu3 %v4307_v45  ;;  %3296 = vmatmul.bf16.vlgmr.msrb.gmra.mxu1 %v2100_v47 }
 0xfeb   : > { %3335 = vmatmul.bf16.vlgmr.msra.gmra.mxu0 %v2103_v48 }
 0xfed   : > { %3308 = vmatpush.bf16.msra.mxu2 %v4298_v50 }
 0xfee   : > { %3321 = vmatpush.bf16.msra.mxu3 %v4306_v52 }
 0xff0   : > { %3309 = vmatmul.bf16.vlgmr.msra.gmra.mxu2 %v2101_v54 }
 0xff1   : > { %3322 = vmatmul.bf16.vlgmr.msra.gmra.mxu3 %v2102_v55 }
0x1027   : > { %v3141_v49 = vpop.f32.mrf.mxu1 }
0x1028   : > { %v3180_v56 = vpop.f32.mrf.mxu0  ;;  %v3142_v8 = vadd.f32 %v4351_v4, %v3141_v49 }
0x102f   : > { %v3143_v57 = vpop.f32.mrf.mxu1 }
0x1030   : > { %v3182_v58 = vpop.f32.mrf.mxu0  ;;  %v4352_v57 = vld [vmem:[%s5437_s20] ss:$0 sm:$0xff] }
0x1033   : > { %v3154_v59 = vpop.f32.mrf.mxu2 }
0x1034   : > { %v3167_v60 = vpop.f32.mrf.mxu3  ;;  %v3155_v11 = vadd.f32 %v3154_v59, %v3142_v8 }
0x1036   : > { %v3168_v14 = vadd.f32 %v3167_v60, %v3155_v11 }
0x1037   : > { %v3193_v61 = vpop.f32.mrf.mxu1 }
0x1038   : > { %v3232_v62 = vpop.f32.mrf.mxu0  ;;  %v3181_v17 = vadd.f32 %v3180_v56, %v3168_v14 }
0x103a   : > { %v3194_v20 = vadd.f32 %v3193_v61, %v3181_v17 }
0x103b   : > { %v3156_v0 = vpop.f32.mrf.mxu2 }
0x103c   : > { %v3169_v1 = vpop.f32.mrf.mxu3 }
0x103f   : > { %v3195_v7 = vpop.f32.mrf.mxu1 }
0x1040   : > { %v3234_v3 = vpop.f32.mrf.mxu0 }
0x1043   : > { %v3206_v5 = vpop.f32.mrf.mxu2 }
0x1044   : > { %v3219_v6 = vpop.f32.mrf.mxu3  ;;  %v3207_v23 = vadd.f32 %v3206_v5, %v3194_v20 }
0x1046   : > { %v3220_v24 = vadd.f32 %v3219_v6, %v3207_v23 }
0x1047   : > { %v3245_v9 = vpop.f32.mrf.mxu1 }
0x1048   : > { %v3284_v10 = vpop.f32.mrf.mxu0  ;;  %v3233_v28 = vadd.f32 %v3232_v62, %v3220_v24 }
0x104a   : > { %v3246_v2 = vadd.f32 %v3245_v9, %v3233_v28 }
0x104b   : > { %v3208_v12 = vpop.f32.mrf.mxu2 }
0x104c   : > { %v3221_v13 = vpop.f32.mrf.mxu3 }
0x104f   : > { %v3247_v15 = vpop.f32.mrf.mxu1 }
0x1050   : > { %v3286_v16 = vpop.f32.mrf.mxu0 }
0x1053   : > { %v3258_v18 = vpop.f32.mrf.mxu2 }
0x1054   : > { %v3271_v19 = vpop.f32.mrf.mxu3  ;;  %v3259_v22 = vadd.f32 %v3258_v18, %v3246_v2 }
0x1056   : > { %v3272_v30 = vadd.f32 %v3271_v19, %v3259_v22 }
0x1058   : > { %v3285_v32 = vadd.f32 %v3284_v10, %v3272_v30 }
0x105b   : > { %v3260_v25 = vpop.f32.mrf.mxu2 }
0x105c   : > { %v3273_v26 = vpop.f32.mrf.mxu3 }
0x1067   : > { %v3297_v63 = vpop.f32.mrf.mxu1 }
0x1068   : > { %v3336_v29 = vpop.f32.mrf.mxu0  ;;  %v3298_v34 = vadd.f32 %v3297_v63, %v3285_v32 }
0x106f   : > { %v3299_v27 = vpop.f32.mrf.mxu1 }
0x1070   : > { %v3338_v33 = vpop.f32.mrf.mxu0 }
0x1073   : > { %v3310_v37 = vpop.f32.mrf.mxu2 }
0x1074   : > { %v3311_v38 = vadd.f32 %v3310_v37, %v3298_v34  ;;  %v3323_v36 = vpop.f32.mrf.mxu3 }
0x1076   : > { %v3324_v39 = vadd.f32 %v3323_v36, %v3311_v38 }
0x1078   : > { %v3337_v40 = vadd.f32 %v3336_v29, %v3324_v39 }
0x107a   : > { %v3340_v41 = vadd.f32 %v3337_v40, %v4866_v31 }
0x107b   : > { %v3312_v42 = vpop.f32.mrf.mxu2 }
0x107c   : > { %v3325_v43 = vpop.f32.mrf.mxu3  ;;  %v3343_v44 = vsel %vm720_vm0, %v3340_v41, 0.0 }
0x107d   : > { %3344 = vadd.xlane.f32.xlu2 %v3343_v44 }
0x10f0   : > { %v3345_v21 = vpop.xlane.xlu2 %3344 }
0x10f1   : > { %v3346_v45 = vmul.f32 %v3345_v21, %v4641_v35 }
0x10f3   : > { %v3347_v46 = vsub.f32 %v3340_v41, %v3346_v45 }
0x10f5   : > { %v3348_v47 = vmul.f32 %v3347_v46, %v3347_v46 }
0x10f7   : > { %v3349_v48 = vsel %vm720_vm0, %v3348_v47, 0.0 }
0x10f8   : > { %3350 = vadd.xlane.f32.xlu0 %v3349_v48 }
0x116b   : > { %v3351_v50 = vpop.xlane.xlu0 %3350 }
0x116c   : > { %v3352_v51 = vmul.f32 %v3351_v50, %v4641_v35  ;;  %v4353_v35 = vld [vmem:[%s5438_s21] ss:$0 sm:$0xff] }
0x116e   : > { %v3353_v52 = vadd.f32 1e-05, %v3352_v51 }
0x1170   : > { %4392 = vrsqrt.f32 %v3353_v52  ;;  %vm3360_vm15 = vweird.f32 %v3353_v52 }
0x1176   : > { %v4393_v31 = vpop.eup %4392 }
0x1177   : > { %v3355_v53 = vmul.f32 %v4393_v31, %v3353_v52  ;;  %vm3361_vm14 = vweird.f32 %v4393_v31 }
0x1178   : > { %vm3362_vm3 = vmor %vm3360_vm15, %vm3361_vm14 }
0x1179   : > { %v3356_v54 = vmul.f32 %v4393_v31, %v3355_v53 }
0x117b   : > { %v3357_v55 = vmul.f32 0.5, %v3356_v54 }
0x117d   : > { %v3358_v49 = vsub.f32 1.5, %v3357_v55 }
0x117f   : > { %v3359_v56 = vmul.f32 %v4393_v31, %v3358_v49 }
0x1181   : > { %v3363_v58 = vsel %vm3362_vm3, %v4393_v31, %v3359_v56 }
0x1182   : > { %v3364_v59 = vmul.f32 %v3363_v58, %v3347_v46 }
0x1184   : > { %v3368_v60 = vmul.f32 %v4352_v57, %v3364_v59 }
0x1186   : > { %v3372_v61 = vadd.f32 %v4353_v35, %v3368_v60 }
0x1188   : > { %3373 = vst.msk [vmem:[%s695_s24] sm:$0xff] %vm720_vm0, %v3372_v61 }
0x1189 PF: > { %s32_s3 = sadd.s32 1, %s4400_s3  }
0x118a   : > { %p29_p4 = scmp.ge.s32.totalorder %s32_s3, 4  }
0x118c   :  { %31 = sbr.rel (!%p29_p4) target bundleno = 8 (0x8), region = 141 }

</bundles_post_ra>
